<compile_context>
chip_gen: v7x
topology: tpu7x:2x2x1
jax: 0.10.0
libtpu: 0.0.40
codegen_flags: <defaults>
</compile_context>

<pallas_src>
import functools

import jax
import jax.numpy as jnp
import numpy as np
from jax.experimental import pallas as pl
from jax.experimental.pallas import tpu as pltpu

NEG_SLOPE = 0.01   # PyTorch nn.LeakyReLU default
BN_EPS = 1e-5      # PyTorch nn.BatchNorm1d default


def _dnn_kernel(x_ref, w1_ref, b1_ref, w2_ref, o_ref):
    """One batch tile: x (tm, D) -> output (1, 1, tm) f32 (lane-dense)."""
    # In-kernel bf16 cast of the activation tile (no-op if x is already bf16);
    # layer 1 runs on the MXU with f32 accumulation.
    x = x_ref[...].astype(jnp.bfloat16)
    h = jnp.dot(x, w1_ref[...], preferred_element_type=jnp.float32)
    h = h + b1_ref[...]                        # folded BatchNorm + bias (f32)
    h = jnp.maximum(h, NEG_SLOPE * h)          # LeakyReLU
    # Layer 2 (H -> 1): VPU multiply + XLU lane reduce; keeps the MXU free.
    y = jnp.sum(h * w2_ref[...], axis=-1)      # (tm,)
    o_ref[...] = y.reshape(o_ref.shape)        # (1, 1, tm) lane-dense store


@functools.partial(jax.jit, static_argnames=("block_rows",))
def dnn_forward(x, w1, b1, gamma, beta, running_mean, running_var, w2, b2,
                *, block_rows=512):
    """Eval-mode forward of DNN(input_dim=D, layers=(H,), output_dim=1).

    Parameters mirror the PyTorch module:
      x: (B, D) f32 or bf16;  w1: (H, D), b1: (H,);  BN buffers: (H,) each;
      w2: (1, H), b2: (1,).   Returns (B, 1) f32.
    """
    B, D = x.shape
    H = w1.shape[0]

    # ---- Host-side folding: BatchNorm (running stats) + Linear-1 bias ----
    scale = gamma / jnp.sqrt(running_var + BN_EPS)                 # (H,)
    shift = beta - running_mean * scale                            # (H,)
    w1_folded = (w1.T * scale[None, :]).astype(jnp.bfloat16)       # (D, H)
    b1_folded = (b1 * scale + shift).astype(jnp.float32).reshape(1, H)
    w2_row = w2.reshape(1, H).astype(jnp.float32)

    # ---- Grid over the batch only; ragged tail handled by the grid ----
    tm = block_rows
    n_blocks = (B + tm - 1) // tm      # no pad copy of x; tail rows are junk

    cost = pl.CostEstimate(
        flops=2 * B * D * H + 6 * B * H,          # matmul + epilogue
        transcendentals=0,
        bytes_accessed=(B * D * x.dtype.itemsize  # x streamed once
                        + D * H * 2               # bf16 W1' (resident)
                        + 2 * H * 4               # b1', w2
                        + n_blocks * tm * 4),     # output slab
    )

    out = pl.pallas_call(
        _dnn_kernel,
        out_shape=jax.ShapeDtypeStruct((n_blocks, 1, tm), jnp.float32),
        grid=(n_blocks,),
        in_specs=[
            pl.BlockSpec((tm, D), lambda i: (i, 0)),   # x: tiled over batch
            pl.BlockSpec((D, H), lambda i: (0, 0)),    # W1': VMEM-resident
            pl.BlockSpec((1, H), lambda i: (0, 0)),    # b1': VMEM-resident
            pl.BlockSpec((1, H), lambda i: (0, 0)),    # w2 : VMEM-resident
        ],
        out_specs=pl.BlockSpec((1, 1, tm), lambda i: (i, 0, 0)),
        compiler_params=pltpu.CompilerParams(
            dimension_semantics=("parallel",)),
        cost_estimate=cost,
    )(x, w1_folded, b1_folded, w2_row)

    # Un-tile, drop the ragged-tail junk rows, restore (B, 1), add output bias.
    y = out.reshape(-1)[:B].reshape(B, 1) + b2.reshape(1, 1)
    return y


def _reference_f64(x, w1, b1, gamma, beta, running_mean, running_var, w2, b2):
    """Pure numpy float64 reference of the PyTorch eval-mode forward."""
    x = np.asarray(x, np.float64)
    w1 = np.asarray(w1, np.float64)
    b1 = np.asarray(b1, np.float64)
    gamma = np.asarray(gamma, np.float64)
    beta = np.asarray(beta, np.float64)
    mean = np.asarray(running_mean, np.float64)
    var = np.asarray(running_var, np.float64)
    w2 = np.asarray(w2, np.float64)
    b2 = np.asarray(b2, np.float64)
    h = x @ w1.T + b1
    h = (h - mean) / np.sqrt(var + BN_EPS) * gamma + beta
    h = np.where(h >= 0, h, NEG_SLOPE * h)
    return h @ w2.T + b2


if __name__ == "__main__":
    # Shapes consistent with the module defaults (layers=(512,)); B is not a
    # tile multiple so the ragged-tail path is exercised, and B=1000 @ tm=512
    # gives an even 2-block "parallel" grid (both v7x TensorCores get work).
    B, D, H = 1000, 64, 512

    key = jax.random.PRNGKey(0)
    keys = jax.random.split(key, 8)
    x = jax.random.normal(keys[0], (B, D), jnp.float32)
    # Kaiming-normal(fan_in, a=0.1) like the module's _weight_init.
    gain = float(np.sqrt(2.0 / (1.0 + 0.1 ** 2)))
    w1 = jax.random.normal(keys[1], (H, D), jnp.float32) * (gain / np.sqrt(D))
    b1 = jax.random.uniform(keys[2], (H,), jnp.float32, -0.1, 0.1)
    gamma = jax.random.uniform(keys[3], (H,), jnp.float32, 0.5, 1.5)
    beta = jax.random.uniform(keys[4], (H,), jnp.float32, -0.2, 0.2)
    running_mean = jax.random.normal(keys[5], (H,), jnp.float32) * 0.5
    running_var = jax.random.uniform(keys[6], (H,), jnp.float32, 0.5, 1.5)
    w2 = jax.random.normal(keys[7], (1, H), jnp.float32) * (gain / np.sqrt(H))
    b2 = jnp.zeros((1,), jnp.float32)

    out = dnn_forward(x, w1, b1, gamma, beta, running_mean, running_var, w2, b2)
    out = np.asarray(jax.block_until_ready(out))

    # Check 1 (tight): reference using the exact bf16-quantized layer-1 inputs
    # the kernel sees -> only f32 accumulation-order differences remain.
    scale_j = gamma / jnp.sqrt(running_var + BN_EPS)
    w1f_bf16 = (w1.T * scale_j[None, :]).astype(jnp.bfloat16)
    b1f_f32 = (b1 * scale_j + beta - running_mean * scale_j).astype(jnp.float32)
    x_q = np.asarray(x.astype(jnp.bfloat16)).astype(np.float64)
    w1f_q = np.asarray(w1f_bf16).astype(np.float64)
    h_q = x_q @ w1f_q + np.asarray(b1f_f32, np.float64)
    h_q = np.where(h_q >= 0, h_q, NEG_SLOPE * h_q)
    ref_q = h_q @ np.asarray(w2, np.float64).T + np.asarray(b2, np.float64)
    np.testing.assert_allclose(out, ref_q, rtol=5e-3, atol=5e-3)

    # Check 2 (loose): full-precision PyTorch-equivalent math; the gap is the
    # deliberate bf16 quantization of x and W1'.
    ref = _reference_f64(x, w1, b1, gamma, beta, running_mean, running_var, w2, b2)
    np.testing.assert_allclose(out, ref, rtol=1e-1, atol=1e-1)

    print("KERNEL_OK")
</pallas_src>

<mosaic_0001>
module attributes {stable_mosaic.version = 11 : i64} {
  func.func @_dnn_kernel(%arg0: i32, %arg1: memref<512x64xf32, #tpu.memory_space<vmem>>, %arg2: memref<64x512xbf16, #tpu.memory_space<vmem>>, %arg3: memref<1x512xf32, #tpu.memory_space<vmem>>, %arg4: memref<1x512xf32, #tpu.memory_space<vmem>>, %arg5: memref<1x1x512xf32, #tpu.memory_space<vmem>>) attributes {dimension_semantics = [#tpu.dimension_semantics<parallel>], iteration_bounds = array<i64: 2>, scalar_prefetch = 0 : i64, scratch_operands = 0 : i64, tpu.core_type = #tpu.core_type<tc>, window_params = [{transform_indices = @transform_0, window_bounds = array<i64: 512, 64>}, {pipeline_mode = #tpu.pipeline_mode<synchronous>, transform_indices = @transform_1, window_bounds = array<i64: 64, 512>}, {pipeline_mode = #tpu.pipeline_mode<synchronous>, transform_indices = @transform_2, window_bounds = array<i64: 1, 512>}, {pipeline_mode = #tpu.pipeline_mode<synchronous>, transform_indices = @transform_3, window_bounds = array<i64: 1, 512>}, {transform_indices = @transform_4, window_bounds = array<i64: 1, 1, 512>}]} {
    %c0 = arith.constant 0 : index
    %c0_0 = arith.constant 0 : index
    %0 = vector.load %arg1[%c0, %c0_0] : memref<512x64xf32, #tpu.memory_space<vmem>>, vector<512x64xf32>
    %1 = arith.truncf %0 : vector<512x64xf32> to vector<512x64xbf16>
    %c0_1 = arith.constant 0 : index
    %c0_2 = arith.constant 0 : index
    %2 = vector.load %arg2[%c0_1, %c0_2] : memref<64x512xbf16, #tpu.memory_space<vmem>>, vector<64x512xbf16>
    %cst = arith.constant dense<0.000000e+00> : vector<512x512xf32>
    %3 = tpu.matmul %1, %2, %cst {dimension_numbers = #tpu.dot_dimension_numbers<[1], [0], [0], [1], [0, 0, 1, 1], [], []>} : vector<512x64xbf16>, vector<64x512xbf16>, vector<512x512xf32> -> vector<512x512xf32>
    %c0_3 = arith.constant 0 : index
    %c0_4 = arith.constant 0 : index
    %4 = vector.load %arg3[%c0_3, %c0_4] : memref<1x512xf32, #tpu.memory_space<vmem>>, vector<1x512xf32>
    %5 = vector.broadcast %4 : vector<1x512xf32> to vector<512x512xf32>
    %6 = arith.addf %3, %5 : vector<512x512xf32>
    %cst_5 = arith.constant 0.00999999977 : f32
    %7 = vector.broadcast %cst_5 : f32 to vector<512x512xf32>
    %8 = arith.mulf %7, %6 : vector<512x512xf32>
    %9 = arith.maximumf %6, %8 : vector<512x512xf32>
    %c0_6 = arith.constant 0 : index
    %c0_7 = arith.constant 0 : index
    %10 = vector.load %arg4[%c0_6, %c0_7] : memref<1x512xf32, #tpu.memory_space<vmem>>, vector<1x512xf32>
    %11 = vector.broadcast %10 : vector<1x512xf32> to vector<512x512xf32>
    %12 = arith.mulf %9, %11 : vector<512x512xf32>
    %cst_8 = arith.constant dense<0.000000e+00> : vector<512xf32>
    %13 = vector.multi_reduction <add>, %12, %cst_8 [1] : vector<512x512xf32> to vector<512xf32>
    %14 = vector.shape_cast %13 : vector<512xf32> to vector<1x1x512xf32>
    %c0_9 = arith.constant 0 : index
    %c0_10 = arith.constant 0 : index
    %c0_11 = arith.constant 0 : index
    %15 = vector.load %arg5[%c0_9, %c0_10, %c0_11] : memref<1x1x512xf32, #tpu.memory_space<vmem>>, vector<1x1x512xf32>
    tpu.vector_store %arg5[%c0_9, %c0_10, %c0_11], %14 {strides = array<i32>} : memref<1x1x512xf32, #tpu.memory_space<vmem>>, vector<1x1x512xf32>,
    return
  }
  func.func @transform_0(%arg0: i32) -> (i32, i32) {
    %c0_i32 = arith.constant 0 : i32
    %c0_i32_0 = arith.constant 0 : i32
    return %arg0, %c0_i32 : i32, i32
  }
  func.func @transform_1(%arg0: i32) -> (i32, i32) {
    %c0_i32 = arith.constant 0 : i32
    %c0_i32_0 = arith.constant 0 : i32
    %c0_i32_1 = arith.constant 0 : i32
    return %c0_i32, %c0_i32_0 : i32, i32
  }
  func.func @transform_2(%arg0: i32) -> (i32, i32) {
    %c0_i32 = arith.constant 0 : i32
    %c0_i32_0 = arith.constant 0 : i32
    %c0_i32_1 = arith.constant 0 : i32
    return %c0_i32, %c0_i32_0 : i32, i32
  }
  func.func @transform_3(%arg0: i32) -> (i32, i32) {
    %c0_i32 = arith.constant 0 : i32
    %c0_i32_0 = arith.constant 0 : i32
    %c0_i32_1 = arith.constant 0 : i32
    return %c0_i32, %c0_i32_0 : i32, i32
  }
  func.func @transform_4(%arg0: i32) -> (i32, i32, i32) {
    %c0_i32 = arith.constant 0 : i32
    %c0_i32_0 = arith.constant 0 : i32
    %c0_i32_1 = arith.constant 0 : i32
    return %arg0, %c0_i32, %c0_i32_0 : i32, i32, i32
  }
}

</mosaic_0001>

<bundles_post_ra>
// kernel: dnn_forward.1
= control target key start
LH: loop header
LB: loop body
LE: loop exit
PB: predicated region body
PF: predicated region fallthrough
CT: control target
= control target key end

     0   :  { %s8378_s15 = smov 0   ;;  %s12251_s0 = inlined_call_operand.vmem [shape: f32[1000,64], index: 0, kind: input, shape index: {}]   ;;  %s12252_s1 = inlined_call_operand.vmem [shape: bf16[64,512], index: 1, kind: input, shape index: {}]   ;;  %s12253_s2 = inlined_call_operand.vmem [shape: f32[1,512], index: 2, kind: input, shape index: {}]   ;;  %s12254_s3 = inlined_call_operand.vmem [shape: f32[1,512], index: 3, kind: input, shape index: {}]   ;;  %s12255_s4 = inlined_call_operand.vmem [shape: f32[2,1,512], index: 4, kind: output, shape index: {}]  }
   0x1 LB: > { %s8384_s16 = sadd.s32 4294967295, %s8349_s15   ;;  %p8221_p0 = scmp.ge.s32.totalorder %s8349_s15, 1  ;;  %s8349_s15 = sphi %s8378_s15, %s14_s15  }
   0x2   : > { %p171_p1 = scmp.lt.s32.totalorder %s8349_s15, 3 }
   0x4   : > { %p172_p2 = pnand %p8221_p0, %p171_p1 }
   0x6   : > { %175 = sbr.rel (%p172_p2) target bundleno = 1386 (0x56a), region = 36 }
   0xd   : > { %v8319_v0 = vld [vmem:[%s12252_s1 + $0x4] ss:$16 sps:$4 sm:$0xff]   ;;  %s8222_s19 = sshll.u32 %s8384_s16, 6  ;;  %v8321_v1 = vld [vmem:[%s12252_s1 + $0xc] ss:$16 sps:$4 sm:$0xff]   ;;  %v12258_v2 = vmov 0  }
   0xe   : > { %562 = vmatprep.mubr.bf16.mxu0 %v12258_v2  ;;  %915 = vmatprep.mubr.bf16.mxu1 %v12258_v2  ;;  %p205_p3 = scmp.lt.s32.totalorder %s8222_s19, 124  ;;  %v8323_v3 = vld [vmem:[%s12252_s1] ss:$16 sps:$4 sm:$0xff]   ;;  %v8324_v4 = vld [vmem:[%s12252_s1 + $0x8] ss:$16 sps:$4 sm:$0xff]   ;;  %vm433_vm0 = vcmask 523264  }
   0xf   : > { %530 = vmatprep.subr.bf16.mxu0 %v8319_v0  ;;  %8318 = vset.pattern.permute.xlu1 %v12258_v2  ;;  %v8325_v5 = vld [vmem:[%s12252_s1 + $0x24] ss:$16 sps:$4 sm:$0xff]   ;;  %v8327_v6 = vld [vmem:[%s12252_s1 + $0x2c] ss:$16 sps:$4 sm:$0xff]   ;;  %v8329_v7 = vld [vmem:[%s12252_s1 + $0x20] ss:$16 sps:$4 sm:$0xff]  }
  0x10   : > { %883 = vmatprep.subr.bf16.mxu1 %v8321_v1  ;;  %s12544_s19 = smov (!%p205_p3, %s8222_s19), 124  ;;  %8317 = vset.pattern.permute.xlu0 %v12258_v2  ;;  %v8330_v8 = vld [vmem:[%s12252_s1 + $0x28] ss:$16 sps:$4 sm:$0xff]   ;;  %v8331_v9 = vld [vmem:[%s12252_s1 + $0x44] ss:$16 sps:$4 sm:$0xff]   ;;  %vm7797_vm1 = vcmask 130112  }
  0x11   : > { %531 = vmatpush1.bf16.msra.mxu0 %v8323_v3  ;;  %884 = vmatpush1.bf16.msra.mxu1 %v8324_v4  ;;  %s8223_s10 = sshll.u32 %s12544_s19, 3  ;;  %v8333_v10 = vld [vmem:[%s12252_s1 + $0x4c] ss:$16 sps:$4 sm:$0xff]   ;;  %v8335_v11 = vld [vmem:[%s12252_s1 + $0x40] ss:$16 sps:$4 sm:$0xff]   ;;  %vm7804_vm2 = vcmask 195712  }
  0x12   : > { %532 = vmatprep.subr.bf16.mxu0 %v8325_v5  ;;  %885 = vmatprep.subr.bf16.mxu1 %v8327_v6  ;;  %v8336_v12 = vld [vmem:[%s12252_s1 + $0x48] ss:$16 sps:$4 sm:$0xff]   ;;  %v8337_v13 = vld [vmem:[%s12252_s1 + $0x64] ss:$16 sps:$4 sm:$0xff]   ;;  %v8339_v14 = vld [vmem:[%s12252_s1 + $0x6c] ss:$16 sps:$4 sm:$0xff]   ;;  %s8438_s25 = scalar_lea.vmem %s12251_s0, %s8223_s10 }
  0x13   : > { %v8341_v15 = vld [vmem:[%s12252_s1 + $0x60] ss:$16 sps:$4 sm:$0xff]   ;;  %v8342_v16 = vld [vmem:[%s12252_s1 + $0x68] ss:$16 sps:$4 sm:$0xff]   ;;  %vm7811_vm3 = vcmask 261312   ;;  %vm7818_vm4 = vcmask 326912  }
  0x14   : > { %v219_v17 = vld [vmem:[%s8438_s25] sm:$0xff]  ;;  %v220_v18 = vld [vmem:[%s8438_s25 + $0x8] sm:$0xff]  ;;  %v221_v20 = vld [vmem:[%s8438_s25 + $0x10] sm:$0xff]  ;;  %vm7825_vm5 = vcmask 392512   ;;  %vm7832_vm6 = vcmask 458112   ;;  %vm7839_vm7 = vcmask 523712  }
  0x15   : > { %533 = vmatpush1.bf16.msra.mxu0 %v8329_v7  ;;  %886 = vmatpush1.bf16.msra.mxu1 %v8330_v8  ;;  %v283_v19 = vpack.c.bf16 %v220_v18, %v219_v17  ;;  %v222_v21 = vld [vmem:[%s8438_s25 + $0x18] sm:$0xff]  ;;  %v223_v23 = vld [vmem:[%s8438_s25 + $0x20] sm:$0xff]  ;;  %v224_v24 = vld [vmem:[%s8438_s25 + $0x28] sm:$0xff]  ;;  %vm7846_vm8 = vcmask 589312   ;;  %vm7853_vm9 = vcmask 654912   ;;  %vm7860_vm10 = vcmask 720512  }
  0x16   : > { %534 = vmatprep.subr.bf16.mxu0 %v8331_v9  ;;  %887 = vmatprep.subr.bf16.mxu1 %v8333_v10  ;;  %v284_v22 = vpack.c.bf16 %v222_v21, %v221_v20  ;;  %v285_v25 = vpack.c.bf16 %v224_v24, %v223_v23  ;;  %v225_v26 = vld [vmem:[%s8438_s25 + $0x30] sm:$0xff]  ;;  %v226_v27 = vld [vmem:[%s8438_s25 + $0x38] sm:$0xff]  ;;  %v227_v29 = vld [vmem:[%s8438_s25 + $0x40] sm:$0xff]  ;;  %vm7867_vm11 = vcmask 786112   ;;  %vm7874_vm12 = vcmask 851712   ;;  %p214_p4 = scmp.lt.s32.totalorder %s8384_s16, 1 }
  0x17   : > { %v286_v28 = vpack.c.bf16 %v226_v27, %v225_v26  ;;  %v228_v30 = vld [vmem:[%s8438_s25 + $0x48] sm:$0xff]  ;;  %v229_v32 = vld [vmem:[%s8438_s25 + $0x50] sm:$0xff]  ;;  %v230_v33 = vld [vmem:[%s8438_s25 + $0x58] sm:$0xff]  ;;  %vm7881_vm13 = vcmask 917312   ;;  %vm7888_vm14 = vcmask 982912   ;;  %vm7895_vm15 = vcmask 1048512  }
  0x18   : > { %v287_v31 = vpack.c.bf16 %v228_v30, %v227_v29  ;;  %v288_v34 = vpack.c.bf16 %v230_v33, %v229_v32  ;;  %v231_v35 = vld [vmem:[%s8438_s25 + $0x60] sm:$0xff]  ;;  %v232_v36 = vld [vmem:[%s8438_s25 + $0x68] sm:$0xff]  ;;  %v233_v38 = vld [vmem:[%s8438_s25 + $0x70] sm:$0xff]  ;;  %v12256_v29 = vlaneseq  ;;  %s12546_s16 = smov (!%p214_p4, %s8384_s16), 1 }
  0x19   : > { %535 = vmatpush1.bf16.msra.mxu0 %v8335_v11  ;;  %888 = vmatpush1.bf16.msra.mxu1 %v8336_v12  ;;  %v289_v37 = vpack.c.bf16 %v232_v36, %v231_v35  ;;  %v234_v39 = vld [vmem:[%s8438_s25 + $0x78] sm:$0xff]  ;;  %v235_v41 = vld [vmem:[%s8438_s25 + $0x80] sm:$0xff]  ;;  %v236_v42 = vld [vmem:[%s8438_s25 + $0x88] sm:$0xff]  ;;  %s8224_s8 = sshll.u32 %s12546_s16, 2 }
  0x1a   : > { %536 = vmatprep.subr.bf16.mxu0 %v8337_v13  ;;  %889 = vmatprep.subr.bf16.mxu1 %v8339_v14  ;;  %v290_v40 = vpack.c.bf16 %v234_v39, %v233_v38  ;;  %v291_v43 = vpack.c.bf16 %v236_v42, %v235_v41  ;;  %v237_v44 = vld [vmem:[%s8438_s25 + $0x90] sm:$0xff]  ;;  %v238_v45 = vld [vmem:[%s8438_s25 + $0x98] sm:$0xff]  ;;  %v239_v47 = vld [vmem:[%s8438_s25 + $0xa0] sm:$0xff]  ;;  %v8597_v30 = vshrl.u32 %v12256_v29, 7  ;;  %s217_s11 = scalar_lea.vmem %s12255_s4, %s8224_s8 }
  0x1b   : > { %v292_v46 = vpack.c.bf16 %v238_v45, %v237_v44  ;;  %v240_v48 = vld [vmem:[%s8438_s25 + $0xa8] sm:$0xff]  ;;  %v241_v50 = vld [vmem:[%s8438_s25 + $0xb0] sm:$0xff]  ;;  %v242_v51 = vld [vmem:[%s8438_s25 + $0xb8] sm:$0xff] }
  0x1c   : > { %v293_v49 = vpack.c.bf16 %v240_v48, %v239_v47  ;;  %v294_v52 = vpack.c.bf16 %v242_v51, %v241_v50  ;;  %v243_v53 = vld [vmem:[%s8438_s25 + $0xc0] sm:$0xff]  ;;  %v244_v54 = vld [vmem:[%s8438_s25 + $0xc8] sm:$0xff]  ;;  %v245_v56 = vld [vmem:[%s8438_s25 + $0xd0] sm:$0xff]  ;;  %12342 = vst [vmem:[#allocation2_spill] sm:$0xff] %v8597_v30  ;;  %v8603_v32 = vsub.s32 2, %v8597_v30  ;;  %v8612_v35 = vsub.s32 3, %v8597_v30 }
  0x1d   : > { %537 = vmatpush1.bf16.msra.mxu0 %v8341_v15  ;;  %890 = vmatpush1.bf16.msra.mxu1 %v8342_v16  ;;  %v295_v55 = vpack.c.bf16 %v244_v54, %v243_v53  ;;  %v246_v57 = vld [vmem:[%s8438_s25 + $0xd8] sm:$0xff]  ;;  %v247_v59 = vld [vmem:[%s8438_s25 + $0xe0] sm:$0xff]  ;;  %v248_v60 = vld [vmem:[%s8438_s25 + $0xe8] sm:$0xff] }
  0x1e   : > { %v296_v58 = vpack.c.bf16 %v246_v57, %v245_v56  ;;  %v297_v61 = vpack.c.bf16 %v248_v60, %v247_v59  ;;  %v249_v62 = vld [vmem:[%s8438_s25 + $0xf0] sm:$0xff]  ;;  %v250_v63 = vld [vmem:[%s8438_s25 + $0xf8] sm:$0xff]  ;;  %v251_v1 = vld [vmem:[%s8438_s25 + $0x100] sm:$0xff]  ;;  %12344 = vst [vmem:[#allocation4_spill] sm:$0xff] %v8603_v32 }
  0x1f   : > { %v298_v0 = vpack.c.bf16 %v250_v63, %v249_v62  ;;  %v252_v3 = vld [vmem:[%s8438_s25 + $0x108] sm:$0xff]  ;;  %v253_v5 = vld [vmem:[%s8438_s25 + $0x110] sm:$0xff]  ;;  %v254_v6 = vld [vmem:[%s8438_s25 + $0x118] sm:$0xff]  ;;  %12346 = vst [vmem:[#allocation6_spill] sm:$0xff] %v8612_v35 }
  0x20   : > { %8241 = vmatmul.mubr.msk.bf16.vlgmr.msra.gmra.mrb[0].mxu0 %vm433_vm0, %v283_v19  ;;  %8273 = vmatmul.mubr.msk.bf16.vlgmr.msra.gmra.mrb[0].mxu1 %vm433_vm0, %v283_v19  ;;  %v299_v4 = vpack.c.bf16 %v252_v3, %v251_v1  ;;  %v300_v7 = vpack.c.bf16 %v254_v6, %v253_v5  ;;  %v255_v8 = vld [vmem:[%s8438_s25 + $0x120] sm:$0xff]  ;;  %v256_v9 = vld [vmem:[%s8438_s25 + $0x128] sm:$0xff]  ;;  %v257_v11 = vld [vmem:[%s8438_s25 + $0x130] sm:$0xff] }
  0x21   : > { %572 = vmatprep.mubr.bf16.mxu0 %v12258_v2  ;;  %925 = vmatprep.mubr.bf16.mxu1 %v12258_v2  ;;  %v301_v10 = vpack.c.bf16 %v256_v9, %v255_v8  ;;  %v258_v12 = vld [vmem:[%s8438_s25 + $0x138] sm:$0xff]  ;;  %v259_v14 = vld [vmem:[%s8438_s25 + $0x140] sm:$0xff]  ;;  %v260_v15 = vld [vmem:[%s8438_s25 + $0x148] sm:$0xff] }
  0x22   : > { %v302_v13 = vpack.c.bf16 %v258_v12, %v257_v11  ;;  %v303_v16 = vpack.c.bf16 %v260_v15, %v259_v14  ;;  %v261_v17 = vld [vmem:[%s8438_s25 + $0x150] sm:$0xff]  ;;  %v262_v18 = vld [vmem:[%s8438_s25 + $0x158] sm:$0xff]  ;;  %v263_v20 = vld [vmem:[%s8438_s25 + $0x160] sm:$0xff] }
  0x23   : > { %v304_v19 = vpack.c.bf16 %v262_v18, %v261_v17  ;;  %v264_v21 = vld [vmem:[%s8438_s25 + $0x168] sm:$0xff]  ;;  %v265_v23 = vld [vmem:[%s8438_s25 + $0x170] sm:$0xff]  ;;  %v266_v24 = vld [vmem:[%s8438_s25 + $0x178] sm:$0xff] }
  0x24   : > { %v267_v26 = vld [vmem:[%s8438_s25 + $0x180] sm:$0xff]  ;;  %v268_v27 = vld [vmem:[%s8438_s25 + $0x188] sm:$0xff] }
  0x25   : > { %v331_v33 = vld [vmem:[%s12253_s2] sm:$0xf] }
  0x26   : > { %v1748_v38 = vld [vmem:[%s12254_s3] sm:$0xf] }
  0x27   : > { %v8640_v53 = vrot.slane %v1748_v38, %v8603_v32  ;;  %v8643_v54 = vrot.slane %v1748_v38, %v8612_v35 }
  0x28   : > { %8242 = vmatmul.mubr.msk.bf16.gmra.mrb[4].mxu0 %vm433_vm0, %v284_v22  ;;  %8274 = vmatmul.mubr.msk.bf16.gmra.mrb[4].mxu1 %vm433_vm0, %v284_v22  ;;  %v305_v22 = vpack.c.bf16 %v264_v21, %v263_v20 }
  0x29   : > { %582 = vmatprep.mubr.bf16.mxu0 %v12258_v2  ;;  %935 = vmatprep.mubr.bf16.mxu1 %v12258_v2  ;;  %12347 = vst [vmem:[#allocation7_spill] sm:$0xff] %v8640_v53  ;;  %12348 = vst [vmem:[#allocation8_spill] sm:$0xff] %v8643_v54 }
  0x30   : > { %8243 = vmatmul.mubr.msk.bf16.gmra.mrb[8].mxu0 %vm433_vm0, %v285_v25  ;;  %8275 = vmatmul.mubr.msk.bf16.gmra.mrb[8].mxu1 %vm433_vm0, %v285_v25  ;;  %v306_v25 = vpack.c.bf16 %v266_v24, %v265_v23 }
  0x31   : > { %592 = vmatprep.mubr.bf16.mxu0 %v12258_v2  ;;  %945 = vmatprep.mubr.bf16.mxu1 %v12258_v2 }
  0x38   : > { %8244 = vmatmul.mubr.msk.bf16.gmra.mrb[12].mxu0 %vm433_vm0, %v286_v28  ;;  %8276 = vmatmul.mubr.msk.bf16.gmra.mrb[12].mxu1 %vm433_vm0, %v286_v28  ;;  %v307_v28 = vpack.c.bf16 %v268_v27, %v267_v26 }
  0x39   : > { %602 = vmatprep.mubr.bf16.mxu0 %v12258_v2  ;;  %955 = vmatprep.mubr.bf16.mxu1 %v12258_v2 }
  0x40   : > { %8245 = vmatmul.mubr.msk.bf16.gmra.mrb[16].mxu0 %vm433_vm0, %v287_v31  ;;  %8277 = vmatmul.mubr.msk.bf16.gmra.mrb[16].mxu1 %vm433_vm0, %v287_v31  ;;  %v8600_v31 = vsub.s32 0, %v8597_v30 }
  0x41   : > { %612 = vmatprep.mubr.bf16.mxu0 %v12258_v2  ;;  %965 = vmatprep.mubr.bf16.mxu1 %v12258_v2 }
  0x42   : > { %12343 = vst [vmem:[#allocation3_spill] sm:$0xff] %v8600_v31  ;;  %v8615_v36 = vrot.slane %v331_v33, %v8600_v31  ;;  %v8631_v44 = vrot.slane %v1748_v38, %v8600_v31 }
  0x48   : > { %8246 = vmatmul.mubr.msk.bf16.gmra.mrb[20].mxu0 %vm433_vm0, %v288_v34  ;;  %8278 = vmatmul.mubr.msk.bf16.gmra.mrb[20].mxu1 %vm433_vm0, %v288_v34  ;;  %v8609_v34 = vsub.s32 1, %v8597_v30 }
  0x49   : > { %622 = vmatprep.mubr.bf16.mxu0 %v12258_v2  ;;  %975 = vmatprep.mubr.bf16.mxu1 %v12258_v2 }
  0x4a   : > { %12345 = vst [vmem:[#allocation5_spill] sm:$0xff] %v8609_v34  ;;  %v8624_v39 = vrot.slane %v331_v33, %v8609_v34  ;;  %v8635_v47 = vrot.slane %v1748_v38, %v8609_v34 }
  0x50   : > { %8247 = vmatmul.mubr.msk.bf16.gmra.mrb[24].mxu0 %vm433_vm0, %v289_v37  ;;  %8279 = vmatmul.mubr.msk.bf16.gmra.mrb[24].mxu1 %vm433_vm0, %v289_v37  ;;  %v8618_v37 = vrot.slane %v331_v33, %v8603_v32 }
  0x51   : > { %632 = vmatprep.mubr.bf16.mxu0 %v12258_v2  ;;  %985 = vmatprep.mubr.bf16.mxu1 %v12258_v2 }
  0x58   : > { %8248 = vmatmul.mubr.msk.bf16.gmra.mrb[28].mxu0 %vm433_vm0, %v290_v40  ;;  %8280 = vmatmul.mubr.msk.bf16.gmra.mrb[28].mxu1 %vm433_vm0, %v290_v40  ;;  %v8627_v40 = vrot.slane %v331_v33, %v8612_v35 }
  0x59   : > { %642 = vmatprep.mubr.bf16.mxu0 %v12258_v2  ;;  %995 = vmatprep.mubr.bf16.mxu1 %v12258_v2 }
  0x60   : > { %8249 = vmatmul.mubr.msk.bf16.gmra.mrb[32].mxu0 %vm433_vm0, %v291_v43  ;;  %8281 = vmatmul.mubr.msk.bf16.gmra.mrb[32].mxu1 %vm433_vm0, %v291_v43 }
  0x61   : > { %652 = vmatprep.mubr.bf16.mxu0 %v12258_v2  ;;  %1005 = vmatprep.mubr.bf16.mxu1 %v12258_v2 }
  0x68   : > { %8250 = vmatmul.mubr.msk.bf16.gmra.mrb[36].mxu0 %vm433_vm0, %v292_v46  ;;  %8282 = vmatmul.mubr.msk.bf16.gmra.mrb[36].mxu1 %vm433_vm0, %v292_v46 }
  0x69   : > { %662 = vmatprep.mubr.bf16.mxu0 %v12258_v2  ;;  %1015 = vmatprep.mubr.bf16.mxu1 %v12258_v2 }
  0x70   : > { %8251 = vmatmul.mubr.msk.bf16.gmra.mrb[40].mxu0 %vm433_vm0, %v293_v49  ;;  %8283 = vmatmul.mubr.msk.bf16.gmra.mrb[40].mxu1 %vm433_vm0, %v293_v49 }
  0x71   : > { %672 = vmatprep.mubr.bf16.mxu0 %v12258_v2  ;;  %1025 = vmatprep.mubr.bf16.mxu1 %v12258_v2 }
  0x78   : > { %8252 = vmatmul.mubr.msk.bf16.gmra.mrb[44].mxu0 %vm433_vm0, %v294_v52  ;;  %8284 = vmatmul.mubr.msk.bf16.gmra.mrb[44].mxu1 %vm433_vm0, %v294_v52 }
  0x79   : > { %682 = vmatprep.mubr.bf16.mxu0 %v12258_v2  ;;  %1035 = vmatprep.mubr.bf16.mxu1 %v12258_v2 }
  0x80   : > { %8253 = vmatmul.mubr.msk.bf16.gmra.mrb[48].mxu0 %vm433_vm0, %v295_v55  ;;  %8285 = vmatmul.mubr.msk.bf16.gmra.mrb[48].mxu1 %vm433_vm0, %v295_v55 }
  0x81   : > { %692 = vmatprep.mubr.bf16.mxu0 %v12258_v2  ;;  %1045 = vmatprep.mubr.bf16.mxu1 %v12258_v2 }
  0x88   : > { %8254 = vmatmul.mubr.msk.bf16.gmra.mrb[52].mxu0 %vm433_vm0, %v296_v58  ;;  %8286 = vmatmul.mubr.msk.bf16.gmra.mrb[52].mxu1 %vm433_vm0, %v296_v58 }
  0x89   : > { %702 = vmatprep.mubr.bf16.mxu0 %v12258_v2  ;;  %1055 = vmatprep.mubr.bf16.mxu1 %v12258_v2 }
  0x90   : > { %8255 = vmatmul.mubr.msk.bf16.gmra.mrb[56].mxu0 %vm433_vm0, %v297_v61  ;;  %8287 = vmatmul.mubr.msk.bf16.gmra.mrb[56].mxu1 %vm433_vm0, %v297_v61 }
  0x91   : > { %712 = vmatprep.mubr.bf16.mxu0 %v12258_v2  ;;  %1065 = vmatprep.mubr.bf16.mxu1 %v12258_v2 }
  0x98   : > { %8256 = vmatmul.mubr.msk.bf16.gmra.mrb[60].mxu0 %vm433_vm0, %v298_v0  ;;  %8288 = vmatmul.mubr.msk.bf16.gmra.mrb[60].mxu1 %vm433_vm0, %v298_v0 }
  0x99   : > { %722 = vmatprep.mubr.bf16.mxu0 %v12258_v2  ;;  %1075 = vmatprep.mubr.bf16.mxu1 %v12258_v2 }
  0xa0   : > { %8257 = vmatmul.mubr.msk.bf16.gmra.mrb[64].mxu0 %vm433_vm0, %v299_v4  ;;  %8289 = vmatmul.mubr.msk.bf16.gmra.mrb[64].mxu1 %vm433_vm0, %v299_v4 }
  0xa1   : > { %732 = vmatprep.mubr.bf16.mxu0 %v12258_v2  ;;  %1085 = vmatprep.mubr.bf16.mxu1 %v12258_v2 }
  0xa8   : > { %8258 = vmatmul.mubr.msk.bf16.gmra.mrb[68].mxu0 %vm433_vm0, %v300_v7  ;;  %8290 = vmatmul.mubr.msk.bf16.gmra.mrb[68].mxu1 %vm433_vm0, %v300_v7 }
  0xa9   : > { %742 = vmatprep.mubr.bf16.mxu0 %v12258_v2  ;;  %1095 = vmatprep.mubr.bf16.mxu1 %v12258_v2 }
  0xb0   : > { %8259 = vmatmul.mubr.msk.bf16.gmra.mrb[72].mxu0 %vm433_vm0, %v301_v10  ;;  %8291 = vmatmul.mubr.msk.bf16.gmra.mrb[72].mxu1 %vm433_vm0, %v301_v10 }
  0xb1   : > { %752 = vmatprep.mubr.bf16.mxu0 %v12258_v2  ;;  %1105 = vmatprep.mubr.bf16.mxu1 %v12258_v2 }
  0xb8   : > { %8260 = vmatmul.mubr.msk.bf16.gmra.mrb[76].mxu0 %vm433_vm0, %v302_v13  ;;  %8292 = vmatmul.mubr.msk.bf16.gmra.mrb[76].mxu1 %vm433_vm0, %v302_v13 }
  0xb9   : > { %762 = vmatprep.mubr.bf16.mxu0 %v12258_v2  ;;  %1115 = vmatprep.mubr.bf16.mxu1 %v12258_v2 }
  0xc0   : > { %8261 = vmatmul.mubr.msk.bf16.gmra.mrb[80].mxu0 %vm433_vm0, %v303_v16  ;;  %8293 = vmatmul.mubr.msk.bf16.gmra.mrb[80].mxu1 %vm433_vm0, %v303_v16 }
  0xc1   : > { %772 = vmatprep.mubr.bf16.mxu0 %v12258_v2  ;;  %1125 = vmatprep.mubr.bf16.mxu1 %v12258_v2 }
  0xc8   : > { %8262 = vmatmul.mubr.msk.bf16.gmra.mrb[84].mxu0 %vm433_vm0, %v304_v19  ;;  %8294 = vmatmul.mubr.msk.bf16.gmra.mrb[84].mxu1 %vm433_vm0, %v304_v19 }
  0xc9   : > { %782 = vmatprep.mubr.bf16.mxu0 %v12258_v2  ;;  %1135 = vmatprep.mubr.bf16.mxu1 %v12258_v2 }
  0xd0   : > { %8263 = vmatmul.mubr.msk.bf16.gmra.mrb[88].mxu0 %vm433_vm0, %v305_v22  ;;  %8295 = vmatmul.mubr.msk.bf16.gmra.mrb[88].mxu1 %vm433_vm0, %v305_v22 }
  0xd1   : > { %792 = vmatprep.mubr.bf16.mxu0 %v12258_v2  ;;  %1145 = vmatprep.mubr.bf16.mxu1 %v12258_v2 }
  0xd8   : > { %8264 = vmatmul.mubr.msk.bf16.gmra.mrb[92].mxu0 %vm433_vm0, %v306_v25  ;;  %8296 = vmatmul.mubr.msk.bf16.gmra.mrb[92].mxu1 %vm433_vm0, %v306_v25 }
  0xd9   : > { %802 = vmatprep.mubr.bf16.mxu0 %v12258_v2  ;;  %1155 = vmatprep.mubr.bf16.mxu1 %v12258_v2 }
  0xe0   : > { %8265 = vmatmul.mubr.msk.bf16.gmra.mrb[96].mxu0 %vm433_vm0, %v307_v28  ;;  %8297 = vmatmul.mubr.msk.bf16.gmra.mrb[96].mxu1 %vm433_vm0, %v307_v28 }
  0xe1   : > { %812 = vmatprep.mubr.bf16.mxu0 %v12258_v2  ;;  %1165 = vmatprep.mubr.bf16.mxu1 %v12258_v2 }
  0xf3   : > { %v564_v41 = vpop.f32.mrb[0].mxu0  ;;  %v917_v42 = vpop.f32.mrb[0].mxu1 }
  0xf4   : > { %v565_v43 = vadd.f32 %v564_v41, %v8615_v36  ;;  %v918_v45 = vadd.f32 %v917_v42, %v8618_v37  ;;  %v566_v46 = vpop.f32.mrb[1].mxu0  ;;  %v919_v48 = vpop.f32.mrb[1].mxu1 }
  0xf5   : > { %v567_v49 = vadd.f32 %v566_v46, %v8624_v39  ;;  %v920_v50 = vadd.f32 %v919_v48, %v8627_v40  ;;  %v568_v51 = vpop.f32.mrb[2].mxu0  ;;  %v921_v52 = vpop.f32.mrb[2].mxu1 }
  0xf6   : > { %v1236_v55 = vmul.f32 0.01, %v565_v43  ;;  %v1238_v56 = vmul.f32 0.01, %v918_v45  ;;  %v569_v57 = vadd.f32 %v568_v51, %v8615_v36  ;;  %v922_v58 = vadd.f32 %v921_v52, %v8618_v37  ;;  %v570_v59 = vpop.f32.mrb[3].mxu0  ;;  %v923_v60 = vpop.f32.mrb[3].mxu1 }
  0xf7   : > { %v1237_v61 = vmul.f32 0.01, %v567_v49  ;;  %v1239_v62 = vmul.f32 0.01, %v920_v50  ;;  %v571_v63 = vadd.f32 %v570_v59, %v8624_v39  ;;  %v924_v0 = vadd.f32 %v923_v60, %v8627_v40 }
  0xf8   : > { %v1492_v1 = vmax.f32 %v565_v43, %v1236_v55  ;;  %v1494_v3 = vmax.f32 %v918_v45, %v1238_v56  ;;  %v1240_v4 = vmul.f32 0.01, %v569_v57  ;;  %v1242_v5 = vmul.f32 0.01, %v922_v58 }
  0xf9   : > { %v1493_v6 = vmax.f32 %v567_v49, %v1237_v61  ;;  %v1495_v7 = vmax.f32 %v920_v50, %v1239_v62  ;;  %v1241_v8 = vmul.f32 0.01, %v571_v63  ;;  %v1243_v9 = vmul.f32 0.01, %v924_v0 }
  0xfa   : > { %v1770_v10 = vmul.f32 %v8631_v44, %v1492_v1  ;;  %v1496_v11 = vmax.f32 %v569_v57, %v1240_v4  ;;  %v1498_v12 = vmax.f32 %v922_v58, %v1242_v5  ;;  %v1772_v13 = vmul.f32 %v8640_v53, %v1494_v3 }
  0xfb   : > { %v1771_v14 = vmul.f32 %v8635_v47, %v1493_v6  ;;  %v1497_v15 = vmax.f32 %v571_v63, %v1241_v8  ;;  %v1499_v16 = vmax.f32 %v924_v0, %v1243_v9  ;;  %v574_v17 = vpop.f32.mrb[4].mxu0  ;;  %v927_v18 = vpop.f32.mrb[4].mxu1  ;;  %v1773_v19 = vmul.f32 %v8643_v54, %v1495_v7 }
  0xfc   : > { %v8654_v20 = vmul.f32 %v8631_v44, %v1496_v11  ;;  %v8657_v21 = vmul.f32 %v8640_v53, %v1498_v12  ;;  %v575_v22 = vadd.f32 %v574_v17, %v8615_v36  ;;  %v8661_v23 = vadd.f32 %v927_v18, %v8618_v37  ;;  %v576_v24 = vpop.f32.mrb[5].mxu0  ;;  %v929_v25 = vpop.f32.mrb[5].mxu1 }
  0xfd   : > { %v8664_v26 = vmul.f32 %v8635_v47, %v1497_v15  ;;  %v577_v27 = vadd.f32 %v576_v24, %v8624_v39  ;;  %v8668_v28 = vadd.f32 %v929_v25, %v8627_v40  ;;  %v578_v33 = vpop.f32.mrb[6].mxu0  ;;  %v931_v38 = vpop.f32.mrb[6].mxu1  ;;  %v2026_v41 = vadd.f32 %v1771_v14, %v1770_v10 }
  0xfe   : > { %v1244_v42 = vmul.f32 0.01, %v575_v22  ;;  %v8671_v43 = vmul.f32 0.01, %v8661_v23  ;;  %v579_v45 = vadd.f32 %v578_v33, %v8615_v36  ;;  %v932_v46 = vadd.f32 %v931_v38, %v8618_v37  ;;  %v580_v48 = vpop.f32.mrb[7].mxu0  ;;  %v933_v49 = vpop.f32.mrb[7].mxu1 }
  0xff   : > { %v1245_v50 = vmul.f32 0.01, %v577_v27  ;;  %v8676_v51 = vmul.f32 0.01, %v8668_v28  ;;  %v581_v52 = vadd.f32 %v580_v48, %v8624_v39  ;;  %v8680_v55 = vadd.f32 %v933_v49, %v8627_v40 }
 0x100   : > { %v1500_v56 = vmax.f32 %v575_v22, %v1244_v42  ;;  %v1502_v57 = vmax.f32 %v8661_v23, %v8671_v43  ;;  %v1248_v58 = vmul.f32 0.01, %v579_v45  ;;  %v1250_v59 = vmul.f32 0.01, %v932_v46 }
 0x101   : > { %v1501_v60 = vmax.f32 %v577_v27, %v1245_v50  ;;  %v1503_v61 = vmax.f32 %v8668_v28, %v8676_v51  ;;  %v1249_v62 = vmul.f32 0.01, %v581_v52  ;;  %v8687_v63 = vmul.f32 0.01, %v8680_v55 }
 0x102   : > { %v8690_v0 = vmul.f32 %v8631_v44, %v1500_v56  ;;  %v1504_v1 = vmax.f32 %v579_v45, %v1248_v58  ;;  %v1506_v3 = vmax.f32 %v932_v46, %v1250_v59  ;;  %v2027_v4 = vadd.f32 %v2026_v41, %v1772_v13 }
 0x103   : > { %v1779_v5 = vmul.f32 %v8635_v47, %v1501_v60  ;;  %v1505_v6 = vmax.f32 %v581_v52, %v1249_v62  ;;  %v1507_v7 = vmax.f32 %v8680_v55, %v8687_v63  ;;  %v584_v8 = vpop.f32.mrb[8].mxu0  ;;  %v937_v9 = vpop.f32.mrb[8].mxu1  ;;  %v1777_v10 = vmul.f32 %v8643_v54, %v1499_v16 }
 0x104   : > { %v8697_v11 = vmul.f32 %v8631_v44, %v1504_v1  ;;  %v8700_v12 = vmul.f32 %v8640_v53, %v1506_v3  ;;  %v585_v14 = vadd.f32 %v584_v8, %v8615_v36  ;;  %v938_v13 = vadd.f32 %v937_v9, %v8618_v37  ;;  %v586_v15 = vpop.f32.mrb[9].mxu0  ;;  %v939_v17 = vpop.f32.mrb[9].mxu1 }
 0x105   : > { %v8705_v18 = vmul.f32 %v8635_v47, %v1505_v6  ;;  %v2028_v22 = vadd.f32 %v2027_v4, %v1773_v19  ;;  %v587_v24 = vadd.f32 %v586_v15, %v8624_v39  ;;  %v8709_v16 = vadd.f32 %v939_v17, %v8627_v40  ;;  %v588_v25 = vpop.f32.mrb[10].mxu0  ;;  %v941_v27 = vpop.f32.mrb[10].mxu1 }
 0x106   : > { %v1252_v33 = vmul.f32 0.01, %v585_v14  ;;  %v1254_v38 = vmul.f32 0.01, %v938_v13  ;;  %v589_v41 = vadd.f32 %v588_v25, %v8615_v36  ;;  %v942_v42 = vadd.f32 %v941_v27, %v8618_v37  ;;  %v590_v45 = vpop.f32.mrb[11].mxu0  ;;  %v943_v46 = vpop.f32.mrb[11].mxu1 }
 0x107   : > { %2029 = vadd.xlane.f32.xlu0 %v2028_v22  ;;  %v1253_v48 = vmul.f32 0.01, %v587_v24  ;;  %v8714_v49 = vmul.f32 0.01, %v8709_v16  ;;  %v591_v19 = vadd.f32 %v590_v45, %v8624_v39  ;;  %v8718_v50 = vadd.f32 %v943_v46, %v8627_v40 }
 0x108   : > { %v1508_v52 = vmax.f32 %v585_v14, %v1252_v33  ;;  %v1510_v56 = vmax.f32 %v938_v13, %v1254_v38  ;;  %v1256_v58 = vmul.f32 0.01, %v589_v41  ;;  %v1258_v59 = vmul.f32 0.01, %v942_v42 }
 0x109   : > { %v1509_v60 = vmax.f32 %v587_v24, %v1253_v48  ;;  %v1511_v62 = vmax.f32 %v8709_v16, %v8714_v49  ;;  %v1257_v1 = vmul.f32 0.01, %v591_v19  ;;  %v8723_v3 = vmul.f32 0.01, %v8718_v50 }
 0x10a   : > { %v8726_v4 = vmul.f32 %v8631_v44, %v1508_v52  ;;  %v8729_v6 = vmul.f32 %v8640_v53, %v1510_v56  ;;  %v1512_v8 = vmax.f32 %v589_v41, %v1256_v58  ;;  %v1514_v9 = vmax.f32 %v942_v42, %v1258_v59 }
 0x10b   : > { %v8732_v14 = vmul.f32 %v8635_v47, %v1509_v60  ;;  %v1513_v13 = vmax.f32 %v591_v19, %v1257_v1  ;;  %v1515_v15 = vmax.f32 %v8718_v50, %v8723_v3  ;;  %v2031_v17 = vadd.f32 %v8664_v26, %v8654_v20  ;;  %v594_v22 = vpop.f32.mrb[12].mxu0  ;;  %v947_v24 = vpop.f32.mrb[12].mxu1 }
 0x10c   : > { %v8739_v25 = vmul.f32 %v8631_v44, %v1512_v8  ;;  %v8742_v27 = vmul.f32 %v8640_v53, %v1514_v9  ;;  %v595_v33 = vadd.f32 %v594_v22, %v8615_v36  ;;  %v948_v38 = vadd.f32 %v947_v24, %v8618_v37  ;;  %v596_v41 = vpop.f32.mrb[13].mxu0  ;;  %v949_v42 = vpop.f32.mrb[13].mxu1 }
 0x10d   : > { %v8747_v45 = vmul.f32 %v8635_v47, %v1513_v13  ;;  %v2032_v46 = vadd.f32 %v2031_v17, %v8657_v21  ;;  %v1780_v20 = vmul.f32 %v8640_v53, %v1502_v57  ;;  %v1781_v26 = vmul.f32 %v8643_v54, %v1503_v61  ;;  %v598_v48 = vpop.f32.mrb[14].mxu0  ;;  %v951_v19 = vpop.f32.mrb[14].mxu1 }
 0x10e   : > { %v1260_v52 = vmul.f32 0.01, %v595_v33  ;;  %v1262_v56 = vmul.f32 0.01, %v948_v38  ;;  %v2036_v58 = vadd.f32 %v1779_v5, %v8690_v0  ;;  %v597_v59 = vadd.f32 %v596_v41, %v8624_v39  ;;  %v600_v60 = vpop.f32.mrb[15].mxu0  ;;  %v953_v21 = vpop.f32.mrb[15].mxu1 }
 0x10f   : > { %v2033_v1 = vadd.f32 %v2032_v46, %v1777_v10  ;;  %v8761_v23 = vadd.f32 %v949_v42, %v8627_v40  ;;  %v599_v43 = vadd.f32 %v598_v48, %v8615_v36  ;;  %v952_v28 = vadd.f32 %v951_v19, %v8618_v37 }
 0x110   : > { %v1516_v51 = vmax.f32 %v595_v33, %v1260_v52  ;;  %v1518_v57 = vmax.f32 %v948_v38, %v1262_v56  ;;  %v2037_v61 = vadd.f32 %v2036_v58, %v1780_v20  ;;  %v1261_v8 = vmul.f32 0.01, %v597_v59 }
 0x111   : > { %2034 = vadd.xlane.f32.xlu0 %v2033_v1  ;;  %v8766_v9 = vmul.f32 0.01, %v8761_v23  ;;  %v1264_v0 = vmul.f32 0.01, %v599_v43  ;;  %v1266_v5 = vmul.f32 0.01, %v952_v28  ;;  %v601_v13 = vadd.f32 %v600_v60, %v8624_v39 }
 0x112   : > { %v8770_v10 = vmul.f32 %v8631_v44, %v1516_v51  ;;  %v8773_v17 = vmul.f32 %v8640_v53, %v1518_v57  ;;  %v2038_v22 = vadd.f32 %v2037_v61, %v1781_v26  ;;  %v1517_v24 = vmax.f32 %v597_v59, %v1261_v8 }
 0x113   : > { %v1519_v33 = vmax.f32 %v8761_v23, %v8766_v9  ;;  %v1520_v38 = vmax.f32 %v599_v43, %v1264_v0  ;;  %v1522_v41 = vmax.f32 %v952_v28, %v1266_v5  ;;  %v1265_v42 = vmul.f32 0.01, %v601_v13  ;;  %v604_v46 = vpop.f32.mrb[16].mxu0  ;;  %v957_v20 = vpop.f32.mrb[16].mxu1 }
 0x114   : > { %2039 = vadd.xlane.f32.xlu1 %v2038_v22  ;;  %v8778_v48 = vmul.f32 %v8635_v47, %v1517_v24  ;;  %v8781_v19 = vadd.f32 %v953_v21, %v8627_v40  ;;  %v1785_v26 = vmul.f32 %v8643_v54, %v1507_v7  ;;  %v2041_v52 = vadd.f32 %v8705_v18, %v8697_v11  ;;  %v606_v56 = vpop.f32.mrb[17].mxu0  ;;  %v959_v58 = vpop.f32.mrb[17].mxu1 }
 0x115   : > { %v8790_v59 = vmul.f32 %v8631_v44, %v1520_v38  ;;  %v8793_v60 = vmul.f32 %v8640_v53, %v1522_v41  ;;  %v1521_v1 = vmax.f32 %v601_v13, %v1265_v42  ;;  %v605_v21 = vadd.f32 %v604_v46, %v8615_v36  ;;  %v608_v43 = vpop.f32.mrb[18].mxu0  ;;  %v961_v28 = vpop.f32.mrb[18].mxu1 }
 0x116   : > { %v8797_v55 = vmul.f32 0.01, %v8781_v19  ;;  %v2042_v63 = vadd.f32 %v2041_v52, %v8700_v12  ;;  %v958_v7 = vadd.f32 %v957_v20, %v8618_v37  ;;  %v1789_v11 = vmul.f32 %v8643_v54, %v1511_v62  ;;  %v610_v18 = vpop.f32.mrb[19].mxu0  ;;  %v963_v51 = vpop.f32.mrb[19].mxu1 }
 0x117   : > { %v8806_v57 = vmul.f32 %v8635_v47, %v1521_v1  ;;  %v1268_v61 = vmul.f32 0.01, %v605_v21  ;;  %v2046_v8 = vadd.f32 %v8732_v14, %v8726_v4  ;;  %v607_v0 = vadd.f32 %v606_v56, %v8624_v39 }
 0x118   : > { %v1523_v12 = vmax.f32 %v8781_v19, %v8797_v55  ;;  %v2043_v5 = vadd.f32 %v2042_v63, %v1785_v26  ;;  %v1270_v13 = vmul.f32 0.01, %v958_v7  ;;  %v8814_v16 = vadd.f32 %v959_v58, %v8627_v40 }
 0x119   : > { %v1524_v49 = vmax.f32 %v605_v21, %v1268_v61  ;;  %v2047_v62 = vadd.f32 %v2046_v8, %v8729_v6  ;;  %v1269_v22 = vmul.f32 0.01, %v607_v0  ;;  %v609_v24 = vadd.f32 %v608_v43, %v8615_v36 }
 0x11a   : > { %2044 = vadd.xlane.f32.xlu1 %v2043_v5  ;;  %v1526_v38 = vmax.f32 %v958_v7, %v1270_v13  ;;  %v8819_v4 = vmul.f32 0.01, %v8814_v16  ;;  %v962_v14 = vadd.f32 %v961_v28, %v8618_v37  ;;  %v1793_v41 = vmul.f32 %v8643_v54, %v1515_v15 }
 0x11b   : > { %v8827_v42 = vmul.f32 %v8631_v44, %v1524_v49  ;;  %v2048_v46 = vadd.f32 %v2047_v62, %v1789_v11  ;;  %v1525_v6 = vmax.f32 %v607_v0, %v1269_v22  ;;  %v1272_v20 = vmul.f32 0.01, %v609_v24  ;;  %v614_v26 = vpop.f32.mrb[20].mxu0  ;;  %v967_v52 = vpop.f32.mrb[20].mxu1 }
 0x11c   : > { %v8830_v56 = vmul.f32 %v8640_v53, %v1526_v38  ;;  %v1527_v58 = vmax.f32 %v8814_v16, %v8819_v4  ;;  %v1274_v1 = vmul.f32 0.01, %v962_v14  ;;  %v2051_v50 = vadd.f32 %v8747_v45, %v8739_v25  ;;  %v616_v3 = vpop.f32.mrb[21].mxu0  ;;  %v969_v15 = vpop.f32.mrb[21].mxu1 }
 0x11d   : > { %2049 = vadd.xlane.f32.xlu0 %v2048_v46  ;;  %v8837_v21 = vmul.f32 %v8635_v47, %v1525_v6  ;;  %v1528_v43 = vmax.f32 %v609_v24, %v1272_v20  ;;  %v611_v28 = vadd.f32 %v610_v18, %v8624_v39  ;;  %v8841_v63 = vadd.f32 %v963_v51, %v8627_v40  ;;  %v618_v7 = vpop.f32.mrb[22].mxu0  ;;  %v971_v11 = vpop.f32.mrb[22].mxu1 }
 0x11e   : > { %v1530_v61 = vmax.f32 %v962_v14, %v1274_v1  ;;  %v2052_v8 = vadd.f32 %v2051_v50, %v8742_v27  ;;  %v615_v0 = vadd.f32 %v614_v26, %v8615_v36  ;;  %v968_v25 = vadd.f32 %v967_v52, %v8618_v37  ;;  %v620_v45 = vpop.f32.mrb[23].mxu0  ;;  %v973_v5 = vpop.f32.mrb[23].mxu1 }
 0x11f   : > { %v8847_v13 = vmul.f32 %v8631_v44, %v1528_v43  ;;  %v1273_v49 = vmul.f32 0.01, %v611_v28  ;;  %v8850_v18 = vmul.f32 0.01, %v8841_v63  ;;  %v1797_v51 = vmul.f32 %v8643_v54, %v1519_v33 }
 0x120   : > { %v8857_v27 = vmul.f32 %v8640_v53, %v1530_v61  ;;  %v2053_v62 = vadd.f32 %v2052_v8, %v1793_v41  ;;  %v1276_v22 = vmul.f32 0.01, %v615_v0  ;;  %v1278_v24 = vmul.f32 0.01, %v968_v25 }
 0x121   : > { %v1529_v38 = vmax.f32 %v611_v28, %v1273_v49  ;;  %v1531_v14 = vmax.f32 %v8841_v63, %v8850_v18  ;;  %v2056_v46 = vadd.f32 %v8778_v48, %v8770_v10  ;;  %v617_v6 = vadd.f32 %v616_v3, %v8624_v39 }
 0x122   : > { %2054 = vadd.xlane.f32.xlu1 %v2053_v62  ;;  %v1532_v20 = vmax.f32 %v615_v0, %v1276_v22  ;;  %v1534_v23 = vmax.f32 %v968_v25, %v1278_v24  ;;  %v8865_v9 = vadd.f32 %v969_v15, %v8627_v40  ;;  %v619_v33 = vadd.f32 %v618_v7, %v8615_v36 }
 0x123   : > { %v8869_v41 = vmul.f32 %v8635_v47, %v1529_v38  ;;  %v2057_v26 = vadd.f32 %v2056_v46, %v8773_v17  ;;  %v1277_v52 = vmul.f32 0.01, %v617_v6  ;;  %v972_v1 = vadd.f32 %v971_v11, %v8618_v37  ;;  %v624_v50 = vpop.f32.mrb[24].mxu0  ;;  %v977_v10 = vpop.f32.mrb[24].mxu1 }
 0x124   : > { %v8874_v48 = vmul.f32 %v8631_v44, %v1532_v20  ;;  %v8877_v3 = vmul.f32 %v8640_v53, %v1534_v23  ;;  %v8880_v15 = vmul.f32 0.01, %v8865_v9  ;;  %v1280_v43 = vmul.f32 0.01, %v619_v33  ;;  %v626_v28 = vpop.f32.mrb[25].mxu0  ;;  %v979_v7 = vpop.f32.mrb[25].mxu1 }
 0x125   : > { %v2058_v61 = vadd.f32 %v2057_v26, %v1797_v51  ;;  %v1533_v8 = vmax.f32 %v617_v6, %v1277_v52  ;;  %v1282_v17 = vmul.f32 0.01, %v972_v1  ;;  %v1801_v11 = vmul.f32 %v8643_v54, %v1523_v12  ;;  %v628_v0 = vpop.f32.mrb[26].mxu0  ;;  %v981_v25 = vpop.f32.mrb[26].mxu1 }
 0x126   : > { %v1535_v49 = vmax.f32 %v8865_v9, %v8880_v15  ;;  %v1536_v62 = vmax.f32 %v619_v33, %v1280_v43  ;;  %v2061_v22 = vadd.f32 %v8806_v57, %v8790_v59  ;;  %v621_v24 = vadd.f32 %v620_v45, %v8624_v39  ;;  %v630_v38 = vpop.f32.mrb[27].mxu0  ;;  %v983_v51 = vpop.f32.mrb[27].mxu1 }
 0x127   : > { %2059 = vadd.xlane.f32.xlu0 %v2058_v61  ;;  %v8892_v46 = vmul.f32 %v8635_v47, %v1533_v8  ;;  %v1538_v19 = vmax.f32 %v972_v1, %v1282_v17  ;;  %v8895_v55 = vadd.f32 %v973_v5, %v8627_v40  ;;  %v625_v12 = vadd.f32 %v624_v50, %v8615_v36 }
 0x128   : > { %v8899_v6 = vmul.f32 %v8631_v44, %v1536_v62  ;;  %v2062_v20 = vadd.f32 %v2061_v22, %v8793_v60  ;;  %v1281_v59 = vmul.f32 0.01, %v621_v24  ;;  %v978_v57 = vadd.f32 %v977_v10, %v8618_v37 }
 0x129   : > { %v8904_v45 = vmul.f32 %v8640_v53, %v1538_v19  ;;  %v8907_v23 = vmul.f32 0.01, %v8895_v55  ;;  %v1284_v33 = vmul.f32 0.01, %v625_v12  ;;  %v1805_v5 = vmul.f32 %v8643_v54, %v1527_v58 }
 0x12a   : > { %v2063_v26 = vadd.f32 %v2062_v20, %v1801_v11  ;;  %v1537_v52 = vmax.f32 %v621_v24, %v1281_v59  ;;  %v1286_v1 = vmul.f32 0.01, %v978_v57  ;;  %v2066_v60 = vadd.f32 %v8837_v21, %v8827_v42 }
 0x12b   : > { %v1539_v50 = vmax.f32 %v8895_v55, %v8907_v23  ;;  %v1540_v10 = vmax.f32 %v625_v12, %v1284_v33  ;;  %v627_v43 = vadd.f32 %v626_v28, %v8624_v39  ;;  %v8919_v61 = vadd.f32 %v979_v7, %v8627_v40  ;;  %v634_v8 = vpop.f32.mrb[28].mxu0  ;;  %v987_v17 = vpop.f32.mrb[28].mxu1 }
 0x12c   : > { %2064 = vadd.xlane.f32.xlu1 %v2063_v26  ;;  %v8922_v16 = vmul.f32 %v8635_v47, %v1537_v52  ;;  %v1542_v4 = vmax.f32 %v978_v57, %v1286_v1  ;;  %v2067_v58 = vadd.f32 %v2066_v60, %v8830_v56  ;;  %v629_v42 = vadd.f32 %v628_v0, %v8615_v36  ;;  %v636_v21 = vpop.f32.mrb[29].mxu0  ;;  %v989_v11 = vpop.f32.mrb[29].mxu1 }
 0x12d   : > { %v8927_v62 = vmul.f32 %v8631_v44, %v1540_v10  ;;  %v1285_v28 = vmul.f32 0.01, %v627_v43  ;;  %v8930_v7 = vmul.f32 0.01, %v8919_v61  ;;  %v982_v22 = vadd.f32 %v981_v25, %v8618_v37  ;;  %v638_v24 = vpop.f32.mrb[30].mxu0  ;;  %v991_v19 = vpop.f32.mrb[30].mxu1 }
 0x12e   : > { %v8934_v12 = vmul.f32 %v8640_v53, %v1542_v4  ;;  %v2068_v20 = vadd.f32 %v2067_v58, %v1805_v5  ;;  %v1288_v56 = vmul.f32 0.01, %v629_v42  ;;  %v1809_v0 = vmul.f32 %v8643_v54, %v1531_v14  ;;  %v640_v59 = vpop.f32.mrb[31].mxu0  ;;  %v993_v57 = vpop.f32.mrb[31].mxu1 }
 0x12f   : > { %v1541_v33 = vmax.f32 %v627_v43, %v1285_v28  ;;  %v1543_v26 = vmax.f32 %v8919_v61, %v8930_v7  ;;  %v1290_v52 = vmul.f32 0.01, %v982_v22  ;;  %v2071_v25 = vadd.f32 %v8869_v41, %v8847_v13 }
 0x130   : > { %2069 = vadd.xlane.f32.xlu0 %v2068_v20  ;;  %v1544_v1 = vmax.f32 %v629_v42, %v1288_v56  ;;  %v631_v5 = vadd.f32 %v630_v38, %v8624_v39  ;;  %v8946_v60 = vadd.f32 %v983_v51, %v8627_v40  ;;  %v635_v63 = vadd.f32 %v634_v8, %v8615_v36 }
 0x131   : > { %v8950_v18 = vmul.f32 %v8635_v47, %v1541_v33  ;;  %v1546_v14 = vmax.f32 %v982_v22, %v1290_v52  ;;  %v2072_v10 = vadd.f32 %v2071_v25, %v8857_v27  ;;  %v988_v43 = vadd.f32 %v987_v17, %v8618_v37 }
 0x132   : > { %v8955_v4 = vmul.f32 %v8631_v44, %v1544_v1  ;;  %v1289_v13 = vmul.f32 0.01, %v631_v5  ;;  %v8958_v41 = vmul.f32 0.01, %v8946_v60  ;;  %v1292_v38 = vmul.f32 0.01, %v635_v63 }
 0x133   : > { %v8961_v51 = vmul.f32 %v8640_v53, %v1546_v14  ;;  %v2073_v8 = vadd.f32 %v2072_v10, %v1809_v0  ;;  %v1294_v58 = vmul.f32 0.01, %v988_v43  ;;  %v1813_v27 = vmul.f32 %v8643_v54, %v1535_v49  ;;  %v644_v42 = vpop.f32.mrb[32].mxu0  ;;  %v997_v17 = vpop.f32.mrb[32].mxu1 }
 0x134   : > { %v1545_v28 = vmax.f32 %v631_v5, %v1289_v13  ;;  %v1547_v22 = vmax.f32 %v8946_v60, %v8958_v41  ;;  %v1548_v20 = vmax.f32 %v635_v63, %v1292_v38  ;;  %v2076_v56 = vadd.f32 %v8892_v46, %v8874_v48  ;;  %v646_v33 = vpop.f32.mrb[33].mxu0  ;;  %v999_v52 = vpop.f32.mrb[33].mxu1 }
 0x135   : > { %2074 = vadd.xlane.f32.xlu1 %v2073_v8  ;;  %v1550_v0 = vmax.f32 %v988_v43, %v1294_v58  ;;  %v637_v25 = vadd.f32 %v636_v21, %v8624_v39  ;;  %v8973_v9 = vadd.f32 %v989_v11, %v8627_v40  ;;  %v639_v15 = vadd.f32 %v638_v24, %v8615_v36  ;;  %v648_v49 = vpop.f32.mrb[34].mxu0  ;;  %v1001_v1 = vpop.f32.mrb[34].mxu1 }
 0x136   : > { %v8977_v5 = vmul.f32 %v8635_v47, %v1545_v28  ;;  %v8980_v63 = vmul.f32 %v8631_v44, %v1548_v20  ;;  %v2077_v48 = vadd.f32 %v2076_v56, %v8877_v3  ;;  %v992_v46 = vadd.f32 %v991_v19, %v8618_v37  ;;  %v650_v14 = vpop.f32.mrb[35].mxu0  ;;  %v1003_v10 = vpop.f32.mrb[35].mxu1 }
 0x137   : > { %v8985_v21 = vmul.f32 %v8640_v53, %v1550_v0  ;;  %v1293_v11 = vmul.f32 0.01, %v637_v25  ;;  %v8988_v24 = vmul.f32 0.01, %v8973_v9  ;;  %v1296_v43 = vmul.f32 0.01, %v639_v15 }
 0x138   : > { %v2078_v13 = vadd.f32 %v2077_v48, %v1813_v27  ;;  %v1298_v38 = vmul.f32 0.01, %v992_v46  ;;  %v1817_v8 = vmul.f32 %v8643_v54, %v1539_v50  ;;  %v2081_v3 = vadd.f32 %v8922_v16, %v8899_v6 }
 0x139   : > { %v1549_v19 = vmax.f32 %v637_v25, %v1293_v11  ;;  %v1551_v58 = vmax.f32 %v8973_v9, %v8988_v24  ;;  %v1552_v28 = vmax.f32 %v639_v15, %v1296_v43  ;;  %v641_v20 = vadd.f32 %v640_v59, %v8624_v39 }
 0x13a   : > { %2079 = vadd.xlane.f32.xlu0 %v2078_v13  ;;  %v1554_v56 = vmax.f32 %v992_v46, %v1298_v38  ;;  %v2082_v27 = vadd.f32 %v2081_v3, %v8904_v45  ;;  %v9001_v0 = vadd.f32 %v993_v57, %v8627_v40  ;;  %v645_v55 = vadd.f32 %v644_v42, %v8615_v36 }
 0x13b   : > { %v9005_v23 = vmul.f32 %v8635_v47, %v1549_v19  ;;  %v9008_v6 = vmul.f32 %v8631_v44, %v1552_v28  ;;  %v1297_v50 = vmul.f32 0.01, %v641_v20  ;;  %v998_v16 = vadd.f32 %v997_v17, %v8618_v37  ;;  %v654_v25 = vpop.f32.mrb[36].mxu0  ;;  %v1007_v59 = vpop.f32.mrb[36].mxu1 }
 0x13c   : > { %v9012_v15 = vmul.f32 %v8640_v53, %v1554_v56  ;;  %v2083_v45 = vadd.f32 %v2082_v27, %v1817_v8  ;;  %v9015_v57 = vmul.f32 0.01, %v9001_v0  ;;  %v1300_v48 = vmul.f32 0.01, %v645_v55  ;;  %v656_v42 = vpop.f32.mrb[37].mxu0  ;;  %v1009_v46 = vpop.f32.mrb[37].mxu1 }
 0x13d   : > { %v1553_v11 = vmax.f32 %v641_v20, %v1297_v50  ;;  %v1302_v43 = vmul.f32 0.01, %v998_v16  ;;  %v1821_v13 = vmul.f32 %v8643_v54, %v1543_v26  ;;  %v2086_v17 = vadd.f32 %v8950_v18, %v8927_v62  ;;  %v658_v38 = vpop.f32.mrb[38].mxu0  ;;  %v1011_v3 = vpop.f32.mrb[38].mxu1 }
 0x13e   : > { %2084 = vadd.xlane.f32.xlu1 %v2083_v45  ;;  %v1555_v8 = vmax.f32 %v9001_v0, %v9015_v57  ;;  %v1556_v19 = vmax.f32 %v645_v55, %v1300_v48  ;;  %v647_v28 = vadd.f32 %v646_v33, %v8624_v39  ;;  %v9027_v20 = vadd.f32 %v999_v52, %v8627_v40  ;;  %v9029_v56 = vpop.f32.mrb[39].mxu0  ;;  %v9031_v61 = vpop.f32.mrb[39].mxu1 }
 0x13f   : > { %v1831_v7 = vmul.f32 %v8635_v47, %v1553_v11  ;;  %v1558_v26 = vmax.f32 %v998_v16, %v1302_v43  ;;  %v2087_v62 = vadd.f32 %v2086_v17, %v8934_v12  ;;  %v649_v18 = vadd.f32 %v648_v49, %v8615_v36 }
 0x140   : > { %v9037_v27 = vmul.f32 %v8631_v44, %v1556_v19  ;;  %v1301_v55 = vmul.f32 0.01, %v647_v28  ;;  %v9040_v33 = vmul.f32 0.01, %v9027_v20  ;;  %v1002_v52 = vadd.f32 %v1001_v1, %v8618_v37 }
 0x141   : > { %v9044_v50 = vmul.f32 %v8640_v53, %v1558_v26  ;;  %v2088_v45 = vadd.f32 %v2087_v62, %v1821_v13  ;;  %v1304_v48 = vmul.f32 0.01, %v649_v18  ;;  %v1825_v12 = vmul.f32 %v8643_v54, %v1547_v22 }
 0x142   : > { %v1557_v49 = vmax.f32 %v647_v28, %v1301_v55  ;;  %v1559_v16 = vmax.f32 %v9027_v20, %v9040_v33  ;;  %v1306_v11 = vmul.f32 0.01, %v1002_v52  ;;  %v2091_v43 = vadd.f32 %v8977_v5, %v8955_v4 }
 0x143   : > { %2089 = vadd.xlane.f32.xlu0 %v2088_v45  ;;  %v1560_v1 = vmax.f32 %v649_v18, %v1304_v48  ;;  %v651_v17 = vadd.f32 %v650_v14, %v8624_v39  ;;  %v9056_v13 = vadd.f32 %v1003_v10, %v8627_v40  ;;  %v655_v19 = vadd.f32 %v654_v25, %v8615_v36  ;;  %v664_v60 = vpop.f32.mrb[40].mxu0  ;;  %v1017_v41 = vpop.f32.mrb[40].mxu1 }
 0x144   : > { %v9060_v22 = vmul.f32 %v8635_v47, %v1557_v49  ;;  %v1562_v28 = vmax.f32 %v1002_v52, %v1306_v11  ;;  %v2092_v26 = vadd.f32 %v2091_v43, %v8961_v51  ;;  %v1008_v62 = vadd.f32 %v1007_v59, %v8618_v37  ;;  %v9064_v4 = vpop.f32.mrb[41].mxu0  ;;  %v9066_v5 = vpop.f32.mrb[41].mxu1 }
 0x145   : > { %v9069_v14 = vmul.f32 %v8631_v44, %v1560_v1  ;;  %v1305_v10 = vmul.f32 0.01, %v651_v17  ;;  %v9072_v25 = vmul.f32 0.01, %v9056_v13  ;;  %v1308_v18 = vmul.f32 0.01, %v655_v19 }
 0x146   : > { %v9075_v55 = vmul.f32 %v8640_v53, %v1562_v28  ;;  %v2093_v52 = vadd.f32 %v2092_v26, %v1825_v12  ;;  %v1310_v45 = vmul.f32 0.01, %v1008_v62  ;;  %v1829_v51 = vmul.f32 %v8643_v54, %v1551_v58  ;;  %v668_v59 = vpop.f32.mrb[42].mxu0  ;;  %v9081_v48 = vpop.f32.mrb[42].mxu1 }
 0x147   : > { %v1561_v49 = vmax.f32 %v651_v17, %v1305_v10  ;;  %v1563_v11 = vmax.f32 %v9056_v13, %v9072_v25  ;;  %v1564_v43 = vmax.f32 %v655_v19, %v1308_v18  ;;  %v2096_v1 = vadd.f32 %v9005_v23, %v8980_v63  ;;  %v9087_v28 = vpop.f32.mrb[43].mxu0  ;;  %v9089_v12 = vpop.f32.mrb[43].mxu1 }
 0x148   : > { %2094 = vadd.xlane.f32.xlu1 %v2093_v52  ;;  %v1566_v26 = vmax.f32 %v1008_v62, %v1310_v45  ;;  %v657_v9 = vadd.f32 %v656_v42, %v8624_v39  ;;  %v9093_v24 = vadd.f32 %v1009_v46, %v8627_v40  ;;  %v659_v58 = vadd.f32 %v658_v38, %v8615_v36 }
 0x149   : > { %v9097_v17 = vmul.f32 %v8635_v47, %v1561_v49  ;;  %v9100_v19 = vmul.f32 %v8631_v44, %v1564_v43  ;;  %v2097_v63 = vadd.f32 %v2096_v1, %v8985_v21  ;;  %v1012_v23 = vadd.f32 %v1011_v3, %v8618_v37 }
 0x14a   : > { %v9105_v10 = vmul.f32 %v8640_v53, %v1566_v26  ;;  %v1309_v62 = vmul.f32 0.01, %v657_v9  ;;  %v9108_v42 = vmul.f32 0.01, %v9093_v24  ;;  %v1312_v46 = vmul.f32 0.01, %v659_v58 }
 0x14b   : > { %v2098_v18 = vadd.f32 %v2097_v63, %v1829_v51  ;;  %v1314_v38 = vmul.f32 0.01, %v1012_v23  ;;  %v1833_v52 = vmul.f32 %v8643_v54, %v1555_v8  ;;  %v2101_v45 = vadd.f32 %v1831_v7, %v9008_v6  ;;  %v674_v21 = vpop.f32.mrb[44].mxu0  ;;  %v9115_v49 = vpop.f32.mrb[44].mxu1 }
 0x14c   : > { %v1565_v3 = vmax.f32 %v657_v9, %v1309_v62  ;;  %v1567_v43 = vmax.f32 %v9093_v24, %v9108_v42  ;;  %v1568_v1 = vmax.f32 %v659_v58, %v1312_v46  ;;  %v661_v26 = vadd.f32 %v9029_v56, %v8624_v39  ;;  %v9121_v51 = vpop.f32.mrb[45].mxu0  ;;  %v9123_v63 = vpop.f32.mrb[45].mxu1 }
 0x14d   : > { %2099 = vadd.xlane.f32.xlu0 %v2098_v18  ;;  %v1570_v0 = vmax.f32 %v1012_v23, %v1314_v38  ;;  %v2102_v57 = vadd.f32 %v2101_v45, %v9012_v15  ;;  %v9128_v6 = vadd.f32 %v9031_v61, %v8627_v40  ;;  %v665_v8 = vadd.f32 %v664_v60, %v8615_v36  ;;  %v9131_v7 = vpop.f32.mrb[46].mxu0  ;;  %v9133_v9 = vpop.f32.mrb[46].mxu1 }
 0x14e   : > { %v9136_v56 = vmul.f32 %v8635_v47, %v1565_v3  ;;  %v9139_v58 = vmul.f32 %v8631_v44, %v1568_v1  ;;  %v1313_v62 = vmul.f32 0.01, %v661_v26  ;;  %v1018_v23 = vadd.f32 %v1017_v41, %v8618_v37  ;;  %v9142_v15 = vpop.f32.mrb[47].mxu0  ;;  %v9144_v46 = vpop.f32.mrb[47].mxu1 }
 0x14f   : > { %v9147_v61 = vmul.f32 %v8640_v53, %v1570_v0  ;;  %v2103_v60 = vadd.f32 %v2102_v57, %v1833_v52  ;;  %v9150_v18 = vmul.f32 0.01, %v9128_v6  ;;  %v1316_v38 = vmul.f32 0.01, %v665_v8 }
 0x150   : > { %v1569_v45 = vmax.f32 %v661_v26, %v1313_v62  ;;  %v1318_v3 = vmul.f32 0.01, %v1018_v23  ;;  %v1837_v1 = vmul.f32 %v8643_v54, %v1559_v16  ;;  %v2106_v41 = vadd.f32 %v9060_v22, %v9037_v27 }
 0x151   : > { %2104 = vadd.xlane.f32.xlu1 %v2103_v60  ;;  %v1572_v29 = vmax.f32 %v665_v8, %v1316_v38  ;;  %v667_v52 = vadd.f32 %v9064_v4, %v8624_v39  ;;  %v9164_v26 = vadd.f32 %v9066_v5, %v8627_v40  ;;  %v669_v27 = vadd.f32 %v668_v59, %v8615_v36 }
 0x152   : > { %v9167_v57 = vmul.f32 %v8635_v47, %v1569_v45  ;;  %v1574_v20 = vmax.f32 %v1018_v23, %v1318_v3  ;;  %v2107_v33 = vadd.f32 %v2106_v41, %v9044_v50  ;;  %v1022_v4 = vadd.f32 %v9081_v48, %v8618_v37 }
 0x153   : > { %v9172_v16 = vmul.f32 %v8631_v44, %v1572_v29  ;;  %v1317_v22 = vmul.f32 0.01, %v667_v52  ;;  %v9175_v8 = vmul.f32 0.01, %v9164_v26  ;;  %v9179_v5 = vpop.f32.mrb[48].mxu0  ;;  %v9181_v62 = vpop.f32.mrb[48].mxu1  ;;  %v1841_v29 = vmul.f32 %v8643_v54, %v1563_v11 }
 0x154   : > { %v9184_v23 = vmul.f32 %v8640_v53, %v1574_v20  ;;  %v2108_v50 = vadd.f32 %v2107_v33, %v1837_v1  ;;  %v1320_v60 = vmul.f32 0.01, %v669_v27  ;;  %v9190_v59 = vpop.f32.mrb[49].mxu0  ;;  %v9192_v38 = vpop.f32.mrb[49].mxu1  ;;  %v1322_v3 = vmul.f32 0.01, %v1022_v4 }
 0x155   : > { %v1573_v45 = vmax.f32 %v667_v52, %v1317_v22  ;;  %v2111_v41 = vadd.f32 %v9097_v17, %v9069_v14  ;;  %v9198_v20 = vpop.f32.mrb[50].mxu0  ;;  %v9200_v1 = vpop.f32.mrb[50].mxu1  ;;  %v671_v25 = vadd.f32 %v9087_v28, %v8624_v39  ;;  %v9206_v11 = vadd.f32 %v9089_v12, %v8627_v40 }
 0x156   : > { %2109 = vadd.xlane.f32.xlu0 %v2108_v50  ;;  %v1576_v13 = vmax.f32 %v669_v27, %v1320_v60  ;;  %v675_v52 = vadd.f32 %v674_v21, %v8615_v36  ;;  %v9209_v33 = vpop.f32.mrb[51].mxu0  ;;  %v9211_v22 = vpop.f32.mrb[51].mxu1  ;;  %v1578_v17 = vmax.f32 %v1022_v4, %v1322_v3  ;;  %v1028_v27 = vadd.f32 %v9115_v49, %v8618_v37 }
 0x157   : > { %v1851_v14 = vmul.f32 %v8635_v47, %v1573_v45  ;;  %v2112_v2 = vadd.f32 %v2111_v41, %v9075_v55  ;;  %v1321_v50 = vmul.f32 0.01, %v671_v25  ;;  %v9221_v12 = vmul.f32 0.01, %v9206_v11 }
 0x158   : > { %v9218_v28 = vmul.f32 %v8631_v44, %v1576_v13  ;;  %v1324_v21 = vmul.f32 0.01, %v675_v52  ;;  %v9224_v60 = vmul.f32 %v8640_v53, %v1578_v17  ;;  %v1326_v0 = vmul.f32 0.01, %v1028_v27 }
 0x159   : > { %v2113_v48 = vadd.f32 %v2112_v2, %v1841_v29  ;;  %v1845_v55 = vmul.f32 %v8643_v54, %v1567_v43  ;;  %v1577_v4 = vmax.f32 %v671_v25, %v1321_v50  ;;  %v1579_v49 = vmax.f32 %v9206_v11, %v9221_v12 }
 0x15a   : > { %v1580_v45 = vmax.f32 %v675_v52, %v1324_v21  ;;  %v2116_v3 = vadd.f32 %v9136_v56, %v9100_v19  ;;  %v1582_v41 = vmax.f32 %v1028_v27, %v1326_v0  ;;  %v677_v13 = vadd.f32 %v9121_v51, %v8624_v39 }
 0x15b   : > { %2114 = vadd.xlane.f32.xlu1 %v2113_v48  ;;  %v9238_v2 = vadd.f32 %v9123_v63, %v8627_v40  ;;  %v679_v24 = vadd.f32 %v9131_v7, %v8615_v36  ;;  %v9242_v42 = vpop.f32.mrb[52].mxu0  ;;  %v9244_v43 = vpop.f32.mrb[52].mxu1  ;;  %v9247_v29 = vmul.f32 %v8635_v47, %v1577_v4  ;;  %v1032_v51 = vadd.f32 %v9133_v9, %v8618_v37 }
 0x15c   : > { %v9250_v19 = vmul.f32 %v8631_v44, %v1580_v45  ;;  %v2117_v56 = vadd.f32 %v2116_v3, %v9105_v10  ;;  %v9255_v63 = vpop.f32.mrb[53].mxu0  ;;  %v9257_v0 = vpop.f32.mrb[53].mxu1  ;;  %v9260_v7 = vmul.f32 %v8640_v53, %v1582_v41  ;;  %v1325_v48 = vmul.f32 0.01, %v677_v13 }
 0x15d   : > { %v9263_v25 = vmul.f32 0.01, %v9238_v2  ;;  %v1328_v52 = vmul.f32 0.01, %v679_v24  ;;  %v1330_v27 = vmul.f32 0.01, %v1032_v51  ;;  %v12349_v10 = vmax.f32 %v9128_v6, %v9150_v18 }
 0x15e   : > { %v2118_v17 = vadd.f32 %v2117_v56, %v1845_v55  ;;  %v2121_v9 = vadd.f32 %v9167_v57, %v9139_v58  ;;  %v9271_v21 = vpop.f32.mrb[54].mxu0  ;;  %v9273_v4 = vpop.f32.mrb[54].mxu1  ;;  %v1581_v45 = vmax.f32 %v677_v13, %v1325_v48  ;;  %v681_v55 = vadd.f32 %v9142_v15, %v8624_v39 }
 0x15f   : > { %v1849_v50 = vmul.f32 %v8643_v54, %v12349_v10  ;;  %v1584_v41 = vmax.f32 %v679_v24, %v1328_v52  ;;  %v9279_v56 = vpop.f32.mrb[55].mxu0  ;;  %v9281_v6 = vpop.f32.mrb[55].mxu1  ;;  %v1586_v18 = vmax.f32 %v1032_v51, %v1330_v27  ;;  %v9286_v57 = vadd.f32 %v9144_v46, %v8627_v40 }
 0x160   : > { %2119 = vadd.xlane.f32.xlu0 %v2118_v17  ;;  %v2122_v58 = vadd.f32 %v2121_v9, %v9147_v61  ;;  %v685_v13 = vadd.f32 %v9179_v5, %v8615_v36  ;;  %v9291_v24 = vmul.f32 %v8635_v47, %v1581_v45  ;;  %v1329_v48 = vmul.f32 0.01, %v681_v55 }
 0x161   : > { %v9294_v15 = vmul.f32 %v8631_v44, %v1584_v41  ;;  %v1038_v52 = vadd.f32 %v9181_v62, %v8618_v37  ;;  %v9299_v51 = vmul.f32 %v8640_v53, %v1586_v18  ;;  %v9302_v46 = vmul.f32 0.01, %v9286_v57 }
 0x162   : > { %v2123_v61 = vadd.f32 %v2122_v58, %v1849_v50  ;;  %v1332_v17 = vmul.f32 0.01, %v685_v13  ;;  %v1585_v27 = vmax.f32 %v681_v55, %v1329_v48  ;;  %v12350_v10 = vmax.f32 %v9164_v26, %v9175_v8 }
 0x163   : > { %v1334_v5 = vmul.f32 0.01, %v1038_v52  ;;  %v2126_v45 = vadd.f32 %v1851_v14, %v9172_v16  ;;  %v9309_v41 = vpop.f32.mrb[56].mxu0  ;;  %v9311_v62 = vpop.f32.mrb[56].mxu1  ;;  %v687_v55 = vadd.f32 %v9190_v59, %v8624_v39  ;;  %v9319_v58 = vadd.f32 %v9192_v38, %v8627_v40 }
 0x164   : > { %v1853_v9 = vmul.f32 %v8643_v54, %v12350_v10  ;;  %2124 = vadd.xlane.f32.xlu1 %v2123_v61  ;;  %v1588_v18 = vmax.f32 %v685_v13, %v1332_v17  ;;  %v9321_v26 = vpop.f32.mrb[57].mxu0  ;;  %v9323_v8 = vpop.f32.mrb[57].mxu1  ;;  %v9326_v16 = vmul.f32 %v8635_v47, %v1585_v27  ;;  %v689_v13 = vadd.f32 %v9198_v20, %v8615_v36 }
 0x165   : > { %v1590_v14 = vmax.f32 %v1038_v52, %v1334_v5  ;;  %v2127_v48 = vadd.f32 %v2126_v45, %v9184_v23  ;;  %v9331_v61 = vpop.f32.mrb[58].mxu0  ;;  %v9333_v59 = vpop.f32.mrb[58].mxu1  ;;  %v1333_v17 = vmul.f32 0.01, %v687_v55  ;;  %v9339_v10 = vmul.f32 0.01, %v9319_v58 }
 0x166   : > { %v9336_v38 = vmul.f32 %v8631_v44, %v1588_v18  ;;  %v1042_v27 = vadd.f32 %v9200_v1, %v8618_v37  ;;  %v9343_v52 = vpop.f32.mrb[59].mxu0  ;;  %v9345_v23 = vpop.f32.mrb[59].mxu1  ;;  %v1336_v45 = vmul.f32 0.01, %v689_v13  ;;  %v1857_v18 = vmul.f32 %v8643_v54, %v1579_v49 }
 0x167   : > { %v9348_v20 = vmul.f32 %v8640_v53, %v1590_v14  ;;  %v2128_v5 = vadd.f32 %v2127_v48, %v1853_v9  ;;  %v1589_v50 = vmax.f32 %v687_v55, %v1333_v17  ;;  %v2131_v1 = vadd.f32 %v9247_v29, %v9218_v28 }
 0x168   : > { %v1338_v35 = vmul.f32 0.01, %v1042_v27  ;;  %v1592_v32 = vmax.f32 %v689_v13, %v1336_v45  ;;  %v691_v14 = vadd.f32 %v9209_v33, %v8624_v39  ;;  %v9362_v9 = vadd.f32 %v9211_v22, %v8627_v40 }
 0x169   : > { %2129 = vadd.xlane.f32.xlu0 %v2128_v5  ;;  %v695_v11 = vadd.f32 %v9242_v42, %v8615_v36  ;;  %v9367_v12 = vmul.f32 %v8635_v47, %v1589_v50  ;;  %v2132_v55 = vadd.f32 %v2131_v1, %v9224_v60  ;;  %v1048_v28 = vadd.f32 %v9244_v43, %v8618_v37 }
 0x16a   : > { %v1594_v49 = vmax.f32 %v1042_v27, %v1338_v35  ;;  %v9373_v29 = vmul.f32 %v8631_v44, %v1592_v32  ;;  %v1337_v33 = vmul.f32 0.01, %v691_v14  ;;  %v9376_v48 = vmul.f32 0.01, %v9362_v9  ;;  %v270_v27 = vld [vmem:[%s8438_s25 + $0x198] sm:$0xff] }
 0x16b   : > { %v1340_v22 = vmul.f32 0.01, %v695_v11  ;;  %v2133_v42 = vadd.f32 %v2132_v55, %v1857_v18  ;;  %v1342_v50 = vmul.f32 0.01, %v1048_v28  ;;  %v12351_v35 = vmax.f32 %v9238_v2, %v9263_v25  ;;  %v9385_v17 = vpop.f32.mrb[60].mxu0  ;;  %v9387_v43 = vpop.f32.mrb[60].mxu1 }
 0x16c   : > { %v9379_v13 = vmul.f32 %v8640_v53, %v1594_v49  ;;  %v1593_v32 = vmax.f32 %v691_v14, %v1337_v33  ;;  %v2136_v45 = vadd.f32 %v9291_v24, %v9250_v19  ;;  %v9393_v1 = vpop.f32.mrb[61].mxu0  ;;  %v9395_v18 = vpop.f32.mrb[61].mxu1  ;;  %v697_v25 = vadd.f32 %v9255_v63, %v8624_v39 }
 0x16d   : > { %v1861_v60 = vmul.f32 %v8643_v54, %v12351_v35  ;;  %v1596_v5 = vmax.f32 %v695_v11, %v1340_v22  ;;  %2134 = vadd.xlane.f32.xlu1 %v2133_v42  ;;  %v1598_v2 = vmax.f32 %v1048_v28, %v1342_v50  ;;  %v9401_v49 = vadd.f32 %v9257_v0, %v8627_v40  ;;  %v9405_v11 = vpop.f32.mrb[62].mxu0  ;;  %v9407_v19 = vpop.f32.mrb[62].mxu1 }
 0x16e   : > { %v699_v14 = vadd.f32 %v9271_v21, %v8615_v36  ;;  %v9410_v24 = vmul.f32 %v8635_v47, %v1593_v32  ;;  %v2137_v63 = vadd.f32 %v2136_v45, %v9260_v7  ;;  %v1052_v0 = vadd.f32 %v9273_v4, %v8618_v37  ;;  %v9418_v28 = vpop.f32.mrb[63].mxu0  ;;  %v9420_v21 = vpop.f32.mrb[63].mxu1  ;;  %v269_v45 = vld [vmem:[%s8438_s25 + $0x190] sm:$0xff] }
 0x16f   : > { %v9413_v55 = vmul.f32 %v8631_v44, %v1596_v5  ;;  %v9423_v33 = vmul.f32 %v8640_v53, %v1598_v2  ;;  %v1341_v22 = vmul.f32 0.01, %v697_v25  ;;  %v9426_v42 = vmul.f32 0.01, %v9401_v49 }
 0x170   : > { %v1344_v50 = vmul.f32 0.01, %v699_v14  ;;  %v2138_v35 = vadd.f32 %v2137_v63, %v1861_v60  ;;  %v1346_v32 = vmul.f32 0.01, %v1052_v0  ;;  %v12352_v7 = vmax.f32 %v9286_v57, %v9302_v46 }
 0x171   : > { %v2141_v4 = vadd.f32 %v9326_v16, %v9294_v15  ;;  %v1597_v3 = vmax.f32 %v697_v25, %v1341_v22  ;;  %v701_v31 = vadd.f32 %v9279_v56, %v8624_v39  ;;  %v9443_v57 = vadd.f32 %v9281_v6, %v8627_v40 }
 0x172   : > { %v1865_v5 = vmul.f32 %v8643_v54, %v12352_v7  ;;  %v1600_v34 = vmax.f32 %v699_v14, %v1344_v50  ;;  %2139 = vadd.xlane.f32.xlu0 %v2138_v35  ;;  %v1602_v60 = vmax.f32 %v1052_v0, %v1346_v32  ;;  %v705_v15 = vadd.f32 %v9309_v41, %v8615_v36 }
 0x173   : > { %v2142_v63 = vadd.f32 %v2141_v4, %v9299_v51  ;;  %v9447_v46 = vpop.f32.mrb[64].mxu0  ;;  %v9449_v16 = vpop.f32.mrb[64].mxu1  ;;  %v9452_v25 = vmul.f32 %v8635_v47, %v1597_v3  ;;  %v1345_v14 = vmul.f32 0.01, %v701_v31  ;;  %v308_v0 = vpack.c.bf16 %v270_v27, %v269_v45 }
 0x174   : > { %v9455_v56 = vmul.f32 %v8631_v44, %v1600_v34  ;;  %v9457_v51 = vpop.f32.mrb[65].mxu0  ;;  %v9459_v22 = vpop.f32.mrb[65].mxu1  ;;  %v9462_v6 = vmul.f32 %v8640_v53, %v1602_v60  ;;  %v9465_v50 = vmul.f32 0.01, %v9443_v57  ;;  %v1348_v35 = vmul.f32 0.01, %v705_v15 }
 0x175   : > { %v2143_v41 = vadd.f32 %v2142_v63, %v1865_v5  ;;  %v9467_v32 = vpop.f32.mrb[66].mxu0  ;;  %v9469_v3 = vpop.f32.mrb[66].mxu1  ;;  %v1601_v34 = vmax.f32 %v701_v31, %v1345_v14  ;;  %8266 = vmatmul.mubr.msk.bf16.gmra.mrb[100].mxu0 %vm433_vm0, %v308_v0  ;;  %v1058_v27 = vadd.f32 %v9311_v62, %v8618_v37  ;;  %v12353_v7 = vmax.f32 %v9319_v58, %v9339_v10 }
 0x176   : > { %v2146_v5 = vadd.f32 %v9367_v12, %v9336_v38  ;;  %v9480_v45 = vpop.f32.mrb[67].mxu0  ;;  %v9482_v60 = vpop.f32.mrb[67].mxu1  ;;  %v1604_v63 = vmax.f32 %v705_v15, %v1348_v35  ;;  %v707_v62 = vadd.f32 %v9321_v26, %v8624_v39  ;;  %v9490_v58 = vadd.f32 %v9323_v8, %v8627_v40  ;;  %8298 = vmatmul.mubr.msk.bf16.gmra.mrb[100].mxu1 %vm433_vm0, %v308_v0 }
 0x177   : > { %v1869_v4 = vmul.f32 %v8643_v54, %v12353_v7  ;;  %2144 = vadd.xlane.f32.xlu1 %v2143_v41  ;;  %v9493_v10 = vmul.f32 %v8635_v47, %v1601_v34  ;;  %v1350_v38 = vmul.f32 0.01, %v1058_v27  ;;  %v709_v14 = vadd.f32 %v9331_v61, %v8615_v36 }
 0x178   : > { %v2147_v12 = vadd.f32 %v2146_v5, %v9348_v20  ;;  %v12354_v41 = vmov 0   ;;  %v9501_v15 = vmul.f32 %v8631_v44, %v1604_v63  ;;  %v1349_v26 = vmul.f32 0.01, %v707_v62 }
 0x179   : > { %822 = vmatprep.mubr.bf16.mxu0 %v12354_v41  ;;  %v9504_v8 = vmul.f32 0.01, %v9490_v58  ;;  %v1062_v35 = vadd.f32 %v9333_v59, %v8618_v37  ;;  %1175 = vmatprep.mubr.bf16.mxu1 %v12354_v41  ;;  %v1606_v20 = vmax.f32 %v1058_v27, %v1350_v38  ;;  %v1352_v7 = vmul.f32 0.01, %v709_v14 }
 0x17a   : > { %v2148_v34 = vadd.f32 %v2147_v12, %v1869_v4  ;;  %v12355_v61 = vmax.f32 %v9362_v9, %v9376_v48  ;;  %v1605_v5 = vmax.f32 %v707_v62, %v1349_v26  ;;  %v2151_v2 = vadd.f32 %v9410_v24, %v9373_v29 }
 0x17b   : > { %v1354_v31 = vmul.f32 0.01, %v1062_v35  ;;  %v9517_v30 = vpop.f32.mrb[68].mxu0  ;;  %v9519_v59 = vpop.f32.mrb[68].mxu1  ;;  %v9522_v27 = vmul.f32 %v8640_v53, %v1606_v20  ;;  %v1608_v4 = vmax.f32 %v709_v14, %v1352_v7  ;;  %v711_v9 = vadd.f32 %v9343_v52, %v8624_v39 }
 0x17c   : > { %v1873_v0 = vmul.f32 %v8643_v54, %v12355_v61  ;;  %2149 = vadd.xlane.f32.xlu0 %v2148_v34  ;;  %v9528_v48 = vadd.f32 %v9345_v23, %v8627_v40  ;;  %v9530_v62 = vpop.f32.mrb[69].mxu0  ;;  %v9532_v38 = vpop.f32.mrb[69].mxu1  ;;  %v9535_v29 = vmul.f32 %v8635_v47, %v1605_v5  ;;  %v2152_v12 = vadd.f32 %v2151_v2, %v9379_v13 }
 0x17d   : > { %v1610_v24 = vmax.f32 %v1062_v35, %v1354_v31  ;;  %v715_v14 = vadd.f32 %v9385_v17, %v8615_v36  ;;  %v9540_v26 = vpop.f32.mrb[70].mxu0  ;;  %v9542_v52 = vpop.f32.mrb[70].mxu1  ;;  %v9545_v23 = vmul.f32 %v8631_v44, %v1608_v4  ;;  %v1353_v20 = vmul.f32 0.01, %v711_v9 }
 0x17e   : > { %v9548_v34 = vmul.f32 0.01, %v9528_v48  ;;  %v1068_v7 = vadd.f32 %v9387_v43, %v8618_v37  ;;  %v9552_v31 = vpop.f32.mrb[71].mxu0  ;;  %v9554_v13 = vpop.f32.mrb[71].mxu1  ;;  %v2153_v2 = vadd.f32 %v2152_v12, %v1873_v0  ;;  %v12357_v61 = vmax.f32 %v9401_v49, %v9426_v42 }
 0x17f   : > { %12356 = vst [vmem:[#allocation9_spill] sm:$0xff] %v9554_v13  ;;  %v9557_v17 = vmul.f32 %v8640_v53, %v1610_v24  ;;  %v1356_v35 = vmul.f32 0.01, %v715_v14  ;;  %v1609_v4 = vmax.f32 %v711_v9, %v1353_v20  ;;  %v2156_v43 = vadd.f32 %v9452_v25, %v9413_v55 }
 0x180   : > { %v1877_v5 = vmul.f32 %v8643_v54, %v12357_v61  ;;  %v1358_v41 = vmul.f32 0.01, %v1068_v7  ;;  %2154 = vadd.xlane.f32.xlu1 %v2153_v2  ;;  %v717_v24 = vadd.f32 %v9393_v1, %v8624_v39  ;;  %v9571_v0 = vadd.f32 %v9395_v18, %v8627_v40 }
 0x181   : > { %v1612_v13 = vmax.f32 %v715_v14, %v1356_v35  ;;  %v719_v49 = vadd.f32 %v9405_v11, %v8615_v36  ;;  %v9576_v42 = vmul.f32 %v8635_v47, %v1609_v4  ;;  %v2157_v12 = vadd.f32 %v2156_v43, %v9423_v33 }
 0x182   : > { %v1614_v9 = vmax.f32 %v1068_v7, %v1358_v41  ;;  %v1072_v55 = vadd.f32 %v9407_v19, %v8618_v37  ;;  %v1357_v1 = vmul.f32 0.01, %v717_v24  ;;  %v9585_v14 = vmul.f32 0.01, %v9571_v0 }
 0x183   : > { %v9582_v25 = vmul.f32 %v8631_v44, %v1612_v13  ;;  %v1360_v18 = vmul.f32 0.01, %v719_v49  ;;  %v2158_v11 = vadd.f32 %v2157_v12, %v1877_v5  ;;  %v12358_v41 = vmax.f32 %v9443_v57, %v9465_v50  ;;  %v9594_v7 = vpop.f32.mrb[72].mxu0  ;;  %v9596_v19 = vpop.f32.mrb[72].mxu1 }
 0x184   : > { %v9588_v20 = vmul.f32 %v8640_v53, %v1614_v9  ;;  %v1362_v2 = vmul.f32 0.01, %v1072_v55  ;;  %v1613_v13 = vmax.f32 %v717_v24, %v1357_v1  ;;  %v2161_v4 = vadd.f32 %v9493_v10, %v9455_v56  ;;  %v9602_v43 = vpop.f32.mrb[73].mxu0  ;;  %v9604_v5 = vpop.f32.mrb[73].mxu1 }
 0x185   : > { %v1881_v33 = vmul.f32 %v8643_v54, %v12358_v41  ;;  %v1616_v61 = vmax.f32 %v719_v49, %v1360_v18  ;;  %2159 = vadd.xlane.f32.xlu0 %v2158_v11  ;;  %v721_v50 = vadd.f32 %v9418_v28, %v8624_v39  ;;  %v9610_v9 = vadd.f32 %v9420_v21, %v8627_v40  ;;  %v9614_v49 = vpop.f32.mrb[74].mxu0  ;;  %v9616_v12 = vpop.f32.mrb[74].mxu1 }
 0x186   : > { %v1618_v57 = vmax.f32 %v1072_v55, %v1362_v2  ;;  %v725_v24 = vadd.f32 %v9447_v46, %v8615_v36  ;;  %v9619_v56 = vmul.f32 %v8635_v47, %v1613_v13  ;;  %v2162_v55 = vadd.f32 %v2161_v4, %v9462_v6  ;;  %v9627_v21 = vpop.f32.mrb[75].mxu0  ;;  %v9629_v1 = vpop.f32.mrb[75].mxu1 }
 0x187   : > { %v9622_v10 = vmul.f32 %v8631_v44, %v1616_v61  ;;  %v1078_v28 = vadd.f32 %v9449_v16, %v8618_v37  ;;  %12359 = vst [vmem:[#allocation10_spill] sm:$0xff] %v9629_v1  ;;  %v1361_v18 = vmul.f32 0.01, %v721_v50  ;;  %v9635_v11 = vmul.f32 0.01, %v9610_v9 }
 0x188   : > { %v9632_v46 = vmul.f32 %v8640_v53, %v1618_v57  ;;  %v1364_v2 = vmul.f32 0.01, %v725_v24  ;;  %v2163_v41 = vadd.f32 %v2162_v55, %v1881_v33  ;;  %v12360_v6 = vmax.f32 %v9490_v58, %v9504_v8 }
 0x189   : > { %v1366_v13 = vmul.f32 0.01, %v1078_v28  ;;  %v2166_v16 = vadd.f32 %v9535_v29, %v9501_v15  ;;  %v1617_v4 = vmax.f32 %v721_v50, %v1361_v18  ;;  %v727_v63 = vadd.f32 %v9457_v51, %v8624_v39 }
 0x18a   : > { %v1885_v61 = vmul.f32 %v8643_v54, %v12360_v6  ;;  %v1620_v35 = vmax.f32 %v725_v24, %v1364_v2  ;;  %2164 = vadd.xlane.f32.xlu1 %v2163_v41  ;;  %v9650_v58 = vadd.f32 %v9459_v22, %v8627_v40  ;;  %v729_v8 = vadd.f32 %v9467_v32, %v8615_v36 }
 0x18b   : > { %v1622_v1 = vmax.f32 %v1078_v28, %v1366_v13  ;;  %v2167_v33 = vadd.f32 %v2166_v16, %v9522_v27  ;;  %v9654_v15 = vpop.f32.mrb[76].mxu0  ;;  %v9656_v29 = vpop.f32.mrb[76].mxu1  ;;  %v9659_v50 = vmul.f32 %v8635_v47, %v1617_v4  ;;  %v1365_v24 = vmul.f32 0.01, %v727_v63 }
 0x18c   : > { %v9662_v51 = vmul.f32 %v8631_v44, %v1620_v35  ;;  %v1082_v27 = vadd.f32 %v9469_v3, %v8618_v37  ;;  %v9666_v55 = vpop.f32.mrb[77].mxu0  ;;  %v9668_v22 = vpop.f32.mrb[77].mxu1  ;;  %v9674_v18 = vmul.f32 0.01, %v9650_v58  ;;  %v1368_v2 = vmul.f32 0.01, %v729_v8 }
 0x18d   : > { %v9671_v32 = vmul.f32 %v8640_v53, %v1622_v1  ;;  %v2168_v28 = vadd.f32 %v2167_v33, %v1885_v61  ;;  %v9676_v41 = vpop.f32.mrb[78].mxu0  ;;  %v9678_v35 = vpop.f32.mrb[78].mxu1  ;;  %v1621_v13 = vmax.f32 %v727_v63, %v1365_v24  ;;  %v12361_v3 = vmax.f32 %v9528_v48, %v9548_v34 }
 0x18e   : > { %v1370_v6 = vmul.f32 0.01, %v1082_v27  ;;  %v2171_v1 = vadd.f32 %v9576_v42, %v9545_v23  ;;  %v9686_v4 = vpop.f32.mrb[79].mxu0  ;;  %v9688_v61 = vpop.f32.mrb[79].mxu1  ;;  %v1624_v57 = vmax.f32 %v729_v8, %v1368_v2  ;;  %v731_v63 = vadd.f32 %v9480_v45, %v8624_v39 }
 0x18f   : > { %v1889_v16 = vmul.f32 %v8643_v54, %v12361_v3  ;;  %2169 = vadd.xlane.f32.xlu0 %v2168_v28  ;;  %v9696_v48 = vadd.f32 %v9482_v60, %v8627_v40  ;;  %v1899_v34 = vmul.f32 %v8635_v47, %v1621_v13  ;;  %v735_v42 = vadd.f32 %v9517_v30, %v8615_v36 }
 0x190   : > { %v1626_v24 = vmax.f32 %v1082_v27, %v1370_v6  ;;  %v2172_v23 = vadd.f32 %v2171_v1, %v9557_v17  ;;  %v9703_v28 = vmul.f32 %v8631_v44, %v1624_v57  ;;  %v1369_v3 = vmul.f32 0.01, %v731_v63 }
 0x191   : > { %v9706_v8 = vmul.f32 0.01, %v9696_v48  ;;  %v1088_v45 = vadd.f32 %v9519_v59, %v8618_v37  ;;  %v1372_v27 = vmul.f32 0.01, %v735_v42  ;;  %v12362_v17 = vmax.f32 %v9571_v0, %v9585_v14 }
 0x192   : > { %v9711_v60 = vmul.f32 %v8640_v53, %v1626_v24  ;;  %v2173_v2 = vadd.f32 %v2172_v23, %v1889_v16  ;;  %v1625_v13 = vmax.f32 %v731_v63, %v1369_v3  ;;  %v2176_v1 = vadd.f32 %v9619_v56, %v9582_v25 }
 0x193   : > { %v1893_v30 = vmul.f32 %v8643_v54, %v12362_v17  ;;  %v1374_v6 = vmul.f32 0.01, %v1088_v45  ;;  %v9721_v33 = vpop.f32.mrb[80].mxu0  ;;  %v9723_v59 = vpop.f32.mrb[80].mxu1  ;;  %v1628_v16 = vmax.f32 %v735_v42, %v1372_v27  ;;  %v737_v24 = vadd.f32 %v9530_v62, %v8624_v39 }
 0x194   : > { %12363 = vst [vmem:[#allocation11_spill] sm:$0xff] %v9723_v59  ;;  %2174 = vadd.xlane.f32.xlu1 %v2173_v2  ;;  %v9729_v0 = vadd.f32 %v9532_v38, %v8627_v40  ;;  %v739_v14 = vadd.f32 %v9540_v26, %v8615_v36  ;;  %v9733_v63 = vpop.f32.mrb[81].mxu0  ;;  %v9736_v25 = vmul.f32 %v8635_v47, %v1625_v13  ;;  %v9743_v62 = vpop.f32.mrb[81].mxu1 }
 0x195   : > { %v1630_v56 = vmax.f32 %v1088_v45, %v1374_v6  ;;  %v2177_v23 = vadd.f32 %v2176_v1, %v9588_v20  ;;  %v1092_v42 = vadd.f32 %v9542_v52, %v8618_v37  ;;  %v9741_v3 = vpop.f32.mrb[82].mxu0  ;;  %12364 = vst [vmem:[#allocation12_spill] sm:$0xff] %v9743_v62  ;;  %v9746_v38 = vmul.f32 %v8631_v44, %v1628_v16  ;;  %v9760_v1 = vpop.f32.mrb[82].mxu1 }
 0x196   : > { %v1373_v2 = vmul.f32 0.01, %v737_v24  ;;  %v9749_v26 = vmul.f32 0.01, %v9729_v0  ;;  %v1376_v27 = vmul.f32 0.01, %v739_v14  ;;  %v12365_v52 = vmax.f32 %v9610_v9, %v9635_v11 }
 0x197   : > { %v9752_v17 = vmul.f32 %v8640_v53, %v1630_v56  ;;  %v2178_v45 = vadd.f32 %v2177_v23, %v1893_v30  ;;  %v1378_v20 = vmul.f32 0.01, %v1092_v42  ;;  %v9758_v6 = vpop.f32.mrb[83].mxu0  ;;  %v2181_v56 = vadd.f32 %v9659_v50, %v9622_v10  ;;  %v9766_v59 = vpop.f32.mrb[83].mxu1  ;;  %v12366_v11 = vld [vmem:[#allocation9_spill] sm:$0xff] }
 0x198   : > { %v1897_v13 = vmul.f32 %v8643_v54, %v12365_v52  ;;  %v1629_v16 = vmax.f32 %v737_v24, %v1373_v2  ;;  %v1632_v62 = vmax.f32 %v739_v14, %v1376_v27  ;;  %v741_v9 = vadd.f32 %v9552_v31, %v8624_v39 }
 0x199   : > { %2179 = vadd.xlane.f32.xlu0 %v2178_v45  ;;  %v1634_v30 = vmax.f32 %v1092_v42, %v1378_v20  ;;  %v9772_v23 = vadd.f32 %v12366_v11, %v8627_v40  ;;  %v745_v24 = vadd.f32 %v9594_v7, %v8615_v36  ;;  %v2182_v10 = vadd.f32 %v2181_v56, %v9632_v46 }
 0x19a   : > { %v9777_v2 = vmul.f32 %v8635_v47, %v1629_v16  ;;  %v9780_v14 = vmul.f32 %v8631_v44, %v1632_v62  ;;  %v1098_v50 = vadd.f32 %v9596_v19, %v8618_v37  ;;  %v1377_v42 = vmul.f32 0.01, %v741_v9 }
 0x19b   : > { %v9786_v31 = vmul.f32 %v8640_v53, %v1634_v30  ;;  %v9789_v27 = vmul.f32 0.01, %v9772_v23  ;;  %v1380_v45 = vmul.f32 0.01, %v745_v24  ;;  %v2183_v7 = vadd.f32 %v2182_v10, %v1897_v13  ;;  %v9796_v16 = vpop.f32.mrb[84].mxu0  ;;  %v9798_v19 = vpop.f32.mrb[84].mxu1 }
 0x19c   : > { %v1382_v20 = vmul.f32 0.01, %v1098_v50  ;;  %v12367_v52 = vmax.f32 %v9650_v58, %v9674_v18  ;;  %v2186_v46 = vadd.f32 %v1899_v34, %v9662_v51  ;;  %v1633_v56 = vmax.f32 %v741_v9, %v1377_v42  ;;  %v9804_v10 = vpop.f32.mrb[85].mxu0  ;;  %v9806_v57 = vpop.f32.mrb[85].mxu1 }
 0x19d   : > { %v1636_v11 = vmax.f32 %v745_v24, %v1380_v45  ;;  %v747_v13 = vadd.f32 %v9602_v43, %v8624_v39  ;;  %2184 = vadd.xlane.f32.xlu1 %v2183_v7  ;;  %v9811_v18 = vadd.f32 %v9604_v5, %v8627_v40  ;;  %v749_v34 = vadd.f32 %v9614_v49, %v8615_v36  ;;  %v9815_v9 = vpop.f32.mrb[86].mxu0  ;;  %v9827_v45 = vpop.f32.mrb[86].mxu1 }
 0x19e   : > { %v1901_v62 = vmul.f32 %v8643_v54, %v12367_v52  ;;  %v1638_v58 = vmax.f32 %v1098_v50, %v1382_v20  ;;  %v2187_v51 = vadd.f32 %v2186_v46, %v9671_v32  ;;  %v9818_v24 = vmul.f32 %v8635_v47, %v1633_v56  ;;  %v9825_v32 = vpop.f32.mrb[87].mxu0  ;;  %12369 = vst [vmem:[#allocation13_spill] sm:$0xff] %v9827_v45  ;;  %v9835_v52 = vpop.f32.mrb[87].mxu1 }
 0x19f   : > { %v9821_v43 = vmul.f32 %v8631_v44, %v1636_v11  ;;  %v1381_v42 = vmul.f32 0.01, %v747_v13  ;;  %v1102_v50 = vadd.f32 %v9616_v12, %v8618_v37  ;;  %12368 = vst [vmem:[#allocation9_spill] sm:$0xff] %v9825_v32  ;;  %v9833_v7 = vmul.f32 0.01, %v9811_v18  ;;  %12370 = vst [vmem:[#allocation14_spill] sm:$0xff] %v9835_v52 }
 0x1a0   : > { %v9830_v5 = vmul.f32 %v8640_v53, %v1638_v58  ;;  %v2188_v49 = vadd.f32 %v2187_v51, %v1901_v62  ;;  %v1384_v20 = vmul.f32 0.01, %v749_v34  ;;  %v12371_v11 = vmax.f32 %v9696_v48, %v9706_v8  ;;  %v12372_v52 = vld [vmem:[#allocation10_spill] sm:$0xff] }
 0x1a1   : > { %v1637_v46 = vmax.f32 %v747_v13, %v1381_v42  ;;  %v1386_v56 = vmul.f32 0.01, %v1102_v50  ;;  %v2191_v30 = vadd.f32 %v9736_v25, %v9703_v28  ;;  %v1639_v62 = vmax.f32 %v9811_v18, %v9833_v7 }
 0x1a2   : > { %v1905_v12 = vmul.f32 %v8643_v54, %v12371_v11  ;;  %2189 = vadd.xlane.f32.xlu0 %v2188_v49  ;;  %v1640_v58 = vmax.f32 %v749_v34, %v1384_v20  ;;  %v751_v51 = vadd.f32 %v9627_v21, %v8624_v39  ;;  %v9849_v13 = vadd.f32 %v12372_v52, %v8627_v40 }
 0x1a3   : > { %v1915_v42 = vmul.f32 %v8635_v47, %v1637_v46  ;;  %v1642_v48 = vmax.f32 %v1102_v50, %v1386_v56  ;;  %v2192_v8 = vadd.f32 %v2191_v30, %v9711_v60  ;;  %v755_v28 = vadd.f32 %v9654_v15, %v8615_v36  ;;  %v9855_v25 = vpop.f32.mrb[88].mxu0  ;;  %v9857_v49 = vpop.f32.mrb[88].mxu1 }
 0x1a4   : > { %v9860_v18 = vmul.f32 %v8631_v44, %v1640_v58  ;;  %v1385_v21 = vmul.f32 0.01, %v751_v51  ;;  %v1387_v34 = vmul.f32 0.01, %v9849_v13  ;;  %v1108_v7 = vadd.f32 %v9656_v29, %v8618_v37  ;;  %v9865_v20 = vpop.f32.mrb[89].mxu0  ;;  %v9867_v50 = vpop.f32.mrb[89].mxu1 }
 0x1a5   : > { %v9870_v60 = vmul.f32 %v8640_v53, %v1642_v48  ;;  %v2193_v15 = vadd.f32 %v2192_v8, %v1905_v12  ;;  %v1388_v30 = vmul.f32 0.01, %v755_v28  ;;  %v12373_v52 = vmax.f32 %v9729_v0, %v9749_v26  ;;  %v9876_v56 = vpop.f32.mrb[90].mxu0  ;;  %v9878_v11 = vpop.f32.mrb[90].mxu1 }
 0x1a6   : > { %12374 = vst [vmem:[#allocation10_spill] sm:$0xff] %v9876_v56  ;;  %12375 = vst [vmem:[#allocation15_spill] sm:$0xff] %v9878_v11  ;;  %v1641_v58 = vmax.f32 %v751_v51, %v1385_v21  ;;  %v1643_v29 = vmax.f32 %v9849_v13, %v1387_v34  ;;  %v1390_v45 = vmul.f32 0.01, %v1108_v7  ;;  %v2196_v32 = vadd.f32 %v9777_v2, %v9746_v38  ;;  %v9883_v48 = vpop.f32.mrb[91].mxu0  ;;  %v9885_v12 = vpop.f32.mrb[91].mxu1 }
 0x1a7   : > { %v1909_v46 = vmul.f32 %v8643_v54, %v12373_v52  ;;  %12376 = vst [vmem:[#allocation16_spill] sm:$0xff] %v9883_v48  ;;  %12377 = vst [vmem:[#allocation17_spill] sm:$0xff] %v9885_v12  ;;  %2194 = vadd.xlane.f32.xlu1 %v2193_v15  ;;  %v1644_v8 = vmax.f32 %v755_v28, %v1388_v30  ;;  %v757_v0 = vadd.f32 %v9666_v55, %v8624_v39 }
 0x1a8   : > { %v1110_v26 = vadd.f32 %v9668_v22, %v8627_v40  ;;  %v759_v51 = vadd.f32 %v9676_v41, %v8615_v36  ;;  %v1919_v13 = vmul.f32 %v8635_v47, %v1641_v58  ;;  %v1646_v21 = vmax.f32 %v1108_v7, %v1390_v45 }
 0x1a9   : > { %v2197_v38 = vadd.f32 %v2196_v32, %v9752_v17  ;;  %v1112_v2 = vadd.f32 %v9678_v35, %v8618_v37  ;;  %v1922_v34 = vmul.f32 %v8631_v44, %v1644_v8  ;;  %v1389_v28 = vmul.f32 0.01, %v757_v0  ;;  %v9903_v17 = vpop.xlane.xlu0 %2029 }
 0x1aa   : > { %v1391_v15 = vmul.f32 0.01, %v1110_v26  ;;  %v1392_v30 = vmul.f32 0.01, %v759_v51  ;;  %v1924_v55 = vmul.f32 %v8640_v53, %v1646_v21  ;;  %v12378_v41 = vmax.f32 %v9772_v23, %v9789_v27 }
 0x1ab   : > { %v2198_v22 = vadd.f32 %v2197_v38, %v1909_v46  ;;  %v1394_v52 = vmul.f32 0.01, %v1112_v2  ;;  %v1645_v32 = vmax.f32 %v757_v0, %v1389_v28  ;;  %v2201_v58 = vadd.f32 %v9818_v24, %v9780_v14  ;;  %v9907_v8 = vpop.f32.mrb[92].mxu0  ;;  %v9909_v21 = vpop.f32.mrb[92].mxu1  ;;  %v271_v0 = vld [vmem:[%s8438_s25 + $0x1a0] sm:$0xff] }
 0x1ac   : > { %v1913_v45 = vmul.f32 %v8643_v54, %v12378_v41  ;;  %v1647_v35 = vmax.f32 %v1110_v26, %v1391_v15  ;;  %v1648_v7 = vmax.f32 %v759_v51, %v1392_v30  ;;  %v761_v38 = vadd.f32 %v9686_v4, %v8624_v39  ;;  %v272_v26 = vld [vmem:[%s8438_s25 + $0x1a8] sm:$0xff]  ;;  %v9918_v51 = vpop.f32.mrb[93].mxu0  ;;  %v9920_v28 = vpop.f32.mrb[93].mxu1 }
 0x1ad   : > { %2199 = vadd.xlane.f32.xlu0 %v2198_v22  ;;  %v1650_v46 = vmax.f32 %v1112_v2, %v1394_v52  ;;  %v1114_v23 = vadd.f32 %v9688_v61, %v8627_v40  ;;  %v1917_v27 = vmul.f32 %v8643_v54, %v1639_v62  ;;  %v1923_v14 = vmul.f32 %v8635_v47, %v1645_v32  ;;  %v9926_v4 = vpop.f32.mrb[94].mxu0  ;;  %v9928_v30 = vpop.f32.mrb[94].mxu1 }
 0x1ae   : > { %v1926_v24 = vmul.f32 %v8631_v44, %v1648_v7  ;;  %v2202_v2 = vadd.f32 %v2201_v58, %v9786_v31  ;;  %v2206_v15 = vadd.f32 %v1915_v42, %v9821_v43  ;;  %12379 = vst [vmem:[#allocation18_spill] sm:$0xff] %v9926_v4  ;;  %12380 = vst [vmem:[#allocation19_spill] sm:$0xff] %v9928_v30  ;;  %v1393_v62 = vmul.f32 0.01, %v761_v38  ;;  %v9932_v41 = vpop.f32.mrb[95].mxu0  ;;  %v9934_v12 = vpop.f32.mrb[95].mxu1 }
 0x1af   : > { %v1928_v61 = vmul.f32 %v8640_v53, %v1650_v46  ;;  %v1395_v22 = vmul.f32 0.01, %v1114_v23  ;;  %v1921_v52 = vmul.f32 %v8643_v54, %v1643_v29  ;;  %12381 = vst [vmem:[#allocation20_spill] sm:$0xff] %v9932_v41  ;;  %12382 = vst [vmem:[#allocation21_spill] sm:$0xff] %v9934_v12  ;;  %v2211_v31 = vadd.f32 %v1919_v13, %v9860_v18  ;;  %v2035_v4 = vpop.xlane.xlu0 %2034  ;;  %v12383_v41 = vld [vmem:[#allocation2_spill] sm:$0xff] }
 0x1b0   : > { %v2203_v32 = vadd.f32 %v2202_v2, %v1913_v45  ;;  %v2207_v7 = vadd.f32 %v2206_v15, %v9830_v5  ;;  %v309_v43 = vpack.c.bf16 %v272_v26, %v271_v0  ;;  %v1649_v42 = vmax.f32 %v761_v38, %v1393_v62  ;;  %v12386_v0 = vld [vmem:[#allocation5_spill] sm:$0xff]  ;;  %v12388_v62 = vld [vmem:[#allocation4_spill] sm:$0xff] }
 0x1b1   : > { %v1651_v58 = vmax.f32 %v1114_v23, %v1395_v22  ;;  %v1925_v30 = vmul.f32 %v8643_v54, %v1647_v35  ;;  %v2216_v46 = vadd.f32 %v1923_v14, %v1922_v34  ;;  %v2212_v29 = vadd.f32 %v2211_v31, %v9870_v60  ;;  %v12385_v23 = vld [vmem:[#allocation3_spill] sm:$0xff] }
 0x1b2   : > { %2204 = vadd.xlane.f32.xlu1 %v2203_v32  ;;  %v2208_v11 = vadd.f32 %v2207_v7, %v1917_v27  ;;  %8267 = vmatmul.mubr.msk.bf16.gmra.mrb[104].mxu0 %vm433_vm0, %v309_v43  ;;  %v9942_v12 = vsub.s32 4, %v12383_v41  ;;  %v9945_v5 = vsub.s32 5, %v12383_v41  ;;  %v1927_v18 = vmul.f32 %v8635_v47, %v1649_v42  ;;  %v12389_v32 = vld [vmem:[#allocation6_spill] sm:$0xff] }
 0x1b3   : > { %8299 = vmatmul.mubr.msk.bf16.gmra.mrb[104].mxu1 %vm433_vm0, %v309_v43  ;;  %v2217_v13 = vadd.f32 %v2216_v46, %v1924_v55  ;;  %v1929_v45 = vmul.f32 %v8643_v54, %v1651_v58  ;;  %v9951_v34 = vsub.s32 6, %v12383_v41  ;;  %v12384_v35 = vmov 0   ;;  %v9960_v14 = vpop.f32.mrb[96].mxu0  ;;  %v9962_v55 = vpop.f32.mrb[96].mxu1 }
 0x1b4   : > { %832 = vmatprep.mubr.bf16.mxu0 %v12384_v35  ;;  %2209 = vadd.xlane.f32.xlu0 %v2208_v11  ;;  %v2213_v60 = vadd.f32 %v2212_v29, %v1921_v52  ;;  %v9955_v38 = vsub.s32 7, %v12383_v41  ;;  %v2445_v27 = vrot.slane %v2035_v4, %v12385_v23  ;;  %v2449_v26 = vrot.slane %v2035_v4, %v12386_v0  ;;  %v9966_v52 = vpop.f32.mrb[97].mxu0  ;;  %v9972_v58 = vpop.f32.mrb[97].mxu1 }
 0x1b5   : > { %1185 = vmatprep.mubr.bf16.mxu1 %v12384_v35  ;;  %12387 = vst [vmem:[#allocation3_spill] sm:$0xff] %v9962_v55  ;;  %v2218_v2 = vadd.f32 %v2217_v13, %v1925_v30  ;;  %v2221_v15 = vadd.f32 %v1927_v18, %v1926_v24  ;;  %v2453_v22 = vrot.slane %v2035_v4, %v12388_v62  ;;  %12390 = vst [vmem:[#allocation5_spill] sm:$0xff] %v9972_v58  ;;  %v8352_v29 = vmov 1966171168  }
 0x1b6   : > { %v2457_v11 = vrot.slane %v2035_v4, %v12389_v32  ;;  %2214 = vadd.xlane.f32.xlu1 %v2213_v60  ;;  %v2461_v7 = vrot.slane %v2035_v4, %v9942_v12  ;;  %v2465_v31 = vrot.slane %v2035_v4, %v9945_v5  ;;  %v2469_v43 = vrot.slane %v2035_v4, %v9951_v34 }
 0x1b7   : > { %v2473_v42 = vrot.slane %v2035_v4, %v9955_v38  ;;  %v2222_v46 = vadd.f32 %v2221_v15, %v1928_v61  ;;  %v4507_v30 = vcombine.low %v2445_v27, %v2449_v26  ;;  %v4463_v18 = vunpack.c.l.s4 %v8352_v29 }
 0x1b8   : > { %v4508_v24 = vcombine.low %v2453_v22, %v2457_v11  ;;  %2219 = vadd.xlane.f32.xlu0 %v2218_v2  ;;  %v4509_v13 = vcombine.low %v2461_v7, %v2465_v31  ;;  %v2413_v60 = vrot.slane %v9903_v17, %v12385_v23  ;;  %v2417_v55 = vrot.slane %v9903_v17, %v12386_v0 }
 0x1b9   : > { %v4510_v48 = vcombine.low %v2469_v43, %v2473_v42  ;;  %v2223_v56 = vadd.f32 %v2222_v46, %v1929_v45  ;;  %v2421_v4 = vrot.slane %v9903_v17, %v12388_v62  ;;  %v2425_v61 = vrot.slane %v9903_v17, %v12389_v32 }
 0x1ba   : > { %v4464_v27 = vunpack.c.0.s8 %v4463_v18  ;;  %v2429_v26 = vrot.slane %v9903_v17, %v9942_v12  ;;  %v2433_v2 = vrot.slane %v9903_v17, %v9945_v5  ;;  %v2437_v15 = vrot.slane %v9903_v17, %v9951_v34 }
 0x1bb   : > { %2224 = vadd.xlane.f32.xlu1 %v2223_v56  ;;  %v2441_v45 = vrot.slane %v9903_v17, %v9955_v38  ;;  %v4458_v11 = vcombine.low %v2413_v60, %v2417_v55  ;;  %v4459_v7 = vcombine.low %v2421_v4, %v2425_v61  ;;  %v765_v4 = vadd.f32 %v9721_v33, %v8615_v36  ;;  %v12391_v33 = vld [vmem:[#allocation11_spill] sm:$0xff] }
 0x1bc   : > { %v9991_v22 = vsub.s32 %v4464_v27, %v12383_v41  ;;  %v4460_v31 = vcombine.low %v2429_v26, %v2433_v2  ;;  %v771_v61 = vadd.f32 %v9758_v6, %v8624_v39  ;;  %v775_v6 = vadd.f32 %v9796_v16, %v8615_v36 }
 0x1bd   : > { %v4461_v43 = vcombine.low %v2437_v15, %v2441_v45  ;;  %v1396_v15 = vmul.f32 0.01, %v765_v4  ;;  %v10027_v16 = vadd.f32 %v9766_v59, %v8627_v40  ;;  %v10038_v59 = vadd.f32 %v9806_v57, %v8627_v40 }
 0x1be   : > { %v4517_v42 = vrot.slane %v4507_v30, %v9991_v22  ;;  %v4524_v46 = vrot.slane %v4508_v24, %v9991_v22  ;;  %v4531_v29 = vrot.slane %v4509_v13, %v9991_v22  ;;  %v4538_v18 = vrot.slane %v4510_v48, %v9991_v22 }
 0x1bf   : > { %v4468_v56 = vrot.slane %v4458_v11, %v9991_v22  ;;  %v4475_v58 = vrot.slane %v4459_v7, %v9991_v22  ;;  %v4482_v17 = vrot.slane %v4460_v31, %v9991_v22  ;;  %v4489_v27 = vrot.slane %v4461_v43, %v9991_v22 }
 0x1c0   : > { %v4539_v55 = vcombine.low %v4517_v42, %v4524_v46  ;;  %v4540_v60 = vcombine.low %v4531_v29, %v4538_v18  ;;  %v767_v30 = vadd.f32 %v9733_v63, %v8624_v39  ;;  %v769_v24 = vadd.f32 %v9741_v3, %v8615_v36 }
 0x1c1   : > { %v4490_v48 = vcombine.low %v4468_v56, %v4475_v58  ;;  %v4491_v13 = vcombine.low %v4482_v17, %v4489_v27  ;;  %v1118_v7 = vadd.f32 %v12391_v33, %v8618_v37  ;;  %v1401_v3 = vmul.f32 0.01, %v771_v61  ;;  %v12392_v27 = vld [vmem:[#allocation12_spill] sm:$0xff] }
 0x1c2   : > { %v4547_v26 = vrot.slane %v4539_v55, %v9991_v22  ;;  %v4554_v2 = vrot.slane %v4540_v60, %v9991_v22  ;;  %v1397_v45 = vmul.f32 0.01, %v767_v30  ;;  %v1400_v11 = vmul.f32 0.01, %v769_v24 }
 0x1c3   : > { %v4498_v63 = vrot.slane %v4490_v48, %v9991_v22  ;;  %v4505_v31 = vrot.slane %v4491_v13, %v9991_v22  ;;  %v1122_v58 = vadd.f32 %v9760_v1, %v8618_v37  ;;  %v777_v43 = vadd.f32 %v9804_v10, %v8624_v39 }
 0x1c4   : > { %v4555_v42 = vcombine.low %v4547_v26, %v4554_v2  ;;  %v1652_v46 = vmax.f32 %v765_v4, %v1396_v15  ;;  %v785_v29 = vadd.f32 %v9855_v25, %v8615_v36  ;;  %v1653_v18 = vmax.f32 %v767_v30, %v1397_v45 }
 0x1c5   : > { %v1656_v56 = vmax.f32 %v769_v24, %v1400_v11  ;;  %v1398_v17 = vmul.f32 0.01, %v1118_v7  ;;  %v1120_v55 = vadd.f32 %v12392_v27, %v8627_v40  ;;  %v4506_v60 = vcombine.low %v4498_v63, %v4505_v31  ;;  %v10043_v11 = vpop.f32.mrb[98].mxu0 }
 0x1c6   : > { %v1657_v1 = vmax.f32 %v771_v61, %v1401_v3  ;;  %v1402_v48 = vmul.f32 0.01, %v1122_v58  ;;  %v1404_v10 = vmul.f32 0.01, %v775_v6  ;;  %v1405_v13 = vmul.f32 0.01, %v777_v43 }
 0x1c7   : > { %v10031_v4 = vadd.f32 %v9798_v19, %v8618_v37  ;;  %v787_v25 = vadd.f32 %v9865_v20, %v8624_v39  ;;  %v1930_v30 = vmul.f32 %v8631_v44, %v1652_v46  ;;  %v1412_v24 = vmul.f32 0.01, %v785_v29  ;;  %v273_v46 = vld [vmem:[%s8438_s25 + $0x1b0] sm:$0xff] }
 0x1c8   : > { %v1654_v26 = vmax.f32 %v1118_v7, %v1398_v17  ;;  %v1399_v61 = vmul.f32 0.01, %v1120_v55  ;;  %v1931_v15 = vmul.f32 %v8635_v47, %v1653_v18  ;;  %v1934_v19 = vmul.f32 %v8631_v44, %v1656_v56  ;;  %v274_v18 = vld [vmem:[%s8438_s25 + $0x1b8] sm:$0xff]  ;;  %v10055_v56 = vpop.f32.mrb[99].mxu0  ;;  %v10057_v17 = vpop.f32.mrb[98].mxu1 }
 0x1c9   : > { %v1413_v2 = vmul.f32 0.01, %v787_v25  ;;  %v1658_v45 = vmax.f32 %v1122_v58, %v1402_v48  ;;  %v1403_v20 = vmul.f32 0.01, %v10027_v16  ;;  %v1935_v33 = vmul.f32 %v8635_v47, %v1657_v1 }
 0x1ca   : > { %v1660_v7 = vmax.f32 %v775_v6, %v1404_v10  ;;  %v1661_v63 = vmax.f32 %v777_v43, %v1405_v13  ;;  %v1406_v31 = vmul.f32 0.01, %v10031_v4  ;;  %v1668_v3 = vmax.f32 %v785_v29, %v1412_v24 }
 0x1cb   : > { %v1138_v57 = vadd.f32 %v9857_v49, %v8618_v37  ;;  %v1140_v58 = vadd.f32 %v9867_v50, %v8627_v40  ;;  %v1932_v6 = vmul.f32 %v8640_v53, %v1654_v26  ;;  %v1655_v43 = vmax.f32 %v1120_v55, %v1399_v61 }
 0x1cc   : > { %7598 = vperm.xlu1 %8318, %v4555_v42   ;;  %v795_v42 = vadd.f32 %v9907_v8, %v8615_v36  ;;  %v1407_v29 = vmul.f32 0.01, %v10038_v59  ;;  %v1669_v27 = vmax.f32 %v787_v25, %v1413_v2  ;;  %v1936_v49 = vmul.f32 %v8640_v53, %v1658_v45 }
 0x1cd   : > { %v1659_v8 = vmax.f32 %v10027_v16, %v1403_v20  ;;  %v1414_v1 = vmul.f32 0.01, %v1138_v57  ;;  %v1938_v48 = vmul.f32 %v8631_v44, %v1660_v7  ;;  %v1415_v10 = vmul.f32 0.01, %v1140_v58 }
 0x1ce   : > { %7595 = vperm.xlu0 %8317, %v4506_v60   ;;  %v10061_v60 = vpop.f32.mrb[99].mxu1  ;;  %v1420_v50 = vmul.f32 0.01, %v795_v42  ;;  %v797_v13 = vadd.f32 %v9918_v51, %v8624_v39  ;;  %v310_v24 = vpack.c.bf16 %v274_v18, %v273_v46  ;;  %v1939_v55 = vmul.f32 %v8635_v47, %v1661_v63 }
 0x1cf   : > { %v1662_v26 = vmax.f32 %v10031_v4, %v1406_v31  ;;  %v1946_v25 = vmul.f32 %v8631_v44, %v1668_v3  ;;  %v1663_v2 = vmax.f32 %v10038_v59, %v1407_v29  ;;  %v1947_v16 = vmul.f32 %v8635_v47, %v1669_v27 }
 0x1d0   : > { %v1676_v61 = vmax.f32 %v795_v42, %v1420_v50  ;;  %v1421_v45 = vmul.f32 0.01, %v797_v13  ;;  %8268 = vmatmul.mubr.msk.bf16.gmra.mrb[108].mxu0 %vm433_vm0, %v310_v24  ;;  %v1148_v20 = vadd.f32 %v9909_v21, %v8618_v37  ;;  %8300 = vmatmul.mubr.msk.bf16.gmra.mrb[108].mxu1 %vm433_vm0, %v310_v24  ;;  %v1670_v51 = vmax.f32 %v1138_v57, %v1414_v1 }
 0x1d1   : > { %v1933_v7 = vmul.f32 %v8643_v54, %v1655_v43  ;;  %v2226_v63 = vadd.f32 %v1931_v15, %v1930_v30  ;;  %842 = vmatprep.mubr.bf16.mxu0 %v12384_v35  ;;  %1195 = vmatprep.mubr.bf16.mxu1 %v12384_v35  ;;  %v1671_v4 = vmax.f32 %v1140_v58, %v1415_v10 }
 0x1d2   : > { %v1677_v59 = vmax.f32 %v797_v13, %v1421_v45  ;;  %v1422_v31 = vmul.f32 0.01, %v1148_v20  ;;  %v1150_v3 = vadd.f32 %v9920_v28, %v8627_v40  ;;  %v1954_v42 = vmul.f32 %v8631_v44, %v1676_v61 }
 0x1d3   : > { %v2227_v46 = vadd.f32 %v2226_v63, %v1932_v6  ;;  %v1937_v21 = vmul.f32 %v8643_v54, %v1659_v8  ;;  %v2231_v18 = vadd.f32 %v1935_v33, %v1934_v19  ;;  %v1940_v57 = vmul.f32 %v8640_v53, %v1662_v26  ;;  %v2040_v6 = vpop.xlane.xlu1 %2039 }
 0x1d4   : > { %v1955_v30 = vmul.f32 %v8635_v47, %v1677_v59  ;;  %v1678_v15 = vmax.f32 %v1148_v20, %v1422_v31  ;;  %v1423_v43 = vmul.f32 0.01, %v1150_v3  ;;  %v1948_v29 = vmul.f32 %v8640_v53, %v1670_v51 }
 0x1d5   : > { %v2228_v58 = vadd.f32 %v2227_v46, %v1933_v7  ;;  %v2232_v27 = vadd.f32 %v2231_v18, %v1936_v49  ;;  %v1941_v28 = vmul.f32 %v8643_v54, %v1663_v2  ;;  %v2236_v10 = vadd.f32 %v1939_v55, %v1938_v48  ;;  %v12393_v55 = vld [vmem:[#allocation9_spill] sm:$0xff] }
 0x1d6   : > { %v1956_v1 = vmul.f32 %v8640_v53, %v1678_v15  ;;  %v1679_v50 = vmax.f32 %v1150_v3, %v1423_v43  ;;  %v1949_v19 = vmul.f32 %v8643_v54, %v1671_v4  ;;  %v2246_v33 = vadd.f32 %v1947_v16, %v1946_v25  ;;  %v12394_v25 = vld [vmem:[#allocation13_spill] sm:$0xff] }
 0x1d7   : > { %v2233_v13 = vadd.f32 %v2232_v27, %v1937_v21  ;;  %v2256_v8 = vadd.f32 %v1955_v30, %v1954_v42  ;;  %v2237_v24 = vadd.f32 %v2236_v10, %v1940_v57  ;;  %v779_v49 = vadd.f32 %v9815_v9, %v8615_v36  ;;  %v2045_v48 = vpop.xlane.xlu1 %2044  ;;  %v12395_v30 = vld [vmem:[#allocation14_spill] sm:$0xff] }
 0x1d8   : > { %v1957_v26 = vmul.f32 %v8643_v54, %v1679_v50  ;;  %v2247_v61 = vadd.f32 %v2246_v33, %v1948_v29  ;;  %v781_v2 = vadd.f32 %v12393_v55, %v8624_v39  ;;  %v1132_v16 = vadd.f32 %v12394_v25, %v8618_v37  ;;  %v276_v55 = vld [vmem:[%s8438_s25 + $0x1c8] sm:$0xff] }
 0x1d9   : > { %v2257_v45 = vadd.f32 %v2256_v8, %v1956_v1  ;;  %v2238_v20 = vadd.f32 %v2237_v24, %v1941_v28  ;;  %v1408_v63 = vmul.f32 0.01, %v779_v49  ;;  %v2477_v4 = vrot.slane %v2040_v6, %v12385_v23 }
 0x1da   : > { %v10093_v51 = vadd.f32 %v2247_v61, %v1949_v19  ;;  %v2481_v59 = vrot.slane %v2040_v6, %v12386_v0  ;;  %v2485_v31 = vrot.slane %v2040_v6, %v12388_v62  ;;  %v2489_v9 = vrot.slane %v2040_v6, %v12389_v32 }
 0x1db   : > { %v10095_v7 = vadd.f32 %v2257_v45, %v1957_v26  ;;  %v2493_v3 = vrot.slane %v2040_v6, %v9942_v12  ;;  %v2497_v42 = vrot.slane %v2040_v6, %v9945_v5  ;;  %v2501_v46 = vrot.slane %v2040_v6, %v9951_v34  ;;  %v10109_v18 = vpop.xlane.xlu1 %2054 }
 0x1dc   : > { %v2505_v21 = vrot.slane %v2040_v6, %v9955_v38  ;;  %v1409_v57 = vmul.f32 0.01, %v781_v2  ;;  %v10113_v15 = vadd.f32 %v12395_v30, %v8627_v40  ;;  %v1410_v43 = vmul.f32 0.01, %v1132_v16 }
 0x1dd   : > { %v4556_v29 = vcombine.low %v2477_v4, %v2481_v59  ;;  %v1664_v27 = vmax.f32 %v779_v49, %v1408_v63  ;;  %v4557_v1 = vcombine.low %v2485_v31, %v2489_v9  ;;  %v4558_v50 = vcombine.low %v2493_v3, %v2497_v42  ;;  %v275_v49 = vld [vmem:[%s8438_s25 + $0x1c0] sm:$0xff] }
 0x1de   : > { %v4559_v28 = vcombine.low %v2501_v46, %v2505_v21  ;;  %v1665_v19 = vmax.f32 %v781_v2, %v1409_v57  ;;  %v1411_v6 = vmul.f32 0.01, %v10113_v15  ;;  %v2509_v33 = vrot.slane %v2045_v48, %v12385_v23 }
 0x1df   : > { %v10115_v10 = vpop.xlane.xlu1 %2064  ;;  %v2513_v8 = vrot.slane %v2045_v48, %v12386_v0  ;;  %v2517_v24 = vrot.slane %v2045_v48, %v12388_v62  ;;  %v2521_v26 = vrot.slane %v2045_v48, %v12389_v32  ;;  %v2525_v61 = vrot.slane %v2045_v48, %v9942_v12 }
 0x1e0   : > { %v2529_v45 = vrot.slane %v2045_v48, %v9945_v5  ;;  %v1666_v63 = vmax.f32 %v1132_v16, %v1410_v43  ;;  %v4566_v2 = vrot.slane %v4556_v29, %v9991_v22  ;;  %v2533_v25 = vrot.slane %v2045_v48, %v9951_v34 }
 0x1e1   : > { %v2537_v4 = vrot.slane %v2045_v48, %v9955_v38  ;;  %v4573_v59 = vrot.slane %v4557_v1, %v9991_v22  ;;  %v4587_v31 = vrot.slane %v4559_v28, %v9991_v22  ;;  %v805_v9 = vadd.f32 %v9960_v14, %v8615_v36 }
 0x1e2   : > { %v1942_v42 = vmul.f32 %v8631_v44, %v1664_v27  ;;  %v4605_v16 = vcombine.low %v2509_v33, %v2513_v8  ;;  %v807_v46 = vadd.f32 %v9966_v52, %v8624_v39  ;;  %v311_v21 = vpack.c.bf16 %v276_v55, %v275_v49 }
 0x1e3   : > { %v10134_v3 = vpop.xlane.xlu1 %2074  ;;  %v1943_v48 = vmul.f32 %v8635_v47, %v1665_v19  ;;  %v4606_v57 = vcombine.low %v2517_v24, %v2521_v26  ;;  %v4607_v30 = vcombine.low %v2525_v61, %v2529_v45  ;;  %v1428_v43 = vmul.f32 0.01, %v805_v9  ;;  %v12397_v61 = vld [vmem:[#allocation5_spill] sm:$0xff] }
 0x1e4   : > { %v1944_v29 = vmul.f32 %v8640_v53, %v1666_v63  ;;  %v1667_v14 = vmax.f32 %v10113_v15, %v1411_v6  ;;  %v4608_v1 = vcombine.low %v2533_v25, %v2537_v4  ;;  %8269 = vmatmul.mubr.msk.bf16.gmra.mrb[112].mxu0 %vm433_vm0, %v311_v21  ;;  %8301 = vmatmul.mubr.msk.bf16.gmra.mrb[112].mxu1 %vm433_vm0, %v311_v21  ;;  %v12396_v6 = vld [vmem:[#allocation3_spill] sm:$0xff] }
 0x1e5   : > { %v2701_v52 = vrot.slane %v10134_v3, %v12385_v23  ;;  %v1684_v28 = vmax.f32 %v805_v9, %v1428_v43  ;;  %852 = vmatprep.mubr.bf16.mxu0 %v12384_v35  ;;  %v2705_v19 = vrot.slane %v10134_v3, %v12386_v0  ;;  %v1158_v33 = vadd.f32 %v12396_v6, %v8618_v37  ;;  %v12399_v6 = vld [vmem:[#allocation16_spill] sm:$0xff] }
 0x1e6   : > { %1205 = vmatprep.mubr.bf16.mxu1 %v12384_v35  ;;  %v4622_v8 = vrot.slane %v4606_v57, %v9991_v22  ;;  %v4629_v24 = vrot.slane %v4607_v30, %v9991_v22  ;;  %v1160_v45 = vadd.f32 %v12397_v61, %v8627_v40  ;;  %v4636_v49 = vrot.slane %v4608_v1, %v9991_v22 }
 0x1e7   : > { %v1962_v26 = vmul.f32 %v8631_v44, %v1684_v28  ;;  %v2709_v55 = vrot.slane %v10134_v3, %v12388_v62  ;;  %v1945_v4 = vmul.f32 %v8643_v54, %v1667_v14  ;;  %v2729_v21 = vrot.slane %v10134_v3, %v9955_v38  ;;  %v12398_v28 = vld [vmem:[#allocation10_spill] sm:$0xff] }
 0x1e8   : > { %v1431_v25 = vmul.f32 0.01, %v1160_v45  ;;  %v4638_v1 = vcombine.low %v4629_v24, %v4636_v49 }
 0x1ea   : > { %v1687_v57 = vmax.f32 %v1160_v45, %v1431_v25  ;;  %v4652_v49 = vrot.slane %v4638_v1, %v9991_v22  ;;  %v12401_v25 = vld [vmem:[#allocation17_spill] sm:$0xff] }
 0x1ed   : > { %2229 = vadd.xlane.f32.xlu0 %v2228_v58  ;;  %v4580_v58 = vrot.slane %v4558_v50, %v9991_v22  ;;  %v1429_v50 = vmul.f32 0.01, %v807_v46 }
 0x1ef   : > { %v4589_v27 = vcombine.low %v4580_v58, %v4587_v31  ;;  %v1685_v15 = vmax.f32 %v807_v46, %v1429_v50  ;;  %v2717_v58 = vrot.slane %v10134_v3, %v9942_v12  ;;  %v2721_v31 = vrot.slane %v10134_v3, %v9945_v5 }
 0x1f0   : > { %2234 = vadd.xlane.f32.xlu1 %v2233_v13  ;;  %v4588_v13 = vcombine.low %v4566_v2, %v4573_v59  ;;  %v1430_v2 = vmul.f32 0.01, %v1158_v33  ;;  %v2241_v59 = vadd.f32 %v1943_v48, %v1942_v42  ;;  %v2725_v46 = vrot.slane %v10134_v3, %v9951_v34 }
 0x1f1   : > { %2239 = vadd.xlane.f32.xlu0 %v2238_v20  ;;  %v4615_v20 = vrot.slane %v4605_v16, %v9991_v22  ;;  %v1963_v63 = vmul.f32 %v8635_v47, %v1685_v15  ;;  %v4603_v48 = vrot.slane %v4589_v27, %v9991_v22  ;;  %v789_v15 = vadd.f32 %v12398_v28, %v8615_v36  ;;  %v12400_v27 = vld [vmem:[#allocation15_spill] sm:$0xff] }
 0x1f2   : > { %v1686_v9 = vmax.f32 %v1158_v33, %v1430_v2  ;;  %v2242_v30 = vadd.f32 %v2241_v59, %v1944_v29  ;;  %v4596_v42 = vrot.slane %v4588_v13, %v9991_v22  ;;  %v4899_v29 = vcombine.low %v2701_v52, %v2705_v19 }
 0x1f3   : > { %v2266_v16 = vadd.f32 %v1963_v63, %v1962_v26  ;;  %v4637_v14 = vcombine.low %v4615_v20, %v4622_v8  ;;  %v4901_v13 = vcombine.low %v2717_v58, %v2721_v31  ;;  %v4902_v61 = vcombine.low %v2725_v46, %v2729_v21  ;;  %v10197_v46 = vpop.xlane.xlu0 %2049 }
 0x1f4   : > { %v1964_v43 = vmul.f32 %v8640_v53, %v1686_v9  ;;  %v10178_v50 = vadd.f32 %v2242_v30, %v1945_v4  ;;  %v1142_v45 = vadd.f32 %v12400_v27, %v8618_v37  ;;  %v4604_v8 = vcombine.low %v4596_v42, %v4603_v48  ;;  %v277_v42 = vld [vmem:[%s8438_s25 + $0x1d0] sm:$0xff]  ;;  %v278_v48 = vld [vmem:[%s8438_s25 + $0x1d8] sm:$0xff]  ;;  %v10215_v27 = vpop.xlane.xlu1 %2084 }
 0x1f5   : > { %2249 = vadd.xlane.f32.xlu0 %v10093_v51  ;;  %v2713_v51 = vrot.slane %v10134_v3, %v12389_v32  ;;  %v791_v3 = vadd.f32 %v12399_v6, %v8624_v39  ;;  %v4645_v24 = vrot.slane %v4637_v14, %v9991_v22  ;;  %v1416_v63 = vmul.f32 0.01, %v789_v15 }
 0x1f6   : > { %v2267_v33 = vadd.f32 %v2266_v16, %v1964_v43  ;;  %v1144_v4 = vadd.f32 %v12401_v25, %v8627_v40  ;;  %v4909_v52 = vrot.slane %v4899_v29, %v9991_v22  ;;  %v1418_v59 = vmul.f32 0.01, %v1142_v45  ;;  %v12404_v25 = vld [vmem:[#allocation19_spill] sm:$0xff] }
 0x1f7   : > { %v4900_v26 = vcombine.low %v2709_v55, %v2713_v51  ;;  %v1417_v2 = vmul.f32 0.01, %v791_v3  ;;  %v4923_v55 = vrot.slane %v4901_v13, %v9991_v22  ;;  %v4930_v51 = vrot.slane %v4902_v61, %v9991_v22 }
 0x1f8   : > { %v4653_v58 = vcombine.low %v4645_v24, %v4652_v49  ;;  %v1672_v31 = vmax.f32 %v789_v15, %v1416_v63  ;;  %v1419_v16 = vmul.f32 0.01, %v1144_v4  ;;  %v1674_v30 = vmax.f32 %v1142_v45, %v1418_v59  ;;  %v12402_v24 = vld [vmem:[#allocation18_spill] sm:$0xff]  ;;  %v12403_v63 = vld [vmem:[#allocation20_spill] sm:$0xff]  ;;  %v12406_v59 = vld [vmem:[#allocation21_spill] sm:$0xff] }
 0x1f9   : > { %2259 = vadd.xlane.f32.xlu0 %v10095_v7  ;;  %v1965_v7 = vmul.f32 %v8643_v54, %v1687_v57  ;;  %v4916_v19 = vrot.slane %v4900_v26, %v9991_v22  ;;  %v1673_v9 = vmax.f32 %v791_v3, %v1417_v2  ;;  %v4932_v57 = vcombine.low %v4923_v55, %v4930_v51 }
 0x1fa   : > { %v1950_v43 = vmul.f32 %v8631_v44, %v1672_v31  ;;  %v1675_v1 = vmax.f32 %v1144_v4, %v1419_v16  ;;  %v1952_v6 = vmul.f32 %v8640_v53, %v1674_v30  ;;  %v312_v3 = vpack.c.bf16 %v278_v48, %v277_v42 }
 0x1fb   : > { %v10187_v20 = vadd.f32 %v2267_v33, %v1965_v7  ;;  %v4931_v21 = vcombine.low %v4909_v52, %v4916_v19  ;;  %v1951_v14 = vmul.f32 %v8635_v47, %v1673_v9  ;;  %v10203_v7 = vpop.xlane.xlu0 %2059  ;;  %v4946_v15 = vrot.slane %v4932_v57, %v9991_v22  ;;  %v10227_v52 = vpop.xlane.xlu1 %2094 }
 0x1fc   : > { %8270 = vmatmul.mubr.msk.bf16.gmra.mrb[116].mxu0 %vm433_vm0, %v312_v3  ;;  %8302 = vmatmul.mubr.msk.bf16.gmra.mrb[116].mxu1 %vm433_vm0, %v312_v3  ;;  %v1953_v33 = vmul.f32 %v8643_v54, %v1675_v1  ;;  %v799_v49 = vadd.f32 %v12402_v24, %v8615_v36  ;;  %v801_v2 = vadd.f32 %v12403_v63, %v8624_v39 }
 0x1fd   : > { %v4939_v28 = vrot.slane %v4931_v21, %v9991_v22  ;;  %v2251_v29 = vadd.f32 %v1951_v14, %v1950_v43  ;;  %862 = vmatprep.mubr.bf16.mxu0 %v12384_v35  ;;  %1215 = vmatprep.mubr.bf16.mxu1 %v12384_v35  ;;  %v1152_v4 = vadd.f32 %v12404_v25, %v8618_v37  ;;  %v279_v43 = vld [vmem:[%s8438_s25 + $0x1e0] sm:$0xff]  ;;  %v280_v14 = vld [vmem:[%s8438_s25 + $0x1e8] sm:$0xff] }
 0x1fe   : > { %v1424_v55 = vmul.f32 0.01, %v799_v49  ;;  %v1425_v51 = vmul.f32 0.01, %v801_v2  ;;  %v2549_v24 = vrot.slane %v10197_v46, %v12388_v62  ;;  %v2553_v63 = vrot.slane %v10197_v46, %v12389_v32 }
 0x1ff   : > { %v10211_v26 = vpop.xlane.xlu0 %2069  ;;  %v4947_v13 = vcombine.low %v4939_v28, %v4946_v15  ;;  %v2252_v61 = vadd.f32 %v2251_v29, %v1952_v6  ;;  %v1426_v31 = vmul.f32 0.01, %v1152_v4  ;;  %v10233_v9 = vpop.xlane.xlu1 %2104 }
 0x200   : > { %v1680_v21 = vmax.f32 %v799_v49, %v1424_v55  ;;  %v1681_v57 = vmax.f32 %v801_v2, %v1425_v51  ;;  %v2561_v55 = vrot.slane %v10197_v46, %v9945_v5  ;;  %v2565_v51 = vrot.slane %v10197_v46, %v9951_v34 }
 0x201   : > { %7601 = vperm.xlu1 %8318, %v4604_v8   ;;  %v10217_v45 = vadd.f32 %v2252_v61, %v1953_v33  ;;  %v1682_v42 = vmax.f32 %v1152_v4, %v1426_v31  ;;  %v313_v33 = vpack.c.bf16 %v280_v14, %v279_v43  ;;  %v2545_v61 = vrot.slane %v10197_v46, %v12386_v0 }
 0x202   : > { %v1958_v28 = vmul.f32 %v8631_v44, %v1680_v21  ;;  %v1959_v15 = vmul.f32 %v8635_v47, %v1681_v57  ;;  %v2557_v4 = vrot.slane %v10197_v46, %v9942_v12 }
 0x203   : > { %v10219_v8 = vpop.xlane.xlu0 %2079  ;;  %v10237_v48 = vpop.xlane.xlu1 %2114  ;;  %v1960_v3 = vmul.f32 %v8640_v53, %v1682_v42  ;;  %v4655_v42 = vcombine.low %v2549_v24, %v2553_v63 }
 0x204   : > { %8271 = vmatmul.mubr.msk.bf16.gmra.mrb[120].mxu0 %vm433_vm0, %v313_v33  ;;  %8303 = vmatmul.mubr.msk.bf16.gmra.mrb[120].mxu1 %vm433_vm0, %v313_v33  ;;  %v2261_v25 = vadd.f32 %v1959_v15, %v1958_v28  ;;  %v4656_v43 = vcombine.low %v2557_v4, %v2561_v55  ;;  %v2573_v28 = vrot.slane %v10109_v18, %v12385_v23 }
 0x205   : > { %7604 = vperm.xlu1 %8318, %v4653_v58   ;;  %v1154_v58 = vadd.f32 %v12406_v59, %v8627_v40  ;;  %v2569_v59 = vrot.slane %v10197_v46, %v9955_v38  ;;  %872 = vmatprep.mubr.bf16.mxu0 %v12384_v35  ;;  %v2581_v15 = vrot.slane %v10109_v18, %v12388_v62 }
 0x206   : > { %1225 = vmatprep.mubr.bf16.mxu1 %v12384_v35  ;;  %v2585_v35 = vrot.slane %v10109_v18, %v12389_v32  ;;  %v2593_v33 = vrot.slane %v10109_v18, %v9945_v5 }
 0x207   : > { %v10229_v19 = vpop.xlane.xlu0 %2089  ;;  %v1427_v30 = vmul.f32 0.01, %v1154_v58  ;;  %v10246_v29 = vpop.xlane.xlu1 %2124  ;;  %v4657_v14 = vcombine.low %v2565_v51, %v2569_v59 }
 0x208   : > { %12405 = vst [vmem:[#allocation4_spill] sm:$0xff] %v10229_v19  ;;  %12409 = vst [vmem:[#allocation12_spill] sm:$0xff] %v10246_v29  ;;  %v4704_v59 = vcombine.low %v2581_v15, %v2585_v35 }
 0x209   : > { %v1683_v6 = vmax.f32 %v1154_v58, %v1427_v30  ;;  %v2262_v58 = vadd.f32 %v2261_v25, %v1960_v3  ;;  %v2589_v3 = vrot.slane %v10109_v18, %v9942_v12  ;;  %v4678_v25 = vrot.slane %v4656_v43, %v9991_v22 }
 0x20a   : > { %v4685_v4 = vrot.slane %v4657_v14, %v9991_v22  ;;  %v2781_v43 = vrot.slane %v10215_v27, %v9942_v12  ;;  %v2785_v14 = vrot.slane %v10215_v27, %v9945_v5 }
 0x20b   : > { %v10235_v16 = vpop.xlane.xlu0 %2099  ;;  %v1961_v2 = vmul.f32 %v8643_v54, %v1683_v6  ;;  %v10271_v31 = vpop.xlane.xlu1 %2134 }
 0x20c   : > { %12407 = vst [vmem:[#allocation6_spill] sm:$0xff] %v10235_v16  ;;  %12411 = vst [vmem:[#allocation13_spill] sm:$0xff] %v10271_v31  ;;  %v4687_v35 = vcombine.low %v4678_v25, %v4685_v4 }
 0x20d   : > { %v10275_v57 = vadd.f32 %v2262_v58, %v1961_v2  ;;  %v4671_v2 = vrot.slane %v4655_v42, %v9991_v22  ;;  %v4705_v58 = vcombine.low %v2589_v3, %v2593_v33  ;;  %v2777_v42 = vrot.slane %v10215_v27, %v12389_v32 }
 0x20f   : > { %7622 = vperm.xlu0 %8317, %v4947_v13   ;;  %v10241_v1 = vpop.xlane.xlu0 %2109  ;;  %v2541_v13 = vrot.slane %v10197_v46, %v12385_v23  ;;  %v2577_v46 = vrot.slane %v10109_v18, %v12386_v0  ;;  %v10285_v6 = vpop.xlane.xlu1 %2144 }
 0x210   : > { %12408 = vst [vmem:[#allocation11_spill] sm:$0xff] %v10241_v1  ;;  %12413 = vst [vmem:[#allocation3_spill] sm:$0xff] %v10285_v6  ;;  %v4999_v6 = vcombine.low %v2781_v43, %v2785_v14 }
 0x211   : > { %v4654_v30 = vcombine.low %v2541_v13, %v2545_v61  ;;  %v2597_v13 = vrot.slane %v10109_v18, %v9951_v34  ;;  %v2601_v61 = vrot.slane %v10109_v18, %v9955_v38  ;;  %v4703_v51 = vcombine.low %v2573_v28, %v2577_v46 }
 0x212   : > { %v2765_v18 = vrot.slane %v10215_v27, %v12385_v23  ;;  %v2789_v28 = vrot.slane %v10215_v27, %v9951_v34  ;;  %v2793_v46 = vrot.slane %v10215_v27, %v9955_v38 }
 0x213   : > { %v10254_v49 = vpop.xlane.xlu0 %2119  ;;  %v4664_v63 = vrot.slane %v4654_v30, %v9991_v22  ;;  %v10302_v55 = vpop.xlane.xlu1 %2154  ;;  %v2773_v30 = vrot.slane %v10215_v27, %v12388_v62  ;;  %v4713_v33 = vrot.slane %v4703_v51, %v9991_v22 }
 0x214   : > { %12410 = vst [vmem:[#allocation9_spill] sm:$0xff] %v10254_v49  ;;  %12415 = vst [vmem:[#allocation10_spill] sm:$0xff] %v10302_v55  ;;  %v5000_v1 = vcombine.low %v2789_v28, %v2793_v46 }
 0x215   : > { %v4686_v15 = vcombine.low %v4664_v63, %v4671_v2  ;;  %v4998_v55 = vcombine.low %v2773_v30, %v2777_v42  ;;  %v4701_v63 = vrot.slane %v4687_v35, %v9991_v22  ;;  %v811_v35 = vadd.f32 %v10055_v56, %v8624_v39 }
 0x217   : > { %v10273_v21 = vpop.xlane.xlu0 %2129  ;;  %v10323_v3 = vpop.xlane.xlu1 %2164 }
 0x218   : > { %12412 = vst [vmem:[#allocation14_spill] sm:$0xff] %v10273_v21  ;;  %v4706_v21 = vcombine.low %v2597_v13, %v2601_v61  ;;  %12417 = vst [vmem:[#allocation15_spill] sm:$0xff] %v10323_v3  ;;  %v4727_v13 = vrot.slane %v4705_v58, %v9991_v22  ;;  %v5028_v58 = vrot.slane %v5000_v1, %v9991_v22 }
 0x21a   : > { %v4734_v61 = vrot.slane %v4706_v21, %v9991_v22  ;;  %v5014_v21 = vrot.slane %v4998_v55, %v9991_v22 }
 0x21b   : > { %v10295_v24 = vpop.xlane.xlu0 %2139 }
 0x21c   : > { %12414 = vst [vmem:[#allocation5_spill] sm:$0xff] %v10295_v24  ;;  %v4736_v25 = vcombine.low %v4727_v13, %v4734_v61  ;;  %v12427_v13 = vlaneseq }
 0x21e   : > { %v4750_v42 = vrot.slane %v4736_v25, %v9991_v22  ;;  %v10362_v61 = vand.u32 127, %v12427_v13 }
 0x21f   : > { %v10304_v49 = vpop.xlane.xlu0 %2149 }
 0x220   : > { %12416 = vst [vmem:[#allocation16_spill] sm:$0xff] %v10304_v49 }
 0x221   : > { %v10331_v31 = vpop.xlane.xlu1 %2174 }
 0x222   : > { %12419 = vst [vmem:[#allocation18_spill] sm:$0xff] %v10331_v31 }
 0x223   : > { %v10329_v49 = vpop.xlane.xlu0 %2159 }
 0x224   : > { %12418 = vst [vmem:[#allocation17_spill] sm:$0xff] %v10329_v49 }
 0x227   : > { %v10335_v4 = vpop.xlane.xlu0 %2169 }
 0x228   : > { %12420 = vst [vmem:[#allocation20_spill] sm:$0xff] %v10335_v4 }
 0x229   : > { %2244 = vadd.xlane.f32.xlu1 %v10178_v50  ;;  %v2769_v50 = vrot.slane %v10215_v27, %v12386_v0  ;;  %v4694_v27 = vrot.slane %v4686_v15, %v9991_v22  ;;  %v809_v15 = vadd.f32 %v10043_v11, %v8615_v36 }
 0x22b   : > { %v4997_v24 = vcombine.low %v2765_v18, %v2769_v50  ;;  %v10341_v18 = vpop.xlane.xlu1 %2184  ;;  %v4702_v50 = vcombine.low %v4694_v27, %v4701_v63  ;;  %v10345_v43 = vpop.xlane.xlu0 %2179  ;;  %v281_v27 = vld [vmem:[%s8438_s25 + $0x1f0] sm:$0xff]  ;;  %v282_v63 = vld [vmem:[%s8438_s25 + $0x1f8] sm:$0xff]  ;;  %v1432_v25 = vmul.f32 0.01, %v809_v15 }
 0x22c   : > { %12421 = vst [vmem:[#allocation19_spill] sm:$0xff] %v10341_v18  ;;  %12422 = vst [vmem:[#allocation21_spill] sm:$0xff] %v10345_v43 }
 0x22d   : > { %v5007_v51 = vrot.slane %v4997_v24, %v9991_v22 }
 0x22e   : > { %2269 = vadd.xlane.f32.xlu0 %v10187_v20  ;;  %v4720_v20 = vrot.slane %v4704_v59, %v9991_v22  ;;  %v5021_v59 = vrot.slane %v4999_v6, %v9991_v22 }
 0x22f   : > { %v5029_v14 = vcombine.low %v5007_v51, %v5014_v21  ;;  %v10349_v6 = vpop.xlane.xlu0 %2189  ;;  %v1433_v51 = vmul.f32 0.01, %v811_v35  ;;  %v314_v21 = vpack.c.bf16 %v282_v63, %v281_v27 }
 0x230   : > { %v4735_v2 = vcombine.low %v4713_v33, %v4720_v20  ;;  %v5030_v24 = vcombine.low %v5021_v59, %v5028_v58  ;;  %12424 = vst [vmem:[#allocation23_spill] sm:$0xff] %v10349_v6  ;;  %v1162_v59 = vadd.f32 %v10057_v17, %v8618_v37  ;;  %v7792_v58 = vadd.s32 4294967288, %v10362_v61 }
 0x231   : > { %v5037_v1 = vrot.slane %v5029_v14, %v9991_v22  ;;  %8272 = vmatmul.mubr.msk.bf16.gmra.mrb[124].mxu0 %vm433_vm0, %v314_v21  ;;  %8304 = vmatmul.mubr.msk.bf16.gmra.mrb[124].mxu1 %vm433_vm0, %v314_v21 }
 0x232   : > { %v4743_v30 = vrot.slane %v4735_v2, %v9991_v22  ;;  %v5044_v46 = vrot.slane %v5030_v24, %v9991_v22  ;;  %v1434_v14 = vmul.f32 0.01, %v1162_v59 }
 0x234   : > { %v10347_v28 = vpop.xlane.xlu1 %2194  ;;  %v4751_v55 = vcombine.low %v4743_v30, %v4750_v42  ;;  %v5045_v2 = vcombine.low %v5037_v1, %v5044_v46  ;;  %v1688_v30 = vmax.f32 %v809_v15, %v1432_v25  ;;  %v1689_v42 = vmax.f32 %v811_v35, %v1433_v51 }
 0x235   : > { %12423 = vst [vmem:[#allocation22_spill] sm:$0xff] %v10347_v28  ;;  %v10386_v46 = vsub.s32 %v10362_v61, %v12383_v41 }
 0x236   : > { %v1966_v27 = vmul.f32 %v8631_v44, %v1688_v30 }
 0x237   : > { %12433 = vst [vmem:[#allocation31_spill] sm:$0xff] %v10386_v46 }
 0x23a   : > { %7607 = vperm.xlu1 %8318, %v4702_v50   ;;  %v10359_v20 = vpop.xlane.xlu0 %2199  ;;  %v1164_v50 = vadd.f32 %v10061_v60, %v8627_v40  ;;  %v1967_v60 = vmul.f32 %v8635_v47, %v1689_v42 }
 0x23b   : > { %12426 = vst [vmem:[#allocation25_spill] sm:$0xff] %v10359_v20 }
 0x23c   : > { %v1435_v1 = vmul.f32 0.01, %v1164_v50 }
 0x23e   : > { %7610 = vperm.xlu1 %8318, %v4751_v55   ;;  %v10382_v55 = vsub.s32 %v7792_v58, %v12383_v41 }
 0x23f   : > { %v10357_v33 = vpop.xlane.xlu1 %2204 }
 0x240   : > { %12425 = vst [vmem:[#allocation24_spill] sm:$0xff] %v10357_v33  ;;  %12432 = vst [vmem:[#allocation30_spill] sm:$0xff] %v10382_v55 }
 0x241   : > { %v10371_v56 = vpop.xlane.xlu0 %2209 }
 0x242   : > { %12429 = vst [vmem:[#allocation27_spill] sm:$0xff] %v10371_v56  ;;  %v1691_v56 = vmax.f32 %v1164_v50, %v1435_v1 }
 0x243   : > { %v10368_v11 = vpop.xlane.xlu1 %2214 }
 0x244   : > { %12428 = vst [vmem:[#allocation26_spill] sm:$0xff] %v10368_v11  ;;  %7628 = vperm.xlu0 %8317, %v5045_v2   ;;  %v1690_v2 = vmax.f32 %v1162_v59, %v1434_v14  ;;  %v2271_v14 = vadd.f32 %v1967_v60, %v1966_v27 }
 0x245   : > { %v10379_v17 = vpop.xlane.xlu0 %2219 }
 0x246   : > { %12431 = vst [vmem:[#allocation29_spill] sm:$0xff] %v10379_v17  ;;  %v1968_v4 = vmul.f32 %v8640_v53, %v1690_v2 }
 0x248   : > { %v10377_v24 = vpop.xlane.xlu1 %2224  ;;  %v814_v63 = vpop.f32.mrb[100].mxu0 }
 0x249   : > { %12430 = vst [vmem:[#allocation28_spill] sm:$0xff] %v10377_v24  ;;  %v815_v15 = vadd.f32 %v814_v63, %v8615_v36  ;;  %v816_v35 = vpop.f32.mrb[101].mxu0  ;;  %v1167_v21 = vpop.f32.mrb[100].mxu1 }
 0x24a   : > { %v817_v51 = vadd.f32 %v816_v35, %v8624_v39  ;;  %v1168_v20 = vadd.f32 %v1167_v21, %v8618_v37  ;;  %v1169_v30 = vpop.f32.mrb[101].mxu1  ;;  %v10396_v43 = vpop.f32.mrb[102].mxu0 }
 0x24b   : > { %v1436_v17 = vmul.f32 0.01, %v815_v15  ;;  %v1170_v63 = vadd.f32 %v1169_v30, %v8627_v40  ;;  %v10398_v59 = vpop.f32.mrb[102].mxu1  ;;  %v10401_v49 = vpop.f32.mrb[103].mxu0 }
 0x24c   : > { %v7599_v25 = vpop.permute.xlu1 %7598  ;;  %v1437_v6 = vmul.f32 0.01, %v817_v51  ;;  %v10403_v50 = vpop.f32.mrb[103].mxu1 }
 0x24d   : > { %v7796_v58 = vrot.slane %v7599_v25, %v10382_v55  ;;  %v7596_v13 = vpop.permute.xlu0 %7595  ;;  %v1692_v35 = vmax.f32 %v815_v15, %v1436_v17  ;;  %v1438_v25 = vmul.f32 0.01, %v1168_v20  ;;  %v1439_v21 = vmul.f32 0.01, %v1170_v63 }
 0x24e   : > { %v7791_v42 = vrot.slane %v7596_v13, %v10386_v46  ;;  %v1693_v13 = vmax.f32 %v817_v51, %v1437_v6  ;;  %v1969_v55 = vmul.f32 %v8643_v54, %v1691_v56  ;;  %v2272_v15 = vadd.f32 %v2271_v14, %v1968_v4 }
 0x24f   : > { %v1970_v30 = vmul.f32 %v8631_v44, %v1692_v35  ;;  %v1694_v46 = vmax.f32 %v1168_v20, %v1438_v25  ;;  %v1695_v17 = vmax.f32 %v1170_v63, %v1439_v21  ;;  %v2605_v6 = vrot.slane %v10203_v7, %v12385_v23 }
 0x250   : > { %v10406_v1 = vsel %vm7797_vm1, %v7796_v58, %v7791_v42  ;;  %v1971_v27 = vmul.f32 %v8635_v47, %v1693_v13  ;;  %v10413_v11 = vadd.f32 %v2272_v15, %v1969_v55  ;;  %v2609_v20 = vrot.slane %v10203_v7, %v12386_v0 }
 0x251   : > { %v1972_v60 = vmul.f32 %v8640_v53, %v1694_v46  ;;  %v1973_v2 = vmul.f32 %v8643_v54, %v1695_v17  ;;  %v2613_v56 = vrot.slane %v10203_v7, %v12388_v62  ;;  %v2617_v46 = vrot.slane %v10203_v7, %v12389_v32 }
 0x252   : > { %v2276_v24 = vadd.f32 %v1971_v27, %v1970_v30  ;;  %12434 = vst [vmem:[#allocation32_spill] sm:$0xff] %v10413_v11  ;;  %v2621_v4 = vrot.slane %v10203_v7, %v9942_v12  ;;  %v2625_v55 = vrot.slane %v10203_v7, %v9945_v5  ;;  %v2633_v51 = vrot.slane %v10203_v7, %v9955_v38 }
 0x253   : > { %v4752_v63 = vcombine.low %v2605_v6, %v2609_v20  ;;  %v4753_v14 = vcombine.low %v2613_v56, %v2617_v46  ;;  %v2637_v35 = vrot.slane %v10115_v10, %v12385_v23  ;;  %v2641_v25 = vrot.slane %v10115_v10, %v12386_v0 }
 0x254   : > { %v2277_v58 = vadd.f32 %v2276_v24, %v1972_v60  ;;  %v2629_v24 = vrot.slane %v10203_v7, %v9951_v34  ;;  %v4754_v13 = vcombine.low %v2621_v4, %v2625_v55  ;;  %v2645_v30 = vrot.slane %v10115_v10, %v12388_v62 }
 0x255   : > { %v2649_v27 = vrot.slane %v10115_v10, %v12389_v32  ;;  %v2653_v17 = vrot.slane %v10115_v10, %v9942_v12  ;;  %v2657_v7 = vrot.slane %v10115_v10, %v9945_v5  ;;  %v2661_v60 = vrot.slane %v10115_v10, %v9951_v34 }
 0x256   : > { %v2278_v42 = vadd.f32 %v2277_v58, %v1973_v2  ;;  %v4755_v21 = vcombine.low %v2629_v24, %v2633_v51  ;;  %v2665_v15 = vrot.slane %v10115_v10, %v9955_v38  ;;  %v2829_v2 = vrot.slane %v10227_v52, %v12385_v23 }
 0x257   : > { %v2833_v58 = vrot.slane %v10227_v52, %v12386_v0  ;;  %v2837_v6 = vrot.slane %v10227_v52, %v12388_v62  ;;  %v2841_v20 = vrot.slane %v10227_v52, %v12389_v32  ;;  %v2845_v56 = vrot.slane %v10227_v52, %v9942_v12 }
 0x258   : > { %v2849_v10 = vrot.slane %v10227_v52, %v9945_v5  ;;  %v2857_v46 = vrot.slane %v10227_v52, %v9955_v38  ;;  %v4762_v4 = vrot.slane %v4752_v63, %v9991_v22  ;;  %v4769_v55 = vrot.slane %v4753_v14, %v9991_v22 }
 0x259   : > { %v4776_v24 = vrot.slane %v4754_v13, %v9991_v22  ;;  %v4801_v51 = vcombine.low %v2637_v35, %v2641_v25  ;;  %v4802_v33 = vcombine.low %v2645_v30, %v2649_v27  ;;  %v4803_v28 = vcombine.low %v2653_v17, %v2657_v7 }
 0x25a   : > { %v4804_v18 = vcombine.low %v2661_v60, %v2665_v15  ;;  %v5095_v31 = vcombine.low %v2829_v2, %v2833_v58  ;;  %v5096_v3 = vcombine.low %v2837_v6, %v2841_v20  ;;  %v5097_v16 = vcombine.low %v2845_v56, %v2849_v10 }
 0x25b   : > { %v4784_v19 = vcombine.low %v4762_v4, %v4769_v55  ;;  %v4818_v63 = vrot.slane %v4802_v33, %v9991_v22  ;;  %v4825_v14 = vrot.slane %v4803_v28, %v9991_v22  ;;  %v1174_v20 = vadd.f32 %v10403_v50, %v8627_v40 }
 0x25c   : > { %v4832_v13 = vrot.slane %v4804_v18, %v9991_v22  ;;  %v5112_v35 = vrot.slane %v5096_v3, %v9991_v22  ;;  %v5119_v25 = vrot.slane %v5097_v16, %v9991_v22  ;;  %v821_v16 = vadd.f32 %v10401_v49, %v8624_v39 }
 0x25d   : > { %v4792_v27 = vrot.slane %v4784_v19, %v9991_v22  ;;  %v1172_v3 = vadd.f32 %v10398_v59, %v8618_v37  ;;  %v7799_v49 = vadd.s32 4294967280, %v10362_v61 }
 0x25e   : > { %v4834_v60 = vcombine.low %v4825_v14, %v4832_v13  ;;  %v1441_v6 = vmul.f32 0.01, %v821_v16 }
 0x25f   : > { %v10494_v59 = vsub.s32 %v7799_v49, %v12383_v41 }
 0x260   : > { %v4848_v18 = vrot.slane %v4834_v60, %v9991_v22 }
 0x261   : > { %12436 = vst [vmem:[#allocation34_spill] sm:$0xff] %v10494_v59 }
 0x262   : > { %2254 = vadd.xlane.f32.xlu1 %v10217_v45  ;;  %v2853_v45 = vrot.slane %v10227_v52, %v9951_v34  ;;  %v4811_v52 = vrot.slane %v4801_v51, %v9991_v22 }
 0x263   : > { %2279 = vadd.xlane.f32.xlu0 %v2278_v42  ;;  %v4783_v42 = vrot.slane %v4755_v21, %v9991_v22  ;;  %v5105_v21 = vrot.slane %v5095_v31, %v9991_v22  ;;  %v819_v31 = vadd.f32 %v10396_v43, %v8615_v36  ;;  %v1442_v43 = vmul.f32 0.01, %v1172_v3 }
 0x264   : > { %v5098_v29 = vcombine.low %v2853_v45, %v2857_v46  ;;  %v4833_v7 = vcombine.low %v4811_v52, %v4818_v63  ;;  %v1697_v45 = vmax.f32 %v821_v16, %v1441_v6  ;;  %v1443_v46 = vmul.f32 0.01, %v1174_v20 }
 0x265   : > { %v4785_v11 = vcombine.low %v4776_v24, %v4783_v42  ;;  %v5127_v15 = vcombine.low %v5105_v21, %v5112_v35  ;;  %v1440_v58 = vmul.f32 0.01, %v819_v31  ;;  %v1698_v4 = vmax.f32 %v1172_v3, %v1442_v43 }
 0x266   : > { %v5126_v30 = vrot.slane %v5098_v29, %v9991_v22  ;;  %v4841_v28 = vrot.slane %v4833_v7, %v9991_v22  ;;  %v7806_v24 = vadd.s32 4294967272, %v10362_v61  ;;  %v1975_v50 = vmul.f32 %v8635_v47, %v1697_v45 }
 0x267   : > { %v4799_v17 = vrot.slane %v4785_v11, %v9991_v22  ;;  %v5135_v19 = vrot.slane %v5127_v15, %v9991_v22  ;;  %v1696_v10 = vmax.f32 %v819_v31, %v1440_v58  ;;  %v1699_v51 = vmax.f32 %v1174_v20, %v1443_v46 }
 0x268   : > { %v5128_v33 = vcombine.low %v5119_v25, %v5126_v30  ;;  %v4849_v11 = vcombine.low %v4841_v28, %v4848_v18  ;;  %v1976_v52 = vmul.f32 %v8640_v53, %v1698_v4  ;;  %v10502_v13 = vsub.s32 %v7806_v24, %v12383_v41 }
 0x269   : > { %v4800_v2 = vcombine.low %v4792_v27, %v4799_v17  ;;  %v1974_v42 = vmul.f32 %v8631_v44, %v1696_v10  ;;  %v1977_v21 = vmul.f32 %v8643_v54, %v1699_v51 }
 0x26a   : > { %v5142_v29 = vrot.slane %v5128_v33, %v9991_v22  ;;  %12437 = vst [vmem:[#allocation35_spill] sm:$0xff] %v10502_v13 }
 0x26b   : > { %v2281_v35 = vadd.f32 %v1975_v50, %v1974_v42 }
 0x26c   : > { %v5143_v56 = vcombine.low %v5135_v19, %v5142_v29 }
 0x26d   : > { %v2282_v30 = vadd.f32 %v2281_v35, %v1976_v52  ;;  %v2681_v35 = vrot.slane %v10211_v26, %v12389_v32 }
 0x26f   : > { %v10509_v33 = vadd.f32 %v2282_v30, %v1977_v21  ;;  %v2677_v21 = vrot.slane %v10211_v26, %v12388_v62  ;;  %v2689_v30 = vrot.slane %v10211_v26, %v9945_v5 }
 0x273   : > { %7613 = vperm.xlu1 %8318, %v4800_v2  }
 0x277   : > { %7616 = vperm.xlu1 %8318, %v4849_v11  }
 0x279   : > { %7634 = vperm.xlu0 %8317, %v5143_v56  }
 0x27d   : > { %v10491_v55 = vpop.xlane.xlu1 %2234 }
 0x27e   : > { %12435 = vst [vmem:[#allocation33_spill] sm:$0xff] %v10491_v55 }
 0x281   : > { %v7602_v63 = vpop.permute.xlu1 %7601 }
 0x282   : > { %v7803_v14 = vrot.slane %v7602_v63, %v10494_v59  ;;  %v2669_v63 = vrot.slane %v10211_v26, %v12385_v23  ;;  %v12442_v59 = vld [vmem:[#allocation32_spill] sm:$0xff] }
 0x284   : > { %v7805_v25 = vsel %vm7804_vm2, %v7803_v14, %v10406_v1  ;;  %v2673_v14 = vrot.slane %v10211_v26, %v12386_v0 }
 0x285   : > { %v7605_v27 = vpop.permute.xlu1 %7604  ;;  %v824_v17 = vpop.f32.mrb[104].mxu0 }
 0x286   : > { %v7810_v7 = vrot.slane %v7605_v27, %v10502_v13  ;;  %v825_v60 = vadd.f32 %v824_v17, %v8615_v36  ;;  %v826_v15 = vpop.f32.mrb[105].mxu0  ;;  %v1177_v28 = vpop.f32.mrb[104].mxu1  ;;  %v2693_v27 = vrot.slane %v10211_v26, %v9951_v34  ;;  %v2697_v17 = vrot.slane %v10211_v26, %v9955_v38 }
 0x287   : > { %v827_v2 = vadd.f32 %v826_v15, %v8624_v39  ;;  %v10512_v18 = vpop.f32.mrb[106].mxu0  ;;  %v1178_v16 = vadd.f32 %v1177_v28, %v8618_v37  ;;  %v1179_v19 = vpop.f32.mrb[105].mxu1  ;;  %v2901_v15 = vrot.slane %v10233_v9, %v12388_v62  ;;  %v2909_v28 = vrot.slane %v10233_v9, %v9942_v12 }
 0x288   : > { %v10515_v31 = vsel %vm7811_vm3, %v7810_v7, %v7805_v25  ;;  %v1444_v1 = vmul.f32 0.01, %v825_v60  ;;  %v830_v29 = vpop.f32.mrb[107].mxu0  ;;  %v1180_v11 = vadd.f32 %v1179_v19, %v8627_v40  ;;  %v1181_v58 = vpop.f32.mrb[106].mxu1  ;;  %v2685_v25 = vrot.slane %v10211_v26, %v9942_v12 }
 0x289   : > { %v1445_v3 = vmul.f32 0.01, %v827_v2  ;;  %v1446_v20 = vmul.f32 0.01, %v1178_v16  ;;  %v10519_v56 = vpop.f32.mrb[107].mxu1  ;;  %v2893_v7 = vrot.slane %v10233_v9, %v12385_v23  ;;  %v2917_v26 = vrot.slane %v10233_v9, %v9951_v34 }
 0x28a   : > { %v1700_v6 = vmax.f32 %v825_v60, %v1444_v1  ;;  %v1447_v49 = vmul.f32 0.01, %v1180_v11  ;;  %v2897_v60 = vrot.slane %v10233_v9, %v12386_v0  ;;  %v2913_v1 = vrot.slane %v10233_v9, %v9945_v5 }
 0x28b   : > { %v1701_v43 = vmax.f32 %v827_v2, %v1445_v3  ;;  %v1702_v45 = vmax.f32 %v1178_v16, %v1446_v20  ;;  %v2905_v2 = vrot.slane %v10233_v9, %v12389_v32  ;;  %v2921_v16 = vrot.slane %v10233_v9, %v9955_v38 }
 0x28c   : > { %v1978_v10 = vmul.f32 %v8631_v44, %v1700_v6  ;;  %v1703_v4 = vmax.f32 %v1180_v11, %v1447_v49  ;;  %v4850_v19 = vcombine.low %v2669_v63, %v2673_v14  ;;  %v4851_v3 = vcombine.low %v2677_v21, %v2681_v35 }
 0x28d   : > { %v1979_v46 = vmul.f32 %v8635_v47, %v1701_v43  ;;  %v1980_v24 = vmul.f32 %v8640_v53, %v1702_v45  ;;  %v4852_v11 = vcombine.low %v2685_v25, %v2689_v30  ;;  %v4853_v6 = vcombine.low %v2693_v27, %v2697_v17 }
 0x28e   : > { %v1981_v42 = vmul.f32 %v8643_v54, %v1703_v4  ;;  %v5193_v20 = vcombine.low %v2893_v7, %v2897_v60  ;;  %v5194_v43 = vcombine.low %v2901_v15, %v2905_v2  ;;  %v5195_v49 = vcombine.low %v2909_v28, %v2913_v1 }
 0x28f   : > { %v2286_v50 = vadd.f32 %v1979_v46, %v1978_v10  ;;  %v5196_v10 = vcombine.low %v2917_v26, %v2921_v16  ;;  %v4860_v45 = vrot.slane %v4850_v19, %v9991_v22  ;;  %v4867_v46 = vrot.slane %v4851_v3, %v9991_v22 }
 0x290   : > { %v4874_v4 = vrot.slane %v4852_v11, %v9991_v22  ;;  %v5203_v9 = vrot.slane %v5193_v20, %v9991_v22  ;;  %v829_v25 = vadd.f32 %v10512_v18, %v8615_v36  ;;  %v831_v30 = vadd.f32 %v830_v29, %v8624_v39 }
 0x291   : > { %v2287_v51 = vadd.f32 %v2286_v50, %v1980_v24  ;;  %v4881_v24 = vrot.slane %v4853_v6, %v9991_v22  ;;  %v5217_v50 = vrot.slane %v5195_v49, %v9991_v22  ;;  %v1182_v7 = vadd.f32 %v1181_v58, %v8618_v37 }
 0x292   : > { %v1448_v15 = vmul.f32 0.01, %v829_v25  ;;  %v1449_v1 = vmul.f32 0.01, %v831_v30  ;;  %v1184_v19 = vadd.f32 %v10519_v56, %v8627_v40 }
 0x293   : > { %v2288_v52 = vadd.f32 %v2287_v51, %v1981_v42  ;;  %v5210_v42 = vrot.slane %v5194_v43, %v9991_v22  ;;  %v4882_v51 = vcombine.low %v4860_v45, %v4867_v46  ;;  %v1450_v6 = vmul.f32 0.01, %v1182_v7 }
 0x294   : > { %v1704_v56 = vmax.f32 %v829_v25, %v1448_v15 }
 0x295   : > { %v5225_v63 = vcombine.low %v5203_v9, %v5210_v42  ;;  %v4890_v21 = vrot.slane %v4882_v51, %v9991_v22  ;;  %v1705_v9 = vmax.f32 %v831_v30, %v1449_v1 }
 0x297   : > { %v5233_v27 = vrot.slane %v5225_v63, %v9991_v22  ;;  %v1983_v25 = vmul.f32 %v8635_v47, %v1705_v9 }
 0x298   : > { %2289 = vadd.xlane.f32.xlu0 %v2288_v52  ;;  %v4883_v52 = vcombine.low %v4874_v4, %v4881_v24 }
 0x29a   : > { %v4897_v35 = vrot.slane %v4883_v52, %v9991_v22 }
 0x29b   : > { %2264 = vadd.xlane.f32.xlu1 %v10275_v57  ;;  %v5224_v57 = vrot.slane %v5196_v10, %v9991_v22 }
 0x29c   : > { %v4898_v60 = vcombine.low %v4890_v21, %v4897_v35 }
 0x29d   : > { %v5226_v14 = vcombine.low %v5217_v50, %v5224_v57  ;;  %v1451_v50 = vmul.f32 0.01, %v1184_v19 }
 0x29f   : > { %v5240_v17 = vrot.slane %v5226_v14, %v9991_v22  ;;  %v1706_v14 = vmax.f32 %v1182_v7, %v1450_v6 }
 0x2a1   : > { %v5241_v3 = vcombine.low %v5233_v27, %v5240_v17  ;;  %v7813_v27 = vadd.s32 4294967264, %v10362_v61  ;;  %v1982_v17 = vmul.f32 %v8631_v44, %v1704_v56 }
 0x2a3   : > { %v834_v2 = vpop.f32.mrb[108].mxu0  ;;  %v1187_v28 = vpop.f32.mrb[108].mxu1  ;;  %v10599_v7 = vsub.s32 %v7813_v27, %v12383_v41 }
 0x2a4   : > { %v835_v26 = vadd.f32 %v834_v2, %v8615_v36  ;;  %v836_v16 = vpop.f32.mrb[109].mxu0  ;;  %v1188_v18 = vadd.f32 %v1187_v28, %v8618_v37  ;;  %v1189_v29 = vpop.f32.mrb[109].mxu1  ;;  %v1984_v2 = vmul.f32 %v8640_v53, %v1706_v14 }
 0x2a5   : > { %v837_v11 = vadd.f32 %v836_v16, %v8624_v39  ;;  %v1190_v58 = vadd.f32 %v1189_v29, %v8627_v40  ;;  %v10580_v20 = vpop.f32.mrb[110].mxu0  ;;  %v10582_v43 = vpop.f32.mrb[110].mxu1  ;;  %12439 = vst [vmem:[#allocation37_spill] sm:$0xff] %v10599_v7 }
 0x2a6   : > { %v1452_v49 = vmul.f32 0.01, %v835_v26  ;;  %v1454_v10 = vmul.f32 0.01, %v1188_v18  ;;  %v10584_v45 = vpop.f32.mrb[111].mxu0  ;;  %v10586_v46 = vpop.f32.mrb[111].mxu1 }
 0x2a7   : > { %v1453_v4 = vmul.f32 0.01, %v837_v11  ;;  %v1455_v24 = vmul.f32 0.01, %v1190_v58 }
 0x2a8   : > { %v1708_v42 = vmax.f32 %v835_v26, %v1452_v49  ;;  %v1710_v57 = vmax.f32 %v1188_v18, %v1454_v10  ;;  %v7820_v26 = vadd.s32 4294967256, %v10362_v61  ;;  %v2291_v18 = vadd.f32 %v1983_v25, %v1982_v17 }
 0x2a9   : > { %v1709_v51 = vmax.f32 %v837_v11, %v1453_v4  ;;  %v1711_v52 = vmax.f32 %v1190_v58, %v1455_v24  ;;  %v2745_v17 = vrot.slane %v10219_v8, %v12389_v32  ;;  %v2749_v25 = vrot.slane %v10219_v8, %v9942_v12 }
 0x2aa   : > { %v1986_v63 = vmul.f32 %v8631_v44, %v1708_v42  ;;  %v1988_v35 = vmul.f32 %v8640_v53, %v1710_v57  ;;  %v10605_v6 = vsub.s32 %v7820_v26, %v12383_v41  ;;  %v2733_v42 = vrot.slane %v10219_v8, %v12385_v23 }
 0x2ab   : > { %v1987_v21 = vmul.f32 %v8635_v47, %v1709_v51  ;;  %v1989_v30 = vmul.f32 %v8643_v54, %v1711_v52  ;;  %v2757_v26 = vrot.slane %v10219_v8, %v9951_v34 }
 0x2ac   : > { %7619 = vperm.xlu1 %8318, %v4898_v60   ;;  %v1707_v60 = vmax.f32 %v1184_v19, %v1451_v50  ;;  %12440 = vst [vmem:[#allocation38_spill] sm:$0xff] %v10605_v6 }
 0x2ad   : > { %v2296_v15 = vadd.f32 %v1987_v21, %v1986_v63  ;;  %v2741_v63 = vrot.slane %v10219_v8, %v12388_v62 }
 0x2ae   : > { %7640 = vperm.xlu0 %8317, %v5241_v3   ;;  %v1985_v16 = vmul.f32 %v8643_v54, %v1707_v60  ;;  %v2292_v3 = vadd.f32 %v2291_v18, %v1984_v2 }
 0x2af   : > { %v2297_v1 = vadd.f32 %v2296_v15, %v1988_v35 }
 0x2b0   : > { %v10607_v58 = vadd.f32 %v2292_v3, %v1985_v16  ;;  %v2761_v3 = vrot.slane %v10219_v8, %v9955_v38 }
 0x2b1   : > { %v2298_v29 = vadd.f32 %v2297_v1, %v1989_v30  ;;  %v2753_v1 = vrot.slane %v10219_v8, %v9945_v5 }
 0x2b2   : > { %12441 = vst [vmem:[#allocation39_spill] sm:$0xff] %v10607_v58 }
 0x2b6   : > { %v10596_v28 = vpop.xlane.xlu1 %2244 }
 0x2b7   : > { %12438 = vst [vmem:[#allocation36_spill] sm:$0xff] %v10596_v28  ;;  %v844_v24 = vpop.f32.mrb[112].mxu0  ;;  %v1197_v9 = vpop.f32.mrb[112].mxu1 }
 0x2b8   : > { %v845_v50 = vadd.f32 %v844_v24, %v8615_v36  ;;  %v846_v57 = vpop.f32.mrb[113].mxu0  ;;  %v1198_v51 = vadd.f32 %v1197_v9, %v8618_v37  ;;  %v1199_v52 = vpop.f32.mrb[113].mxu1 }
 0x2b9   : > { %v847_v14 = vadd.f32 %v846_v57, %v8624_v39  ;;  %v1200_v21 = vadd.f32 %v1199_v52, %v8627_v40  ;;  %v10625_v35 = vpop.f32.mrb[114].mxu0  ;;  %v10627_v27 = vpop.f32.mrb[114].mxu1  ;;  %v2969_v57 = vrot.slane %v10237_v48, %v12389_v32  ;;  %v2973_v52 = vrot.slane %v10237_v48, %v9942_v12 }
 0x2ba   : > { %v7608_v19 = vpop.permute.xlu1 %7607  ;;  %v1460_v60 = vmul.f32 0.01, %v845_v50  ;;  %v1462_v30 = vmul.f32 0.01, %v1198_v51  ;;  %v10633_v15 = vpop.f32.mrb[115].mxu0 }
 0x2bb   : > { %v7817_v11 = vrot.slane %v7608_v19, %v10599_v7  ;;  %v10635_v2 = vpop.f32.mrb[115].mxu1  ;;  %v1461_v16 = vmul.f32 0.01, %v847_v14  ;;  %v1463_v18 = vmul.f32 0.01, %v1200_v21  ;;  %v2957_v19 = vrot.slane %v10237_v48, %v12385_v23 }
 0x2bc   : > { %v4951_v7 = vcombine.low %v2757_v26, %v2761_v3 }
 0x2bd   : > { %v7819_v49 = vsel %vm7818_vm4, %v7817_v11, %v10515_v31  ;;  %v2737_v31 = vrot.slane %v10219_v8, %v12386_v0  ;;  %v1716_v11 = vmax.f32 %v845_v50, %v1460_v60  ;;  %v1717_v24 = vmax.f32 %v847_v14, %v1461_v16 }
 0x2be   : > { %v7611_v10 = vpop.permute.xlu1 %7610  ;;  %v1719_v9 = vmax.f32 %v1200_v21, %v1463_v18  ;;  %v2977_v8 = vrot.slane %v10237_v48, %v9945_v5  ;;  %v2985_v60 = vrot.slane %v10237_v48, %v9955_v38  ;;  %v4949_v16 = vcombine.low %v2741_v63, %v2745_v17 }
 0x2bf   : > { %v7824_v56 = vrot.slane %v7611_v10, %v10605_v6  ;;  %v2961_v10 = vrot.slane %v10237_v48, %v12386_v0  ;;  %v1994_v50 = vmul.f32 %v8631_v44, %v1716_v11  ;;  %v1995_v14 = vmul.f32 %v8635_v47, %v1717_v24 }
 0x2c0   : > { %v4950_v18 = vcombine.low %v2749_v25, %v2753_v1  ;;  %v1997_v6 = vmul.f32 %v8643_v54, %v1719_v9  ;;  %v5293_v13 = vcombine.low %v2973_v52, %v2977_v8  ;;  %v4965_v24 = vrot.slane %v4949_v16, %v9991_v22 }
 0x2c1   : > { %v10613_v4 = vsel %vm7825_vm5, %v7824_v56, %v7819_v49  ;;  %v1718_v49 = vmax.f32 %v1198_v51, %v1462_v30  ;;  %v2965_v56 = vrot.slane %v10237_v48, %v12388_v62  ;;  %v2981_v51 = vrot.slane %v10237_v48, %v9951_v34 }
 0x2c2   : > { %v4948_v30 = vcombine.low %v2733_v42, %v2737_v31  ;;  %v2306_v28 = vadd.f32 %v1995_v14, %v1994_v50  ;;  %v4979_v42 = vrot.slane %v4951_v7, %v9991_v22  ;;  %v839_v7 = vadd.f32 %v10580_v20, %v8615_v36 }
 0x2c3   : > { %v1996_v21 = vmul.f32 %v8640_v53, %v1718_v49  ;;  %v5292_v11 = vcombine.low %v2965_v56, %v2969_v57  ;;  %v5294_v55 = vcombine.low %v2981_v51, %v2985_v60  ;;  %v4972_v49 = vrot.slane %v4950_v18, %v9991_v22 }
 0x2c4   : > { %v4958_v48 = vrot.slane %v4948_v30, %v9991_v22  ;;  %v1194_v9 = vadd.f32 %v10586_v46, %v8627_v40  ;;  %v1456_v8 = vmul.f32 0.01, %v839_v7 }
 0x2c5   : > { %v2307_v58 = vadd.f32 %v2306_v28, %v1996_v21  ;;  %v5308_v17 = vrot.slane %v5292_v11, %v9991_v22  ;;  %v5322_v25 = vrot.slane %v5294_v55, %v9991_v22  ;;  %v4981_v28 = vcombine.low %v4972_v49, %v4979_v42 }
 0x2c6   : > { %v4980_v1 = vcombine.low %v4958_v48, %v4965_v24  ;;  %v1192_v55 = vadd.f32 %v10582_v43, %v8618_v37  ;;  %v1459_v24 = vmul.f32 0.01, %v1194_v9 }
 0x2c7   : > { %v10668_v31 = vadd.f32 %v2307_v58, %v1997_v6  ;;  %v841_v6 = vadd.f32 %v10584_v45, %v8624_v39 }
 0x2c8   : > { %v1458_v21 = vmul.f32 0.01, %v1192_v55 }
 0x2c9   : > { %v1457_v50 = vmul.f32 0.01, %v841_v6 }
 0x2cd   : > { %2299 = vadd.xlane.f32.xlu0 %v2298_v29  ;;  %v5291_v29 = vcombine.low %v2957_v19, %v2961_v10  ;;  %v4988_v19 = vrot.slane %v4980_v1, %v9991_v22  ;;  %v4995_v10 = vrot.slane %v4981_v28, %v9991_v22 }
 0x2cf   : > { %v5301_v63 = vrot.slane %v5291_v29, %v9991_v22  ;;  %v4996_v56 = vcombine.low %v4988_v19, %v4995_v10  ;;  %v854_v57 = vpop.f32.mrb[116].mxu0  ;;  %v1207_v52 = vpop.f32.mrb[116].mxu1 }
 0x2d0   : > { %2274 = vadd.xlane.f32.xlu1 %v12442_v59  ;;  %v5315_v59 = vrot.slane %v5293_v13, %v9991_v22  ;;  %v855_v20 = vadd.f32 %v854_v57, %v8615_v36  ;;  %v856_v51 = vpop.f32.mrb[117].mxu0  ;;  %v1208_v45 = vadd.f32 %v1207_v52, %v8618_v37  ;;  %v1209_v60 = vpop.f32.mrb[117].mxu1 }
 0x2d1   : > { %v5323_v26 = vcombine.low %v5301_v63, %v5308_v17  ;;  %v857_v30 = vadd.f32 %v856_v51, %v8624_v39  ;;  %v1210_v43 = vadd.f32 %v1209_v60, %v8627_v40  ;;  %v10690_v16 = vpop.f32.mrb[118].mxu0  ;;  %v10692_v46 = vpop.f32.mrb[118].mxu1  ;;  %v1712_v63 = vmax.f32 %v839_v7, %v1456_v8 }
 0x2d2   : > { %v5324_v3 = vcombine.low %v5315_v59, %v5322_v25  ;;  %v1468_v18 = vmul.f32 0.01, %v855_v20  ;;  %v1470_v29 = vmul.f32 0.01, %v1208_v45  ;;  %v10694_v11 = vpop.f32.mrb[119].mxu0  ;;  %v10696_v48 = vpop.f32.mrb[119].mxu1  ;;  %v1713_v17 = vmax.f32 %v841_v6, %v1457_v50 }
 0x2d3   : > { %v5331_v58 = vrot.slane %v5323_v26, %v9991_v22  ;;  %v1469_v49 = vmul.f32 0.01, %v857_v30  ;;  %v1471_v42 = vmul.f32 0.01, %v1210_v43  ;;  %v1714_v26 = vmax.f32 %v1192_v55, %v1458_v21 }
 0x2d4   : > { %v5338_v13 = vrot.slane %v5324_v3, %v9991_v22  ;;  %v1724_v59 = vmax.f32 %v855_v20, %v1468_v18  ;;  %v1726_v25 = vmax.f32 %v1208_v45, %v1470_v29  ;;  %v7827_v8 = vadd.s32 4294967248, %v10362_v61 }
 0x2d5   : > { %v1725_v1 = vmax.f32 %v857_v30, %v1469_v49  ;;  %v1727_v28 = vmax.f32 %v1210_v43, %v1471_v42  ;;  %v1992_v6 = vmul.f32 %v8640_v53, %v1714_v26 }
 0x2d6   : > { %v5339_v14 = vcombine.low %v5331_v58, %v5338_v13  ;;  %v2002_v3 = vmul.f32 %v8631_v44, %v1724_v59  ;;  %v2004_v10 = vmul.f32 %v8640_v53, %v1726_v25  ;;  %v1990_v58 = vmul.f32 %v8631_v44, %v1712_v63 }
 0x2d7   : > { %v2003_v19 = vmul.f32 %v8635_v47, %v1725_v1  ;;  %v1991_v13 = vmul.f32 %v8635_v47, %v1713_v17  ;;  %v2005_v57 = vmul.f32 %v8643_v54, %v1727_v28  ;;  %v10712_v60 = vsub.s32 %v7827_v8, %v12383_v41  ;;  %v864_v18 = vpop.f32.mrb[120].mxu0  ;;  %v1217_v29 = vpop.f32.mrb[120].mxu1  ;;  %v12446_v8 = vld [vmem:[#allocation4_spill] sm:$0xff] }
 0x2d8   : > { %v866_v49 = vpop.f32.mrb[121].mxu0  ;;  %v1218_v42 = vadd.f32 %v1217_v29, %v8618_v37  ;;  %v1219_v63 = vpop.f32.mrb[121].mxu1  ;;  %v2817_v29 = vrot.slane %v12446_v8, %v9945_v5 }
 0x2d9   : > { %v2316_v7 = vadd.f32 %v2003_v19, %v2002_v3  ;;  %v2301_v50 = vadd.f32 %v1991_v13, %v1990_v58  ;;  %12444 = vst [vmem:[#allocation40_spill] sm:$0xff] %v10712_v60  ;;  %v867_v59 = vadd.f32 %v866_v49, %v8624_v39  ;;  %v1220_v25 = vadd.f32 %v1219_v63, %v8627_v40 }
 0x2da   : > { %v1478_v26 = vmul.f32 0.01, %v1218_v42  ;;  %v2825_v49 = vrot.slane %v12446_v8, %v9955_v38 }
 0x2db   : > { %v2317_v52 = vadd.f32 %v2316_v7, %v2004_v10  ;;  %v2302_v51 = vadd.f32 %v2301_v50, %v1992_v6  ;;  %v1477_v19 = vmul.f32 0.01, %v867_v59  ;;  %v1479_v10 = vmul.f32 0.01, %v1220_v25 }
 0x2dc   : > { %v1734_v13 = vmax.f32 %v1218_v42, %v1478_v26  ;;  %v2801_v50 = vrot.slane %v12446_v8, %v12386_v0  ;;  %v12447_v42 = vld [vmem:[#allocation12_spill] sm:$0xff] }
 0x2dd   : > { %v10707_v20 = vadd.f32 %v2317_v52, %v2005_v57  ;;  %v1733_v57 = vmax.f32 %v867_v59, %v1477_v19  ;;  %v1735_v7 = vmax.f32 %v1220_v25, %v1479_v10  ;;  %v3021_v63 = vrot.slane %v12447_v42, %v12385_v23 }
 0x2de   : > { %v2012_v52 = vmul.f32 %v8640_v53, %v1734_v13  ;;  %v3025_v59 = vrot.slane %v12447_v42, %v12386_v0  ;;  %v3029_v25 = vrot.slane %v12447_v42, %v12388_v62  ;;  %v3041_v26 = vrot.slane %v12447_v42, %v9945_v5 }
 0x2df   : > { %v2011_v6 = vmul.f32 %v8635_v47, %v1733_v57  ;;  %v3049_v19 = vrot.slane %v12447_v42, %v9955_v38 }
 0x2e1   : > { %7625 = vperm.xlu1 %8318, %v4996_v56   ;;  %v1715_v56 = vmax.f32 %v1194_v9, %v1459_v24  ;;  %v7834_v9 = vadd.s32 4294967240, %v10362_v61  ;;  %v865_v24 = vadd.f32 %v864_v18, %v8615_v36  ;;  %v2813_v18 = vrot.slane %v12446_v8, %v9942_v12 }
 0x2e3   : > { %7646 = vperm.xlu0 %8317, %v5339_v14   ;;  %v1993_v55 = vmul.f32 %v8643_v54, %v1715_v56  ;;  %v10719_v43 = vsub.s32 %v7834_v9, %v12383_v41  ;;  %v1476_v28 = vmul.f32 0.01, %v865_v24 }
 0x2e5   : > { %v10715_v14 = vadd.f32 %v2302_v51, %v1993_v55  ;;  %12445 = vst [vmem:[#allocation41_spill] sm:$0xff] %v10719_v43  ;;  %v1732_v58 = vmax.f32 %v865_v24, %v1476_v28  ;;  %v2797_v55 = vrot.slane %v12446_v8, %v12385_v23  ;;  %v2013_v51 = vmul.f32 %v8643_v54, %v1735_v7 }
 0x2e6   : > { %v2821_v24 = vrot.slane %v12446_v8, %v9951_v34  ;;  %v3037_v28 = vrot.slane %v12447_v42, %v9942_v12 }
 0x2e7   : > { %v5046_v57 = vcombine.low %v2797_v55, %v2801_v50 }
 0x2ef   : > { %v10709_v45 = vpop.xlane.xlu1 %2254 }
 0x2f0   : > { %12443 = vst [vmem:[#allocation32_spill] sm:$0xff] %v10709_v45 }
 0x2f3   : > { %v7614_v21 = vpop.permute.xlu1 %7613 }
 0x2f4   : > { %v7831_v30 = vrot.slane %v7614_v21, %v10712_v60  ;;  %v2805_v21 = vrot.slane %v12446_v8, %v12388_v62  ;;  %v5056_v60 = vrot.slane %v5046_v57, %v9991_v22 }
 0x2f6   : > { %v7833_v17 = vsel %vm7832_vm6, %v7831_v30, %v10613_v4  ;;  %v2010_v4 = vmul.f32 %v8631_v44, %v1732_v58  ;;  %v2809_v30 = vrot.slane %v12446_v8, %v12389_v32  ;;  %v10770_v58 = vpop.f32.mrb[122].mxu0  ;;  %v5391_v8 = vcombine.low %v3037_v28, %v3041_v26  ;;  %v10791_v28 = vpop.f32.mrb[122].mxu1 }
 0x2f7   : > { %v7617_v1 = vpop.permute.xlu1 %7616  ;;  %v10772_v13 = vpop.f32.mrb[123].mxu0 }
 0x2f8   : > { %v7838_v3 = vrot.slane %v7617_v1, %v10719_v43  ;;  %v2326_v9 = vadd.f32 %v2011_v6, %v2010_v4  ;;  %v3033_v1 = vrot.slane %v12447_v42, %v12389_v32  ;;  %v5047_v7 = vcombine.low %v2805_v21, %v2809_v30 }
 0x2f9   : > { %v5048_v4 = vcombine.low %v2813_v18, %v2817_v29  ;;  %v5049_v6 = vcombine.low %v2821_v24, %v2825_v49  ;;  %v5413_v50 = vrot.slane %v5391_v8, %v9991_v22 }
 0x2fa   : > { %v10729_v56 = vsel %vm7839_vm7, %v7838_v3, %v7833_v17  ;;  %v2327_v17 = vadd.f32 %v2326_v9, %v2012_v52  ;;  %v3045_v3 = vrot.slane %v12447_v42, %v9951_v34  ;;  %v5390_v52 = vcombine.low %v3029_v25, %v3033_v1 }
 0x2fb   : > { %v5063_v42 = vrot.slane %v5047_v7, %v9991_v22 }
 0x2fc   : > { %v10768_v10 = vadd.f32 %v2327_v17, %v2013_v51  ;;  %v5392_v9 = vcombine.low %v3045_v3, %v3049_v19  ;;  %v5070_v51 = vrot.slane %v5048_v4, %v9991_v22  ;;  %v5077_v17 = vrot.slane %v5049_v6, %v9991_v22  ;;  %v10799_v19 = vpop.xlane.xlu0 %2229 }
 0x2fd   : > { %v5406_v55 = vrot.slane %v5390_v52, %v9991_v22  ;;  %v5078_v21 = vcombine.low %v5056_v60, %v5063_v42  ;;  %v1202_v60 = vadd.f32 %v10627_v27, %v8618_v37  ;;  %v1204_v3 = vadd.f32 %v10635_v2, %v8627_v40  ;;  %12448 = vst [vmem:[#allocation4_spill] sm:$0xff] %v10799_v19 }
 0x2fe   : > { %v5079_v30 = vcombine.low %v5070_v51, %v5077_v17 }
 0x2ff   : > { %v5086_v24 = vrot.slane %v5078_v21, %v9991_v22  ;;  %v1466_v7 = vmul.f32 0.01, %v1202_v60  ;;  %v1467_v6 = vmul.f32 0.01, %v1204_v3 }
 0x300   : > { %v5093_v49 = vrot.slane %v5079_v30, %v9991_v22  ;;  %v10802_v8 = vpop.xlane.xlu0 %2239 }
 0x301   : > { %12449 = vst [vmem:[#allocation12_spill] sm:$0xff] %v10802_v8 }
 0x302   : > { %2309 = vadd.xlane.f32.xlu0 %v10668_v31  ;;  %v5389_v31 = vcombine.low %v3021_v63, %v3025_v59  ;;  %v849_v63 = vadd.f32 %v10625_v35, %v8615_v36  ;;  %v851_v59 = vadd.f32 %v10633_v15, %v8624_v39  ;;  %v5094_v26 = vcombine.low %v5086_v24, %v5093_v49 }
 0x304   : > { %v5399_v43 = vrot.slane %v5389_v31, %v9991_v22  ;;  %v1464_v35 = vmul.f32 0.01, %v849_v63  ;;  %v1465_v57 = vmul.f32 0.01, %v851_v59  ;;  %v874_v4 = vpop.f32.mrb[124].mxu0 }
 0x305   : > { %2284 = vadd.xlane.f32.xlu1 %v10509_v33  ;;  %v5420_v33 = vrot.slane %v5392_v9, %v9991_v22  ;;  %v875_v31 = vadd.f32 %v874_v4, %v8615_v36  ;;  %v876_v52 = vpop.f32.mrb[125].mxu0 }
 0x306   : > { %v5421_v18 = vcombine.low %v5399_v43, %v5406_v55  ;;  %v10795_v43 = vpop.f32.mrb[123].mxu1  ;;  %v1720_v9 = vmax.f32 %v849_v63, %v1464_v35  ;;  %v1721_v42 = vmax.f32 %v851_v59, %v1465_v57  ;;  %v877_v2 = vadd.f32 %v876_v52, %v8624_v39  ;;  %v10810_v35 = vpop.xlane.xlu0 %2249 }
 0x307   : > { %v5422_v29 = vcombine.low %v5413_v50, %v5420_v33  ;;  %v1227_v27 = vpop.f32.mrb[124].mxu1  ;;  %v1484_v55 = vmul.f32 0.01, %v875_v31  ;;  %v1722_v33 = vmax.f32 %v1202_v60, %v1466_v7  ;;  %12450 = vst [vmem:[#allocation42_spill] sm:$0xff] %v10810_v35 }
 0x308   : > { %v5429_v25 = vrot.slane %v5421_v18, %v9991_v22  ;;  %v1228_v51 = vadd.f32 %v1227_v27, %v8618_v37  ;;  %v1229_v17 = vpop.f32.mrb[125].mxu1  ;;  %v1485_v21 = vmul.f32 0.01, %v877_v2  ;;  %v1723_v18 = vmax.f32 %v1204_v3, %v1467_v6 }
 0x309   : > { %v5436_v1 = vrot.slane %v5422_v29, %v9991_v22  ;;  %v1230_v50 = vadd.f32 %v1229_v17, %v8627_v40  ;;  %v1740_v29 = vmax.f32 %v875_v31, %v1484_v55  ;;  %v1998_v49 = vmul.f32 %v8631_v44, %v1720_v9 }
 0x30a   : > { %v1486_v30 = vmul.f32 0.01, %v1228_v51  ;;  %v1741_v63 = vmax.f32 %v877_v2, %v1485_v21  ;;  %v2000_v57 = vmul.f32 %v8640_v53, %v1722_v33  ;;  %v2001_v4 = vmul.f32 %v8643_v54, %v1723_v18  ;;  %v10817_v27 = vpop.xlane.xlu0 %2259 }
 0x30b   : > { %v5437_v15 = vcombine.low %v5429_v25, %v5436_v1  ;;  %v1487_v24 = vmul.f32 0.01, %v1230_v50  ;;  %v1999_v25 = vmul.f32 %v8635_v47, %v1721_v42  ;;  %v2018_v1 = vmul.f32 %v8631_v44, %v1740_v29  ;;  %12451 = vst [vmem:[#allocation43_spill] sm:$0xff] %v10817_v27 }
 0x30c   : > { %v1742_v59 = vmax.f32 %v1228_v51, %v1486_v30  ;;  %v2019_v60 = vmul.f32 %v8635_v47, %v1741_v63  ;;  %v7841_v9 = vadd.s32 4294967232, %v10362_v61  ;;  %v7848_v51 = vadd.s32 4294967224, %v10362_v61 }
 0x30d   : > { %v2311_v6 = vadd.f32 %v1999_v25, %v1998_v49  ;;  %v12455_v49 = vld [vmem:[#allocation6_spill] sm:$0xff] }
 0x30e   : > { %v2336_v7 = vadd.f32 %v2019_v60, %v2018_v1  ;;  %v10828_v55 = vsub.s32 %v7841_v9, %v12383_v41  ;;  %v7623_v33 = vpop.permute.xlu0 %7622  ;;  %v2861_v25 = vrot.slane %v12455_v49, %v12385_v23  ;;  %v2865_v63 = vrot.slane %v12455_v49, %v12386_v0 }
 0x30f   : > { %v2312_v52 = vadd.f32 %v2311_v6, %v2000_v57  ;;  %v2873_v1 = vrot.slane %v12455_v49, %v12389_v32  ;;  %v2885_v57 = vrot.slane %v12455_v49, %v9951_v34  ;;  %v2889_v60 = vrot.slane %v12455_v49, %v9955_v38 }
 0x310   : > { %12453 = vst [vmem:[#allocation45_spill] sm:$0xff] %v10828_v55 }
 0x311   : > { %v10822_v2 = vadd.f32 %v2312_v52, %v2001_v4 }
 0x316   : > { %7631 = vperm.xlu1 %8318, %v5094_v26   ;;  %v1743_v26 = vmax.f32 %v1230_v50, %v1487_v24  ;;  %v10831_v50 = vsub.s32 %v7848_v51, %v12383_v41 }
 0x318   : > { %7652 = vperm.xlu0 %8317, %v5437_v15   ;;  %v2020_v15 = vmul.f32 %v8640_v53, %v1742_v59  ;;  %v2021_v3 = vmul.f32 %v8643_v54, %v1743_v26  ;;  %12454 = vst [vmem:[#allocation46_spill] sm:$0xff] %v10831_v50  ;;  %v7852_v18 = vrot.slane %v7623_v33, %v10831_v50 }
 0x319   : > { %v2869_v59 = vrot.slane %v12455_v49, %v12388_v62  ;;  %v2877_v26 = vrot.slane %v12455_v49, %v9942_v12  ;;  %v5144_v33 = vcombine.low %v2861_v25, %v2865_v63 }
 0x31a   : > { %v2337_v31 = vadd.f32 %v2336_v7, %v2020_v15  ;;  %v12456_v15 = vld [vmem:[#allocation13_spill] sm:$0xff] }
 0x31b   : > { %v3089_v7 = vrot.slane %v12456_v15, %v12386_v0  ;;  %v3093_v4 = vrot.slane %v12456_v15, %v12388_v62  ;;  %v3097_v6 = vrot.slane %v12456_v15, %v12389_v32  ;;  %v3105_v52 = vrot.slane %v12456_v15, %v9945_v5 }
 0x31c   : > { %v10820_v42 = vadd.f32 %v2337_v31, %v2021_v3  ;;  %v3085_v3 = vrot.slane %v12456_v15, %v12385_v23  ;;  %v3101_v31 = vrot.slane %v12456_v15, %v9942_v12  ;;  %v3109_v9 = vrot.slane %v12456_v15, %v9951_v34 }
 0x31d   : > { %v3113_v51 = vrot.slane %v12456_v15, %v9955_v38 }
 0x31e   : > { %v5489_v50 = vcombine.low %v3101_v31, %v3105_v52 }
 0x320   : > { %v5511_v63 = vrot.slane %v5489_v50, %v9991_v22  ;;  %v861_v50 = vadd.f32 %v10694_v11, %v8624_v39 }
 0x328   : > { %v10825_v17 = vpop.xlane.xlu1 %2264 }
 0x329   : > { %12452 = vst [vmem:[#allocation44_spill] sm:$0xff] %v10825_v17  ;;  %v5154_v17 = vrot.slane %v5144_v33, %v9991_v22 }
 0x32c   : > { %v7620_v21 = vpop.permute.xlu1 %7619 }
 0x32d   : > { %v7845_v30 = vrot.slane %v7620_v21, %v10828_v55  ;;  %v5145_v21 = vcombine.low %v2869_v59, %v2873_v1  ;;  %v5490_v55 = vcombine.low %v3109_v9, %v3113_v51 }
 0x32f   : > { %v7847_v29 = vsel %vm7846_vm8, %v7845_v30, %v10729_v56  ;;  %v2881_v56 = vrot.slane %v12455_v49, %v9945_v5  ;;  %v5487_v49 = vcombine.low %v3085_v3, %v3089_v7  ;;  %v5161_v27 = vrot.slane %v5145_v21, %v9991_v22 }
 0x330   : > { %v10838_v24 = vsel %vm7853_vm9, %v7852_v18, %v7847_v29  ;;  %v5147_v18 = vcombine.low %v2885_v57, %v2889_v60  ;;  %v12457_v29 = vld [vmem:[#allocation39_spill] sm:$0xff]  ;;  %v5518_v59 = vrot.slane %v5490_v55, %v9991_v22  ;;  %v1214_v55 = vadd.f32 %v10696_v48, %v8627_v40 }
 0x331   : > { %v5146_v30 = vcombine.low %v2877_v26, %v2881_v56  ;;  %v5497_v15 = vrot.slane %v5487_v49, %v9991_v22  ;;  %v5176_v1 = vcombine.low %v5154_v17, %v5161_v27  ;;  %v1473_v17 = vmul.f32 0.01, %v861_v50 }
 0x332   : > { %v5175_v35 = vrot.slane %v5147_v18, %v9991_v22  ;;  %v5520_v57 = vcombine.low %v5511_v63, %v5518_v59  ;;  %v1475_v33 = vmul.f32 0.01, %v1214_v55  ;;  %v7855_v48 = vadd.s32 4294967216, %v10362_v61 }
 0x333   : > { %v5168_v45 = vrot.slane %v5146_v30, %v9991_v22  ;;  %v5184_v60 = vrot.slane %v5176_v1, %v9991_v22  ;;  %v1729_v51 = vmax.f32 %v861_v50, %v1473_v17 }
 0x334   : > { %v1731_v30 = vmax.f32 %v1214_v55, %v1475_v33  ;;  %v10907_v59 = vsub.s32 %v7855_v48, %v12383_v41  ;;  %v12464_v55 = vld [vmem:[#allocation3_spill] sm:$0xff] }
 0x335   : > { %v5177_v26 = vcombine.low %v5168_v45, %v5175_v35  ;;  %v1212_v45 = vadd.f32 %v10692_v46, %v8618_v37  ;;  %v2007_v11 = vmul.f32 %v8635_v47, %v1729_v51  ;;  %v3157_v51 = vrot.slane %v12464_v55, %v12388_v62 }
 0x336   : > { %v2009_v18 = vmul.f32 %v8643_v54, %v1731_v30  ;;  %12461 = vst [vmem:[#allocation47_spill] sm:$0xff] %v10907_v59  ;;  %v3161_v33 = vrot.slane %v12464_v55, %v12389_v32  ;;  %v3177_v30 = vrot.slane %v12464_v55, %v9955_v38 }
 0x337   : > { %2319 = vadd.xlane.f32.xlu0 %v10707_v20  ;;  %v5488_v20 = vcombine.low %v3093_v4, %v3097_v6  ;;  %v5191_v3 = vrot.slane %v5177_v26, %v9991_v22  ;;  %v5534_v4 = vrot.slane %v5520_v57, %v9991_v22  ;;  %v859_v6 = vadd.f32 %v10690_v16, %v8615_v36 }
 0x338   : > { %v1474_v52 = vmul.f32 0.01, %v1212_v45 }
 0x339   : > { %v5504_v25 = vrot.slane %v5488_v20, %v9991_v22  ;;  %v5192_v31 = vcombine.low %v5184_v60, %v5191_v3  ;;  %v1472_v27 = vmul.f32 0.01, %v859_v6  ;;  %v10898_v20 = vpop.xlane.xlu0 %2269 }
 0x33a   : > { %2294 = vadd.xlane.f32.xlu1 %v12457_v29  ;;  %v1730_v16 = vmax.f32 %v1212_v45, %v1474_v52  ;;  %12458 = vst [vmem:[#allocation6_spill] sm:$0xff] %v10898_v20  ;;  %v3149_v52 = vrot.slane %v12464_v55, %v12385_v23 }
 0x33b   : > { %v5519_v56 = vcombine.low %v5497_v15, %v5504_v25  ;;  %v1728_v9 = vmax.f32 %v859_v6, %v1472_v27  ;;  %v7862_v15 = vadd.s32 4294967208, %v10362_v61 }
 0x33c   : > { %v2008_v46 = vmul.f32 %v8640_v53, %v1730_v16  ;;  %v3165_v16 = vrot.slane %v12464_v55, %v9942_v12 }
 0x33d   : > { %v5527_v7 = vrot.slane %v5519_v56, %v9991_v22  ;;  %v2006_v21 = vmul.f32 %v8631_v44, %v1728_v9  ;;  %v10910_v1 = vsub.s32 %v7862_v15, %v12383_v41  ;;  %v7629_v26 = vpop.permute.xlu0 %7628  ;;  %v3153_v9 = vrot.slane %v12464_v55, %v12386_v0 }
 0x33f   : > { %v5535_v35 = vcombine.low %v5527_v7, %v5534_v4  ;;  %v2321_v29 = vadd.f32 %v2007_v11, %v2006_v21  ;;  %12462 = vst [vmem:[#allocation48_spill] sm:$0xff] %v10910_v1  ;;  %v7866_v60 = vrot.slane %v7629_v26, %v10910_v1  ;;  %v12463_v4 = vld [vmem:[#allocation11_spill] sm:$0xff]  ;;  %v3169_v21 = vrot.slane %v12464_v55, %v9945_v5 }
 0x340   : > { %v2925_v6 = vrot.slane %v12463_v4, %v12385_v23  ;;  %v2929_v50 = vrot.slane %v12463_v4, %v12386_v0  ;;  %v2937_v45 = vrot.slane %v12463_v4, %v12389_v32  ;;  %v2949_v27 = vrot.slane %v12463_v4, %v9951_v34 }
 0x341   : > { %v2322_v49 = vadd.f32 %v2321_v29, %v2008_v46  ;;  %v2953_v17 = vrot.slane %v12463_v4, %v9955_v38  ;;  %v3173_v11 = vrot.slane %v12464_v55, %v9951_v34  ;;  %v5585_v48 = vcombine.low %v3149_v52, %v3153_v9 }
 0x342   : > { %v5242_v46 = vcombine.low %v2925_v6, %v2929_v50  ;;  %v5587_v15 = vcombine.low %v3165_v16, %v3169_v21  ;;  %v869_v55 = vadd.f32 %v10770_v58, %v8615_v36  ;;  %v871_v52 = vadd.f32 %v10772_v13, %v8624_v39 }
 0x343   : > { %v10902_v25 = vadd.f32 %v2322_v49, %v2009_v18  ;;  %v5245_v49 = vcombine.low %v2949_v27, %v2953_v17  ;;  %v5588_v26 = vcombine.low %v3173_v11, %v3177_v30  ;;  %v1224_v30 = vadd.f32 %v10795_v43, %v8627_v40 }
 0x344   : > { %v5609_v50 = vrot.slane %v5587_v15, %v9991_v22  ;;  %v1480_v21 = vmul.f32 0.01, %v869_v55  ;;  %v1481_v11 = vmul.f32 0.01, %v871_v52 }
 0x345   : > { %12459 = vst [vmem:[#allocation13_spill] sm:$0xff] %v10902_v25  ;;  %v1483_v13 = vmul.f32 0.01, %v1224_v30 }
 0x346   : > { %v1736_v58 = vmax.f32 %v869_v55, %v1480_v21 }
 0x34b   : > { %7637 = vperm.xlu1 %8318, %v5192_v31   ;;  %v2933_v31 = vrot.slane %v12463_v4, %v12388_v62 }
 0x34d   : > { %7658 = vperm.xlu0 %8317, %v5535_v35   ;;  %v2941_v35 = vrot.slane %v12463_v4, %v9942_v12  ;;  %v5243_v18 = vcombine.low %v2933_v31, %v2937_v45 }
 0x35d   : > { %v10904_v63 = vpop.xlane.xlu1 %2274 }
 0x35e   : > { %12460 = vst [vmem:[#allocation39_spill] sm:$0xff] %v10904_v63 }
 0x361   : > { %v7626_v56 = vpop.permute.xlu1 %7625 }
 0x362   : > { %v7859_v57 = vrot.slane %v7626_v56, %v10907_v59  ;;  %v5252_v56 = vrot.slane %v5242_v46, %v9991_v22 }
 0x364   : > { %v7861_v3 = vsel %vm7860_vm10, %v7859_v57, %v10838_v24  ;;  %v2945_v24 = vrot.slane %v12463_v4, %v9945_v5  ;;  %v5259_v57 = vrot.slane %v5243_v18, %v9991_v22  ;;  %v5595_v4 = vrot.slane %v5585_v48, %v9991_v22 }
 0x365   : > { %v10917_v7 = vsel %vm7867_vm11, %v7866_v60, %v7861_v3  ;;  %v5273_v3 = vrot.slane %v5245_v49, %v9991_v22  ;;  %v12465_v49 = vld [vmem:[#allocation9_spill] sm:$0xff] }
 0x366   : > { %v5244_v29 = vcombine.low %v2941_v35, %v2945_v24  ;;  %v5274_v31 = vcombine.low %v5252_v56, %v5259_v57  ;;  %v2989_v48 = vrot.slane %v12465_v49, %v12385_v23  ;;  %v2997_v15 = vrot.slane %v12465_v49, %v12388_v62 }
 0x367   : > { %v3001_v43 = vrot.slane %v12465_v49, %v12389_v32  ;;  %v3009_v56 = vrot.slane %v12465_v49, %v9945_v5  ;;  %v3013_v57 = vrot.slane %v12465_v49, %v9951_v34 }
 0x368   : > { %v5266_v60 = vrot.slane %v5244_v29, %v9991_v22  ;;  %v5282_v27 = vrot.slane %v5274_v31, %v9991_v22  ;;  %v1737_v29 = vmax.f32 %v871_v52, %v1481_v11 }
 0x36a   : > { %v5275_v45 = vcombine.low %v5266_v60, %v5273_v3  ;;  %v3017_v60 = vrot.slane %v12465_v49, %v9955_v38  ;;  %v2014_v3 = vmul.f32 %v8631_v44, %v1736_v58 }
 0x36c   : > { %2329 = vadd.xlane.f32.xlu0 %v10768_v10  ;;  %v5586_v10 = vcombine.low %v3157_v51, %v3161_v33  ;;  %v5289_v17 = vrot.slane %v5275_v45, %v9991_v22  ;;  %v1222_v33 = vadd.f32 %v10791_v28, %v8618_v37  ;;  %v2993_v28 = vrot.slane %v12465_v49, %v12386_v0 }
 0x36e   : > { %v5602_v6 = vrot.slane %v5586_v10, %v9991_v22  ;;  %v5290_v16 = vcombine.low %v5282_v27, %v5289_v17  ;;  %v1482_v18 = vmul.f32 0.01, %v1222_v33  ;;  %v5340_v58 = vcombine.low %v2989_v48, %v2993_v28  ;;  %v11027_v48 = vpop.xlane.xlu0 %2279 }
 0x36f   : > { %2304 = vadd.xlane.f32.xlu1 %v10715_v14  ;;  %v5616_v14 = vrot.slane %v5588_v26, %v9991_v22  ;;  %v3005_v26 = vrot.slane %v12465_v49, %v9942_v12  ;;  %v5341_v49 = vcombine.low %v2997_v15, %v3001_v43  ;;  %12469 = vst [vmem:[#allocation3_spill] sm:$0xff] %v11027_v48  ;;  %v7869_v28 = vadd.s32 4294967200, %v10362_v61 }
 0x370   : > { %v5617_v35 = vcombine.low %v5595_v4, %v5602_v6  ;;  %v1738_v10 = vmax.f32 %v1222_v33, %v1482_v18  ;;  %v2015_v4 = vmul.f32 %v8635_v47, %v1737_v29  ;;  %v1739_v6 = vmax.f32 %v1224_v30, %v1483_v13 }
 0x371   : > { %v5618_v24 = vcombine.low %v5609_v50, %v5616_v14  ;;  %v12466_v50 = vld [vmem:[#allocation10_spill] sm:$0xff]  ;;  %v7876_v15 = vadd.s32 4294967192, %v10362_v61  ;;  %v5357_v43 = vrot.slane %v5341_v49, %v9991_v22 }
 0x372   : > { %v5625_v9 = vrot.slane %v5617_v35, %v9991_v22  ;;  %v3213_v14 = vrot.slane %v12466_v50, %v12385_v23  ;;  %v3217_v31 = vrot.slane %v12466_v50, %v12386_v0  ;;  %v3221_v45 = vrot.slane %v12466_v50, %v12388_v62 }
 0x373   : > { %v5632_v51 = vrot.slane %v5618_v24, %v9991_v22  ;;  %v3225_v35 = vrot.slane %v12466_v50, %v12389_v32  ;;  %v3229_v24 = vrot.slane %v12466_v50, %v9942_v12  ;;  %v2016_v27 = vmul.f32 %v8640_v53, %v1738_v10 }
 0x374   : > { %v3233_v17 = vrot.slane %v12466_v50, %v9945_v5  ;;  %v3237_v55 = vrot.slane %v12466_v50, %v9951_v34  ;;  %v3241_v52 = vrot.slane %v12466_v50, %v9955_v38  ;;  %v2331_v18 = vadd.f32 %v2015_v4, %v2014_v3 }
 0x375   : > { %v5633_v46 = vcombine.low %v5625_v9, %v5632_v51  ;;  %v12467_v9 = vld [vmem:[#allocation15_spill] sm:$0xff]  ;;  %v5342_v10 = vcombine.low %v3005_v26, %v3009_v56  ;;  %v5343_v50 = vcombine.low %v3013_v57, %v3017_v60  ;;  %v5683_v59 = vcombine.low %v3213_v14, %v3217_v31 }
 0x376   : > { %v3277_v51 = vrot.slane %v12467_v9, %v12385_v23  ;;  %v3281_v33 = vrot.slane %v12467_v9, %v12386_v0  ;;  %v3289_v21 = vrot.slane %v12467_v9, %v12389_v32  ;;  %v3293_v11 = vrot.slane %v12467_v9, %v9942_v12 }
 0x377   : > { %v3297_v30 = vrot.slane %v12467_v9, %v9945_v5  ;;  %v3301_v29 = vrot.slane %v12467_v9, %v9951_v34  ;;  %v3305_v13 = vrot.slane %v12467_v9, %v9955_v38  ;;  %v2332_v1 = vadd.f32 %v2331_v18, %v2016_v27  ;;  %v12471_v27 = vld [vmem:[#allocation18_spill] sm:$0xff] }
 0x378   : > { %v5684_v20 = vcombine.low %v3221_v45, %v3225_v35  ;;  %v5685_v8 = vcombine.low %v3229_v24, %v3233_v17  ;;  %v5686_v19 = vcombine.low %v3237_v55, %v3241_v52  ;;  %v5781_v25 = vcombine.low %v3277_v51, %v3281_v33  ;;  %v7635_v52 = vpop.permute.xlu0 %7634 }
 0x379   : > { %v5783_v63 = vcombine.low %v3293_v11, %v3297_v30  ;;  %v5350_v3 = vrot.slane %v5340_v58, %v9991_v22  ;;  %v5784_v4 = vcombine.low %v3301_v29, %v3305_v13  ;;  %v5364_v26 = vrot.slane %v5342_v10, %v9991_v22 }
 0x37a   : > { %v5371_v56 = vrot.slane %v5343_v50, %v9991_v22  ;;  %v5693_v57 = vrot.slane %v5683_v59, %v9991_v22  ;;  %v5707_v60 = vrot.slane %v5685_v8, %v9991_v22  ;;  %v5714_v14 = vrot.slane %v5686_v19, %v9991_v22 }
 0x37b   : > { %v5791_v45 = vrot.slane %v5781_v25, %v9991_v22  ;;  %v5805_v24 = vrot.slane %v5783_v63, %v9991_v22  ;;  %v3341_v17 = vrot.slane %v12471_v27, %v12385_v23  ;;  %v11047_v55 = vsub.s32 %v7869_v28, %v12383_v41 }
 0x37c   : > { %v3345_v8 = vrot.slane %v12471_v27, %v12386_v0  ;;  %v3349_v19 = vrot.slane %v12471_v27, %v12388_v62  ;;  %v11055_v25 = vsub.s32 %v7876_v15, %v12383_v41  ;;  %v3357_v63 = vrot.slane %v12471_v27, %v9942_v12 }
 0x37d   : > { %12472 = vst [vmem:[#allocation10_spill] sm:$0xff] %v11047_v55  ;;  %v3361_v59 = vrot.slane %v12471_v27, %v9945_v5  ;;  %v3365_v51 = vrot.slane %v12471_v27, %v9951_v34  ;;  %v3369_v33 = vrot.slane %v12471_v27, %v9955_v38  ;;  %v5716_v30 = vcombine.low %v5707_v60, %v5714_v14  ;;  %v12475_v14 = vld [vmem:[#allocation19_spill] sm:$0xff] }
 0x37e   : > { %12473 = vst [vmem:[#allocation15_spill] sm:$0xff] %v11055_v25  ;;  %v7880_v29 = vrot.slane %v7635_v52, %v11055_v25  ;;  %v5879_v13 = vcombine.low %v3341_v17, %v3345_v8  ;;  %v3417_v17 = vrot.slane %v12475_v14, %v12389_v32  ;;  %v3425_v8 = vrot.slane %v12475_v14, %v9945_v5 }
 0x37f   : > { %v5881_v10 = vcombine.low %v3357_v63, %v3361_v59  ;;  %v5882_v28 = vcombine.low %v3365_v51, %v3369_v33  ;;  %v12476_v63 = vld [vmem:[#allocation22_spill] sm:$0xff]  ;;  %v11108_v33 = vpop.f32.mrb[126].mxu0 }
 0x380   : > { %7643 = vperm.xlu1 %8318, %v5290_v16   ;;  %v3285_v16 = vrot.slane %v12467_v9, %v12388_v62  ;;  %v5372_v9 = vcombine.low %v5350_v3, %v5357_v43  ;;  %v3469_v59 = vrot.slane %v12476_v63, %v12385_v23  ;;  %v3473_v52 = vrot.slane %v12476_v63, %v12386_v0 }
 0x381   : > { %v5903_v60 = vrot.slane %v5881_v10, %v9991_v22  ;;  %v3481_v51 = vrot.slane %v12476_v63, %v12389_v32 }
 0x382   : > { %7664 = vperm.xlu0 %8317, %v5633_v46   ;;  %v2017_v46 = vmul.f32 %v8643_v54, %v1739_v6  ;;  %v5782_v53 = vcombine.low %v3285_v16, %v3289_v21  ;;  %v5373_v21 = vcombine.low %v5364_v26, %v5371_v56  ;;  %v5380_v3 = vrot.slane %v5372_v9, %v9991_v22 }
 0x383   : > { %v5730_v26 = vrot.slane %v5716_v30, %v9991_v22  ;;  %v3477_v9 = vrot.slane %v12476_v63, %v12388_v62  ;;  %v3493_v30 = vrot.slane %v12476_v63, %v9951_v34 }
 0x384   : > { %v11025_v6 = vadd.f32 %v2332_v1, %v2017_v46  ;;  %v5700_v1 = vrot.slane %v5684_v20, %v9991_v22  ;;  %v5798_v35 = vrot.slane %v5782_v53, %v9991_v22  ;;  %v5812_v20 = vrot.slane %v5784_v4, %v9991_v22 }
 0x385   : > { %v3353_v53 = vrot.slane %v12471_v27, %v12389_v32  ;;  %v5387_v4 = vrot.slane %v5373_v21, %v9991_v22  ;;  %v3413_v27 = vrot.slane %v12475_v14, %v12388_v62  ;;  %v3485_v21 = vrot.slane %v12476_v63, %v9942_v12 }
 0x386   : > { %12468 = vst [vmem:[#allocation11_spill] sm:$0xff] %v11025_v6  ;;  %v5715_v11 = vcombine.low %v5693_v57, %v5700_v1  ;;  %v5813_v18 = vcombine.low %v5791_v45, %v5798_v35  ;;  %v5814_v58 = vcombine.low %v5805_v24, %v5812_v20  ;;  %v5889_v1 = vrot.slane %v5879_v13, %v9991_v22 }
 0x387   : > { %v5880_v49 = vcombine.low %v3349_v19, %v3353_v53  ;;  %v3405_v45 = vrot.slane %v12475_v14, %v12385_v23  ;;  %v5910_v35 = vrot.slane %v5882_v28, %v9991_v22  ;;  %v3409_v24 = vrot.slane %v12475_v14, %v12386_v0 }
 0x388   : > { %v5723_v43 = vrot.slane %v5715_v11, %v9991_v22  ;;  %v5821_v56 = vrot.slane %v5813_v18, %v9991_v22  ;;  %v5828_v57 = vrot.slane %v5814_v58, %v9991_v22  ;;  %v3421_v20 = vrot.slane %v12475_v14, %v9942_v12  ;;  %v11120_v18 = vpop.f32.mrb[127].mxu0 }
 0x389   : > { %v3429_v19 = vrot.slane %v12475_v14, %v9951_v34  ;;  %v3433_v53 = vrot.slane %v12475_v14, %v9955_v38  ;;  %v3489_v11 = vrot.slane %v12476_v63, %v9945_v5  ;;  %v5977_v28 = vcombine.low %v3405_v45, %v3409_v24 }
 0x38a   : > { %v11127_v13 = vcombine.low %v5723_v43, %v5730_v26  ;;  %v5978_v14 = vcombine.low %v3413_v27, %v3417_v17  ;;  %v5979_v25 = vcombine.low %v3421_v20, %v3425_v8  ;;  %v6076_v48 = vcombine.low %v3477_v9, %v3481_v51 }
 0x38b   : > { %v6077_v6 = vcombine.low %v3485_v21, %v3489_v11 }
 0x392   : > { %v11039_v31 = vpop.xlane.xlu1 %2284 }
 0x393   : > { %12470 = vst [vmem:[#allocation9_spill] sm:$0xff] %v11039_v31 }
 0x396   : > { %v7632_v16 = vpop.permute.xlu1 %7631 }
 0x397   : > { %v7873_v46 = vrot.slane %v7632_v16, %v11047_v55  ;;  %v11110_v16 = vpop.f32.mrb[126].mxu1  ;;  %v6075_v55 = vcombine.low %v3469_v59, %v3473_v52  ;;  %v5994_v59 = vrot.slane %v5978_v14, %v9991_v22  ;;  %v6001_v52 = vrot.slane %v5979_v25, %v9991_v22  ;;  %v12479_v25 = vld [vmem:[#allocation28_spill] sm:$0xff] }
 0x398   : > { %v11122_v58 = vpop.f32.mrb[127].mxu1  ;;  %v3661_v41 = vrot.slane %v12479_v25, %v12385_v23 }
 0x399   : > { %v7875_v50 = vsel %vm7874_vm12, %v7873_v46, %v10917_v7  ;;  %v5896_v7 = vrot.slane %v5880_v49, %v9991_v22  ;;  %v3497_v46 = vrot.slane %v12476_v63, %v9955_v38  ;;  %v11129_v49 = vcombine.low %v5821_v56, %v5828_v57 }
 0x39a   : > { %v11074_v15 = vsel %vm7881_vm13, %v7880_v29, %v7875_v50  ;;  %v11125_v29 = vcombine.low %v5380_v3, %v5387_v4  ;;  %v11133_v50 = vcombine.low %v5903_v60, %v5910_v35  ;;  %v5980_v63 = vcombine.low %v3429_v19, %v3433_v53  ;;  %v12477_v3 = vld [vmem:[#allocation24_spill] sm:$0xff]  ;;  %v12478_v60 = vld [vmem:[#allocation26_spill] sm:$0xff] }
 0x39b   : > { %12474 = vst [vmem:[#allocation18_spill] sm:$0xff] %v11074_v15  ;;  %v11131_v10 = vcombine.low %v5889_v1, %v5896_v7  ;;  %v3533_v4 = vrot.slane %v12477_v3, %v12385_v23  ;;  %v3537_v43 = vrot.slane %v12477_v3, %v12386_v0  ;;  %v3541_v26 = vrot.slane %v12477_v3, %v12388_v62 }
 0x39c   : > { %v3545_v56 = vrot.slane %v12477_v3, %v12389_v32  ;;  %v3549_v57 = vrot.slane %v12477_v3, %v9942_v12  ;;  %v3557_v1 = vrot.slane %v12477_v3, %v9951_v34  ;;  %v3561_v7 = vrot.slane %v12477_v3, %v9955_v38 }
 0x39d   : > { %v3597_v45 = vrot.slane %v12478_v60, %v12385_v23  ;;  %v3601_v35 = vrot.slane %v12478_v60, %v12386_v0  ;;  %v3605_v24 = vrot.slane %v12478_v60, %v12388_v62  ;;  %v3609_v27 = vrot.slane %v12478_v60, %v12389_v32 }
 0x39e   : > { %v3613_v17 = vrot.slane %v12478_v60, %v9942_v12  ;;  %v3617_v20 = vrot.slane %v12478_v60, %v9945_v5  ;;  %v3621_v8 = vrot.slane %v12478_v60, %v9951_v34  ;;  %v3625_v19 = vrot.slane %v12478_v60, %v9955_v38 }
 0x39f   : > { %v5987_v53 = vrot.slane %v5977_v28, %v9991_v22  ;;  %v6008_v9 = vrot.slane %v5980_v63, %v9991_v22  ;;  %v6173_v51 = vcombine.low %v3533_v4, %v3537_v43  ;;  %v6174_v21 = vcombine.low %v3541_v26, %v3545_v56 }
 0x3a0   : > { %v6271_v15 = vcombine.low %v3597_v45, %v3601_v35  ;;  %v6272_v54 = vcombine.low %v3605_v24, %v3609_v27  ;;  %v6099_v60 = vrot.slane %v6077_v6, %v9991_v22  ;;  %v6273_v31 = vcombine.low %v3613_v17, %v3617_v20 }
 0x3a1   : > { %2339 = vadd.xlane.f32.xlu0 %v10820_v42  ;;  %v6078_v42 = vcombine.low %v3493_v30, %v3497_v46  ;;  %v6176_v30 = vcombine.low %v3557_v1, %v3561_v7  ;;  %v6085_v46 = vrot.slane %v6075_v55, %v9991_v22  ;;  %v6274_v14 = vcombine.low %v3621_v8, %v3625_v19 }
 0x3a2   : > { %v3665_v63 = vrot.slane %v12479_v25, %v12386_v0  ;;  %v3669_v4 = vrot.slane %v12479_v25, %v12388_v62  ;;  %v6183_v55 = vrot.slane %v6173_v51, %v9991_v22  ;;  %v6190_v6 = vrot.slane %v6174_v21, %v9991_v22 }
 0x3a3   : > { %v6106_v28 = vrot.slane %v6078_v42, %v9991_v22  ;;  %v6204_v43 = vrot.slane %v6176_v30, %v9991_v22  ;;  %v6009_v26 = vcombine.low %v5987_v53, %v5994_v59  ;;  %v6010_v56 = vcombine.low %v6001_v52, %v6008_v9 }
 0x3a4   : > { %2314 = vadd.xlane.f32.xlu1 %v10822_v2  ;;  %v3553_v2 = vrot.slane %v12477_v3, %v9945_v5  ;;  %v6092_v3 = vrot.slane %v6076_v48, %v9991_v22  ;;  %v3673_v48 = vrot.slane %v12479_v25, %v12389_v32  ;;  %v6295_v1 = vrot.slane %v6273_v31, %v9991_v22 }
 0x3a5   : > { %v6302_v7 = vrot.slane %v6274_v14, %v9991_v22  ;;  %v3677_v45 = vrot.slane %v12479_v25, %v9942_v12  ;;  %v3681_v35 = vrot.slane %v12479_v25, %v9945_v5  ;;  %v3685_v24 = vrot.slane %v12479_v25, %v9951_v34 }
 0x3a6   : > { %v6175_v11 = vcombine.low %v3549_v57, %v3553_v2  ;;  %v6281_v57 = vrot.slane %v6271_v15, %v9991_v22  ;;  %v6288_v2 = vrot.slane %v6272_v54, %v9991_v22  ;;  %v3689_v27 = vrot.slane %v12479_v25, %v9955_v38  ;;  %v12480_v25 = vld [vmem:[#allocation33_spill] sm:$0xff] }
 0x3a7   : > { %v6369_v17 = vcombine.low %v3661_v41, %v3665_v63  ;;  %v6370_v15 = vcombine.low %v3669_v4, %v3673_v48  ;;  %v6107_v20 = vcombine.low %v6085_v46, %v6092_v3  ;;  %v6108_v54 = vcombine.low %v6099_v60, %v6106_v28 }
 0x3a8   : > { %v6197_v42 = vrot.slane %v6175_v11, %v9991_v22  ;;  %v6205_v8 = vcombine.low %v6183_v55, %v6190_v6  ;;  %v5919_v19 = vrot.slane %v11131_v10, %v9991_v22  ;;  %v6303_v53 = vcombine.low %v6281_v57, %v6288_v2 }
 0x3a9   : > { %v879_v59 = vadd.f32 %v11108_v33, %v8615_v36  ;;  %v881_v52 = vadd.f32 %v11120_v18, %v8624_v39  ;;  %v5926_v9 = vrot.slane %v11133_v50, %v9991_v22  ;;  %v6017_v41 = vrot.slane %v6009_v26, %v9991_v22 }
 0x3aa   : > { %v6206_v31 = vcombine.low %v6197_v42, %v6204_v43  ;;  %v6304_v51 = vcombine.low %v6295_v1, %v6302_v7  ;;  %v6371_v21 = vcombine.low %v3677_v45, %v3681_v35  ;;  %v6024_v11 = vrot.slane %v6010_v56, %v9991_v22 }
 0x3ab   : > { %v6372_v30 = vcombine.low %v3685_v24, %v3689_v27  ;;  %v6379_v10 = vrot.slane %v6369_v17, %v9991_v22  ;;  %v6386_v46 = vrot.slane %v6370_v15, %v9991_v22  ;;  %v6115_v36 = vrot.slane %v6107_v20, %v9991_v22 }
 0x3ac   : > { %v6122_v39 = vrot.slane %v6108_v54, %v9991_v22  ;;  %v6213_v33 = vrot.slane %v6205_v8, %v9991_v22  ;;  %v6220_v18 = vrot.slane %v6206_v31, %v9991_v22  ;;  %v6311_v50 = vrot.slane %v6303_v53, %v9991_v22 }
 0x3ad   : > { %v1489_v3 = vmul.f32 0.01, %v881_v52  ;;  %v1232_v60 = vadd.f32 %v11110_v16, %v8618_v37  ;;  %v6318_v28 = vrot.slane %v6304_v51, %v9991_v22  ;;  %v6393_v14 = vrot.slane %v6371_v21, %v9991_v22 }
 0x3ae   : > { %v3725_v63 = vrot.slane %v12480_v25, %v12385_v23  ;;  %v3729_v4 = vrot.slane %v12480_v25, %v12386_v0  ;;  %v6400_v48 = vrot.slane %v6372_v30, %v9991_v22  ;;  %v3733_v55 = vrot.slane %v12480_v25, %v12388_v62 }
 0x3af   : > { %v3737_v37 = vrot.slane %v12480_v25, %v12389_v32  ;;  %v3741_v16 = vrot.slane %v12480_v25, %v9942_v12  ;;  %v3745_v6 = vrot.slane %v12480_v25, %v9945_v5  ;;  %v3749_v42 = vrot.slane %v12480_v25, %v9951_v34 }
 0x3b0   : > { %v3753_v43 = vrot.slane %v12480_v25, %v9955_v38  ;;  %v5927_v26 = vcombine.low %v5919_v19, %v5926_v9  ;;  %v1745_v57 = vmax.f32 %v881_v52, %v1489_v3  ;;  %v1490_v2 = vmul.f32 0.01, %v1232_v60  ;;  %v11255_v19 = vpop.xlane.xlu0 %2289 }
 0x3b1   : > { %v6025_v1 = vcombine.low %v6017_v41, %v6024_v11  ;;  %v6123_v7 = vcombine.low %v6115_v36, %v6122_v39  ;;  %v11243_v45 = vcombine.low %v6213_v33, %v6220_v18  ;;  %v11245_v35 = vcombine.low %v6311_v50, %v6318_v28  ;;  %v12482_v41 = vld [vmem:[#allocation39_spill] sm:$0xff] }
 0x3b2   : > { %v11247_v24 = vcombine.low %v6393_v14, %v6400_v48  ;;  %v6467_v17 = vcombine.low %v3725_v63, %v3729_v4  ;;  %v6468_v15 = vcombine.low %v3733_v55, %v3737_v37  ;;  %v6469_v20 = vcombine.low %v3741_v16, %v3745_v6  ;;  %v12483_v50 = vld [vmem:[#allocation7_spill] sm:$0xff]  ;;  %v12486_v37 = vld [vmem:[#allocation9_spill] sm:$0xff] }
 0x3b3   : > { %v6470_v54 = vcombine.low %v3749_v42, %v3753_v43  ;;  %v1234_v31 = vadd.f32 %v11122_v58, %v8627_v40  ;;  %v7890_v53 = vadd.s32 4294967176, %v10362_v61  ;;  %v2023_v52 = vmul.f32 %v8635_v47, %v1745_v57 }
 0x3b4   : > { %v1746_v9 = vmax.f32 %v1232_v60, %v1490_v2  ;;  %v3981_v51 = vrot.slane %v12482_v41, %v12385_v23  ;;  %v3985_v21 = vrot.slane %v12482_v41, %v12386_v0  ;;  %v3989_v11 = vrot.slane %v12482_v41, %v12388_v62  ;;  %v12484_v60 = vld [vmem:[#allocation2_spill] sm:$0xff]  ;;  %v7641_v4 = vpop.permute.xlu0 %7640 }
 0x3b5   : > { %7649 = vperm.xlu1 %8318, %v11125_v29   ;;  %v1488_v29 = vmul.f32 0.01, %v879_v59  ;;  %v3993_v40 = vrot.slane %v12482_v41, %v12389_v32  ;;  %v3997_v58 = vrot.slane %v12482_v41, %v9942_v12  ;;  %v4005_v47 = vrot.slane %v12482_v41, %v9951_v34 }
 0x3b6   : > { %v4009_v30 = vrot.slane %v12482_v41, %v9955_v38  ;;  %v6484_v36 = vrot.slane %v6468_v15, %v9991_v22  ;;  %v1491_v39 = vmul.f32 0.01, %v1234_v31  ;;  %v6491_v33 = vrot.slane %v6469_v20, %v9991_v22 }
 0x3b7   : > { %7670 = vperm.xlu0 %8317, %v11127_v13   ;;  %v11228_v13 = vcombine.low %v6379_v10, %v6386_v46  ;;  %v1744_v56 = vmax.f32 %v879_v59, %v1488_v29  ;;  %v6416_v10 = vrot.slane %v11247_v24, %v9991_v22  ;;  %v6477_v46 = vrot.slane %v6467_v17, %v9991_v22 }
 0x3b8   : > { %v6498_v18 = vrot.slane %v6470_v54, %v9991_v22  ;;  %v2024_v29 = vmul.f32 %v12483_v50, %v1746_v9  ;;  %v11284_v28 = vsub.s32 %v7890_v53, %v12484_v60  ;;  %v7883_v14 = vadd.s32 4294967184, %v10362_v61  ;;  %v12487_v9 = vld [vmem:[#allocation8_spill] sm:$0xff] }
 0x3b9   : > { %v6409_v27 = vrot.slane %v11228_v13, %v9991_v22  ;;  %v2022_v59 = vmul.f32 %v8631_v44, %v1744_v56  ;;  %v4001_v44 = vrot.slane %v12482_v41, %v9945_v5  ;;  %v6859_v25 = vcombine.low %v3981_v51, %v3985_v21 }
 0x3ba   : > { %12485 = vst [vmem:[#allocation19_spill] sm:$0xff] %v11284_v28  ;;  %v6860_v63 = vcombine.low %v3989_v11, %v3993_v40  ;;  %v6862_v55 = vcombine.low %v4005_v47, %v4009_v30  ;;  %v4045_v16 = vrot.slane %v12486_v37, %v12385_v23  ;;  %v4049_v6 = vrot.slane %v12486_v37, %v12386_v0 }
 0x3bb   : > { %7676 = vperm.xlu0 %8317, %v11129_v49   ;;  %v12481_v49 = vld [vmem:[#allocation14_spill] sm:$0xff]  ;;  %v2341_v3 = vadd.f32 %v2023_v52, %v2022_v59  ;;  %v6861_v48 = vcombine.low %v3997_v58, %v4001_v44  ;;  %v4053_v42 = vrot.slane %v12486_v37, %v12388_v62  ;;  %v4057_v43 = vrot.slane %v12486_v37, %v12389_v32 }
 0x3bc   : > { %v3053_v8 = vrot.slane %v12481_v49, %v12385_v23  ;;  %v4061_v61 = vrot.slane %v12486_v37, %v9942_v12  ;;  %v4065_v57 = vrot.slane %v12486_v37, %v9945_v5  ;;  %v4069_v2 = vrot.slane %v12486_v37, %v9951_v34 }
 0x3bd   : > { %v2342_v24 = vadd.f32 %v2341_v3, %v2024_v29  ;;  %v7894_v17 = vrot.slane %v7641_v4, %v11284_v28  ;;  %v11305_v15 = vsub.s32 %v7883_v14, %v12484_v60  ;;  %v6499_v20 = vcombine.low %v6477_v46, %v6484_v36 }
 0x3be   : > { %v6500_v54 = vcombine.low %v6491_v33, %v6498_v18  ;;  %v6883_v53 = vrot.slane %v6861_v48, %v9991_v22  ;;  %v6890_v59 = vrot.slane %v6862_v55, %v9991_v22  ;;  %v6957_v52 = vcombine.low %v4045_v16, %v4049_v6  ;;  %v12488_v18 = vld [vmem:[#allocation18_spill] sm:$0xff] }
 0x3bf   : > { %7682 = vperm.xlu0 %8317, %v5927_v26   ;;  %v1747_v26 = vmax.f32 %v1234_v31, %v1491_v39  ;;  %v6876_v31 = vrot.slane %v6860_v63, %v9991_v22  ;;  %v6958_v21 = vcombine.low %v4053_v42, %v4057_v43  ;;  %v6959_v11 = vcombine.low %v4061_v61, %v4065_v57 }
 0x3c0   : > { %v6417_v29 = vcombine.low %v6409_v27, %v6416_v10  ;;  %v6507_v3 = vrot.slane %v6499_v20, %v9991_v22  ;;  %v6892_v4 = vcombine.low %v6883_v53, %v6890_v59  ;;  %v6967_v48 = vrot.slane %v6957_v52, %v9991_v22 }
 0x3c1   : > { %v2025_v41 = vmul.f32 %v12487_v9, %v1747_v26  ;;  %v6974_v55 = vrot.slane %v6958_v21, %v9991_v22  ;;  %v6981_v13 = vrot.slane %v6959_v11, %v9991_v22  ;;  %v3057_v42 = vrot.slane %v12481_v49, %v12386_v0  ;;  %v12490_v21 = vld [vmem:[#allocation13_spill] sm:$0xff] }
 0x3c2   : > { %v3065_v43 = vrot.slane %v12481_v49, %v12389_v32  ;;  %v3069_v61 = vrot.slane %v12481_v49, %v9942_v12  ;;  %v3077_v57 = vrot.slane %v12481_v49, %v9951_v34 }
 0x3c3   : > { %7688 = vperm.xlu0 %8317, %v6025_v1   ;;  %v4073_v1 = vrot.slane %v12486_v37, %v9955_v38  ;;  %v11328_v60 = vadd.f32 %v2342_v24, %v2025_v41  ;;  %v6906_v24 = vrot.slane %v6892_v4, %v9991_v22  ;;  %v5438_v59 = vcombine.low %v3053_v8, %v3057_v42  ;;  %v12491_v4 = vld [vmem:[#allocation5_spill] sm:$0xff] }
 0x3c5   : > { %v6960_v40 = vcombine.low %v4069_v2, %v4073_v1  ;;  %v3081_v2 = vrot.slane %v12481_v49, %v9955_v38 }
 0x3c7   : > { %v2295_v56 = vpop.xlane.xlu1 %2294  ;;  %7694 = vperm.xlu0 %8317, %v6123_v7   ;;  %v6869_v7 = vrot.slane %v6859_v25, %v9991_v22  ;;  %v6514_v25 = vrot.slane %v6500_v54, %v9991_v22  ;;  %v6988_v27 = vrot.slane %v6960_v40, %v9991_v22 }
 0x3c8   : > { %v4109_v58 = vrot.slane %v2295_v56, %v12385_v23  ;;  %v4113_v47 = vrot.slane %v2295_v56, %v12386_v0  ;;  %v4117_v30 = vrot.slane %v2295_v56, %v12388_v62  ;;  %v4121_v46 = vrot.slane %v2295_v56, %v12389_v32 }
 0x3c9   : > { %v4125_v36 = vrot.slane %v2295_v56, %v9942_v12  ;;  %v4129_v39 = vrot.slane %v2295_v56, %v9945_v5  ;;  %v4133_v33 = vrot.slane %v2295_v56, %v9951_v34  ;;  %v6891_v63 = vcombine.low %v6869_v7, %v6876_v31 }
 0x3ca   : > { %v7055_v10 = vcombine.low %v4109_v58, %v4113_v47  ;;  %v7056_v37 = vcombine.low %v4117_v30, %v4121_v46  ;;  %v6515_v26 = vcombine.low %v6507_v3, %v6514_v25  ;;  %v6990_v20 = vcombine.low %v6981_v13, %v6988_v27  ;;  %v11373_v25 = vpop.xlane.xlu0 %2299 }
 0x3cb   : > { %v7638_v51 = vpop.permute.xlu1 %7637  ;;  %7700 = vperm.xlu0 %8317, %v11243_v45   ;;  %v4137_v45 = vrot.slane %v2295_v56, %v9955_v38  ;;  %v7057_v16 = vcombine.low %v4125_v36, %v4129_v39  ;;  %v3073_v56 = vrot.slane %v12481_v49, %v9945_v5  ;;  %v6899_v1 = vrot.slane %v6891_v63, %v9991_v22 }
 0x3cc   : > { %v7887_v44 = vrot.slane %v7638_v51, %v11305_v15  ;;  %v7065_v54 = vrot.slane %v7055_v10, %v9991_v22  ;;  %v7072_v7 = vrot.slane %v7056_v37, %v9991_v22  ;;  %v5441_v51 = vcombine.low %v3077_v57, %v3081_v2 }
 0x3cd   : > { %v7058_v6 = vcombine.low %v4133_v33, %v4137_v45  ;;  %v7079_v31 = vrot.slane %v7057_v16, %v9991_v22  ;;  %v6907_v52 = vcombine.low %v6899_v1, %v6906_v24  ;;  %v5440_v41 = vcombine.low %v3069_v61, %v3073_v56 }
 0x3ce   : > { %v7889_v50 = vsel %vm7888_vm14, %v7887_v44, %v12488_v18  ;;  %v7004_v40 = vrot.slane %v6990_v20, %v9991_v22  ;;  %v7087_v58 = vcombine.low %v7065_v54, %v7072_v7  ;;  %v5448_v47 = vrot.slane %v5438_v59, %v9991_v22  ;;  %v7647_v42 = vpop.permute.xlu0 %7646  ;;  %v12493_v59 = vld [vmem:[#allocation31_spill] sm:$0xff] }
 0x3cf   : > { %v11331_v14 = vsel %vm7895_vm15, %v7894_v17, %v7889_v50  ;;  %7706 = vperm.xlu0 %8317, %v11245_v35   ;;  %v3061_v35 = vrot.slane %v12481_v49, %v12388_v62  ;;  %v6989_v17 = vcombine.low %v6967_v48, %v6974_v55  ;;  %v7086_v53 = vrot.slane %v7058_v6, %v9991_v22 }
 0x3d0   : > { %12489 = vst [vmem:[#allocation22_spill] sm:$0xff] %v11331_v14  ;;  %v5462_v49 = vrot.slane %v5440_v41, %v9991_v22  ;;  %v5469_v8 = vrot.slane %v5441_v51, %v9991_v22  ;;  %v7095_v36 = vrot.slane %v7087_v58, %v9991_v22  ;;  %v3117_v48 = vrot.slane %v12491_v4, %v12385_v23 }
 0x3d1   : > { %v5439_v9 = vcombine.low %v3061_v35, %v3065_v43  ;;  %v6997_v11 = vrot.slane %v6989_v17, %v9991_v22  ;;  %v7088_v44 = vcombine.low %v7079_v31, %v7086_v53  ;;  %v3121_v55 = vrot.slane %v12491_v4, %v12386_v0  ;;  %v12492_v31 = vld [vmem:[#allocation30_spill] sm:$0xff] }
 0x3d2   : > { %v5471_v45 = vcombine.low %v5462_v49, %v5469_v8  ;;  %v3125_v13 = vrot.slane %v12491_v4, %v12388_v62  ;;  %v3129_v27 = vrot.slane %v12491_v4, %v12389_v32  ;;  %v3133_v2 = vrot.slane %v12491_v4, %v9942_v12 }
 0x3d3   : > { %7712 = vperm.xlu0 %8317, %v6417_v29   ;;  %v5455_v30 = vrot.slane %v5439_v9, %v9991_v22  ;;  %v7005_v46 = vcombine.low %v6997_v11, %v7004_v40  ;;  %v7102_v39 = vrot.slane %v7088_v44, %v9991_v22  ;;  %v3137_v1 = vrot.slane %v12491_v4, %v9945_v5 }
 0x3d4   : > { %v5485_v29 = vrot.slane %v5471_v45, %v9991_v22  ;;  %v3141_v54 = vrot.slane %v12491_v4, %v9951_v34  ;;  %v3145_v7 = vrot.slane %v12491_v4, %v9955_v38  ;;  %v7904_v53 = vrot.slane %v7647_v42, %v12492_v31 }
 0x3d5   : > { %v5470_v33 = vcombine.low %v5448_v47, %v5455_v30  ;;  %v7103_v18 = vcombine.low %v7095_v36, %v7102_v39  ;;  %v5536_v58 = vcombine.low %v3117_v48, %v3121_v55  ;;  %v5537_v44 = vcombine.low %v3125_v13, %v3129_v27 }
 0x3d6   : > { %v5538_v30 = vcombine.low %v3133_v2, %v3137_v1  ;;  %v5539_v49 = vcombine.low %v3141_v54, %v3145_v7 }
 0x3d7   : > { %7718 = vperm.xlu0 %8317, %v6515_v26   ;;  %v5478_v50 = vrot.slane %v5470_v33, %v9991_v22  ;;  %v5546_v36 = vrot.slane %v5536_v58, %v9991_v22  ;;  %v5553_v39 = vrot.slane %v5537_v44, %v9991_v22 }
 0x3d8   : > { %v5560_v45 = vrot.slane %v5538_v30, %v9991_v22 }
 0x3d9   : > { %2324 = vadd.xlane.f32.xlu1 %v12490_v21  ;;  %v5486_v3 = vcombine.low %v5478_v50, %v5485_v29  ;;  %v5568_v50 = vcombine.low %v5546_v36, %v5553_v39  ;;  %v12498_v39 = vld [vmem:[#allocation21_spill] sm:$0xff] }
 0x3db   : > { %7742 = vperm.xlu0 %8317, %v6907_v52  }
 0x3df   : > { %7748 = vperm.xlu0 %8317, %v7005_v46  }
 0x3e3   : > { %7754 = vperm.xlu0 %8317, %v7103_v18   ;;  %v5567_v18 = vrot.slane %v5539_v49, %v9991_v22 }
 0x3e5   : > { %v5569_v29 = vcombine.low %v5560_v45, %v5567_v18  ;;  %v3377_v45 = vrot.slane %v12498_v39, %v12386_v0  ;;  %v3381_v18 = vrot.slane %v12498_v39, %v12388_v62 }
 0x3ea   : > { %7655 = vperm.xlu1 %8318, %v5486_v3   ;;  %v12494_v3 = vld [vmem:[#allocation16_spill] sm:$0xff] }
 0x3eb   : > { %v3185_v4 = vrot.slane %v12494_v3, %v12386_v0  ;;  %v3189_v48 = vrot.slane %v12494_v3, %v12388_v62  ;;  %v3193_v55 = vrot.slane %v12494_v3, %v12389_v32  ;;  %v3197_v13 = vrot.slane %v12494_v3, %v9942_v12 }
 0x3ec   : > { %v3201_v27 = vrot.slane %v12494_v3, %v9945_v5  ;;  %v3209_v42 = vrot.slane %v12494_v3, %v9955_v38 }
 0x3fc   : > { %v2305_v63 = vpop.xlane.xlu1 %2304 }
 0x3fd   : > { %v4173_v10 = vrot.slane %v2305_v63, %v12385_v23  ;;  %v4177_v37 = vrot.slane %v2305_v63, %v12386_v0  ;;  %v4181_v16 = vrot.slane %v2305_v63, %v12388_v62  ;;  %v4185_v6 = vrot.slane %v2305_v63, %v12389_v32 }
 0x3fe   : > { %v4189_v35 = vrot.slane %v2305_v63, %v9942_v12  ;;  %v4193_v43 = vrot.slane %v2305_v63, %v9945_v5  ;;  %v4197_v61 = vrot.slane %v2305_v63, %v9951_v34  ;;  %v4201_v26 = vrot.slane %v2305_v63, %v9955_v38 }
 0x3ff   : > { %v7153_v56 = vcombine.low %v4173_v10, %v4177_v37  ;;  %v7154_v57 = vcombine.low %v4181_v16, %v4185_v6  ;;  %v3181_v63 = vrot.slane %v12494_v3, %v12385_v23  ;;  %v12495_v10 = vld [vmem:[#allocation11_spill] sm:$0xff]  ;;  %v5576_v37 = vrot.slane %v5568_v50, %v9991_v22 }
 0x400   : > { %v7644_v24 = vpop.permute.xlu1 %7643  ;;  %v7155_v17 = vcombine.low %v4189_v35, %v4193_v43  ;;  %v7156_v20 = vcombine.low %v4197_v61, %v4201_v26  ;;  %v5583_v16 = vrot.slane %v5569_v29, %v9991_v22  ;;  %v3205_v6 = vrot.slane %v12494_v3, %v9951_v34  ;;  %v12496_v26 = vld [vmem:[#allocation17_spill] sm:$0xff] }
 0x401   : > { %v7900_v52 = vrot.slane %v7644_v24, %v12493_v59  ;;  %v7163_v9 = vrot.slane %v7153_v56, %v9991_v22  ;;  %v7170_v41 = vrot.slane %v7154_v57, %v9991_v22  ;;  %v5634_v35 = vcombine.low %v3181_v63, %v3185_v4 }
 0x402   : > { %v7177_v51 = vrot.slane %v7155_v17, %v9991_v22  ;;  %v7184_v21 = vrot.slane %v7156_v20, %v9991_v22  ;;  %v5635_v43 = vcombine.low %v3189_v48, %v3193_v55  ;;  %v5636_v61 = vcombine.low %v3197_v13, %v3201_v27 }
 0x403   : > { %v11406_v11 = vsel %vm7797_vm1, %v7904_v53, %v7900_v52  ;;  %v7185_v40 = vcombine.low %v7163_v9, %v7170_v41  ;;  %v3245_v56 = vrot.slane %v12496_v26, %v12385_v23  ;;  %v3249_v57 = vrot.slane %v12496_v26, %v12386_v0 }
 0x404   : > { %v7186_v47 = vcombine.low %v7177_v51, %v7184_v21  ;;  %v3253_v2 = vrot.slane %v12496_v26, %v12388_v62  ;;  %v3257_v1 = vrot.slane %v12496_v26, %v12389_v32  ;;  %v5584_v24 = vcombine.low %v5576_v37, %v5583_v16 }
 0x405   : > { %v7193_v8 = vrot.slane %v7185_v40, %v9991_v22  ;;  %v5637_v17 = vcombine.low %v3205_v6, %v3209_v42  ;;  %v5644_v20 = vrot.slane %v5634_v35, %v9991_v22  ;;  %v5651_v54 = vrot.slane %v5635_v43, %v9991_v22  ;;  %v12497_v40 = vld [vmem:[#allocation20_spill] sm:$0xff]  ;;  %v11489_v42 = vpop.xlane.xlu0 %2309 }
 0x406   : > { %v7200_v46 = vrot.slane %v7186_v47, %v9991_v22  ;;  %v5658_v7 = vrot.slane %v5636_v61, %v9991_v22  ;;  %v3261_v53 = vrot.slane %v12496_v26, %v9942_v12  ;;  %v3265_v52 = vrot.slane %v12496_v26, %v9945_v5 }
 0x407   : > { %v3269_v9 = vrot.slane %v12496_v26, %v9951_v34  ;;  %v3273_v41 = vrot.slane %v12496_v26, %v9955_v38  ;;  %v5732_v51 = vcombine.low %v3245_v56, %v3249_v57  ;;  %v5733_v21 = vcombine.low %v3253_v2, %v3257_v1  ;;  %v12499_v1 = vld [vmem:[#allocation23_spill] sm:$0xff] }
 0x408   : > { %v7201_v33 = vcombine.low %v7193_v8, %v7200_v46  ;;  %v3309_v58 = vrot.slane %v12497_v40, %v12385_v23  ;;  %v3313_v44 = vrot.slane %v12497_v40, %v12386_v0  ;;  %v3317_v47 = vrot.slane %v12497_v40, %v12388_v62 }
 0x409   : > { %v3321_v30 = vrot.slane %v12497_v40, %v12389_v32  ;;  %v3325_v49 = vrot.slane %v12497_v40, %v9942_v12  ;;  %v3329_v8 = vrot.slane %v12497_v40, %v9945_v5  ;;  %v3333_v46 = vrot.slane %v12497_v40, %v9951_v34 }
 0x40a   : > { %7760 = vperm.xlu0 %8317, %v7201_v33   ;;  %v3337_v36 = vrot.slane %v12497_v40, %v9955_v38  ;;  %v3373_v33 = vrot.slane %v12498_v39, %v12385_v23  ;;  %v3385_v50 = vrot.slane %v12498_v39, %v12389_v32  ;;  %v5665_v29 = vrot.slane %v5637_v17, %v9991_v22 }
 0x40b   : > { %v5734_v3 = vcombine.low %v3261_v53, %v3265_v52  ;;  %v3389_v63 = vrot.slane %v12498_v39, %v9942_v12  ;;  %v3393_v4 = vrot.slane %v12498_v39, %v9945_v5  ;;  %v11481_v48 = vcombine.low %v5644_v20, %v5651_v54 }
 0x40c   : > { %v5735_v55 = vcombine.low %v3269_v9, %v3273_v41  ;;  %v3397_v13 = vrot.slane %v12498_v39, %v9951_v34  ;;  %v3401_v27 = vrot.slane %v12498_v39, %v9955_v38  ;;  %v5749_v37 = vrot.slane %v5733_v21, %v9991_v22 }
 0x40d   : > { %v5830_v16 = vcombine.low %v3309_v58, %v3313_v44  ;;  %v5831_v6 = vcombine.low %v3317_v47, %v3321_v30  ;;  %v5832_v35 = vcombine.low %v3325_v49, %v3329_v8  ;;  %v5833_v43 = vcombine.low %v3333_v46, %v3337_v36  ;;  %v11519_v8 = vpop.permute.xlu0 %7652 }
 0x40e   : > { %2334 = vadd.xlane.f32.xlu1 %v12495_v10  ;;  %v5742_v10 = vrot.slane %v5732_v51, %v9991_v22  ;;  %v5928_v61 = vcombine.low %v3373_v33, %v3377_v45  ;;  %v5929_v26 = vcombine.low %v3381_v18, %v3385_v50  ;;  %v11491_v56 = vcombine.low %v5658_v7, %v5665_v29  ;;  %v12502_v18 = vld [vmem:[#allocation35_spill] sm:$0xff] }
 0x40f   : > { %v5756_v57 = vrot.slane %v5734_v3, %v9991_v22  ;;  %v5930_v2 = vcombine.low %v3389_v63, %v3393_v4  ;;  %v3437_v17 = vrot.slane %v12499_v1, %v12385_v23  ;;  %v5931_v20 = vcombine.low %v3397_v13, %v3401_v27 }
 0x410   : > { %v3441_v54 = vrot.slane %v12499_v1, %v12386_v0  ;;  %v3445_v53 = vrot.slane %v12499_v1, %v12388_v62  ;;  %v3449_v52 = vrot.slane %v12499_v1, %v12389_v32  ;;  %v5763_v7 = vrot.slane %v5735_v55, %v9991_v22 }
 0x411   : > { %v11503_v9 = vcombine.low %v5742_v10, %v5749_v37  ;;  %v5840_v41 = vrot.slane %v5830_v16, %v9991_v22  ;;  %v5847_v51 = vrot.slane %v5831_v6, %v9991_v22  ;;  %v5861_v21 = vrot.slane %v5833_v43, %v9991_v22  ;;  %v2320_v13 = vpop.xlane.xlu0 %2319 }
 0x412   : > { %v5938_v40 = vrot.slane %v5928_v61, %v9991_v22  ;;  %v5945_v58 = vrot.slane %v5929_v26, %v9991_v22  ;;  %v3453_v44 = vrot.slane %v12499_v1, %v9942_v12  ;;  %v3457_v47 = vrot.slane %v12499_v1, %v9945_v5 }
 0x413   : > { %v3461_v30 = vrot.slane %v12499_v1, %v9951_v34  ;;  %v3465_v49 = vrot.slane %v12499_v1, %v9955_v38  ;;  %v5952_v46 = vrot.slane %v5930_v2, %v9991_v22  ;;  %v5959_v36 = vrot.slane %v5931_v20, %v9991_v22 }
 0x414   : > { %v6026_v39 = vcombine.low %v3437_v17, %v3441_v54  ;;  %v6027_v33 = vcombine.low %v3445_v53, %v3449_v52  ;;  %v11527_v50 = vcombine.low %v5756_v57, %v5763_v7  ;;  %v11531_v3 = vcombine.low %v5840_v41, %v5847_v51  ;;  %v12500_v53 = vld [vmem:[#allocation25_spill] sm:$0xff] }
 0x415   : > { %v6028_v4 = vcombine.low %v3453_v44, %v3457_v47  ;;  %v6029_v55 = vcombine.low %v3461_v30, %v3465_v49  ;;  %v11535_v27 = vcombine.low %v5938_v40, %v5945_v58  ;;  %v11537_v10 = vcombine.low %v5952_v46, %v5959_v36 }
 0x416   : > { %v6036_v37 = vrot.slane %v6026_v39, %v9991_v22  ;;  %v6043_v16 = vrot.slane %v6027_v33, %v9991_v22  ;;  %v4269_v6 = vrot.slane %v2320_v13, %v12385_v23  ;;  %v4277_v43 = vrot.slane %v2320_v13, %v12388_v62 }
 0x417   : > { %v4281_v61 = vrot.slane %v2320_v13, %v12389_v32  ;;  %v4285_v26 = vrot.slane %v2320_v13, %v9942_v12  ;;  %v4289_v57 = vrot.slane %v2320_v13, %v9945_v5  ;;  %v4293_v2 = vrot.slane %v2320_v13, %v9951_v34 }
 0x418   : > { %v4297_v1 = vrot.slane %v2320_v13, %v9955_v38  ;;  %v6050_v20 = vrot.slane %v6028_v4, %v9991_v22  ;;  %v6057_v54 = vrot.slane %v6029_v55, %v9991_v22  ;;  %v3501_v52 = vrot.slane %v12500_v53, %v12385_v23 }
 0x419   : > { %v11555_v7 = vcombine.low %v6036_v37, %v6043_v16  ;;  %v3505_v41 = vrot.slane %v12500_v53, %v12386_v0  ;;  %v3509_v51 = vrot.slane %v12500_v53, %v12388_v62  ;;  %v7301_v30 = vcombine.low %v4277_v43, %v4281_v61 }
 0x41a   : > { %v7302_v49 = vcombine.low %v4285_v26, %v4289_v57  ;;  %v7303_v46 = vcombine.low %v4293_v2, %v4297_v1  ;;  %v11571_v36 = vcombine.low %v6050_v20, %v6057_v54  ;;  %v3517_v39 = vrot.slane %v12500_v53, %v9942_v12 }
 0x41b   : > { %v3521_v33 = vrot.slane %v12500_v53, %v9945_v5  ;;  %v3525_v4 = vrot.slane %v12500_v53, %v9951_v34  ;;  %v6124_v37 = vcombine.low %v3501_v52, %v3505_v41  ;;  %v7317_v1 = vrot.slane %v7301_v30, %v9991_v22 }
 0x41c   : > { %v7324_v20 = vrot.slane %v7302_v49, %v9991_v22  ;;  %v7331_v54 = vrot.slane %v7303_v46, %v9991_v22 }
 0x41f   : > { %7661 = vperm.xlu1 %8318, %v5584_v24   ;;  %v5854_v24 = vrot.slane %v5832_v35, %v9991_v22  ;;  %v4273_v35 = vrot.slane %v2320_v13, %v12386_v0  ;;  %v3529_v13 = vrot.slane %v12500_v53, %v9955_v38 }
 0x421   : > { %v11533_v63 = vcombine.low %v5854_v24, %v5861_v21  ;;  %v3513_v24 = vrot.slane %v12500_v53, %v12389_v32  ;;  %v7300_v47 = vcombine.low %v4269_v6, %v4273_v35  ;;  %v12501_v6 = vld [vmem:[#allocation27_spill] sm:$0xff]  ;;  %v6127_v14 = vcombine.low %v3525_v4, %v3529_v13 }
 0x422   : > { %v3565_v35 = vrot.slane %v12501_v6, %v12385_v23  ;;  %v3569_v43 = vrot.slane %v12501_v6, %v12386_v0  ;;  %v3573_v61 = vrot.slane %v12501_v6, %v12388_v62  ;;  %v3577_v26 = vrot.slane %v12501_v6, %v12389_v32 }
 0x423   : > { %v6125_v16 = vcombine.low %v3509_v51, %v3513_v24  ;;  %v7310_v2 = vrot.slane %v7300_v47, %v9991_v22  ;;  %v3581_v46 = vrot.slane %v12501_v6, %v9942_v12  ;;  %v3585_v44 = vrot.slane %v12501_v6, %v9945_v5 }
 0x424   : > { %v3589_v17 = vrot.slane %v12501_v6, %v9951_v34  ;;  %v3593_v45 = vrot.slane %v12501_v6, %v9955_v38  ;;  %v6126_v6 = vcombine.low %v3517_v39, %v3521_v33 }
 0x426   : > { %v6225_v33 = vcombine.low %v3589_v17, %v3593_v45  ;;  %v6155_v45 = vrot.slane %v6127_v14, %v9991_v22 }
 0x431   : > { %v2315_v57 = vpop.xlane.xlu1 %2314 }
 0x432   : > { %v4237_v53 = vrot.slane %v2315_v57, %v12385_v23  ;;  %v4241_v52 = vrot.slane %v2315_v57, %v12386_v0  ;;  %v4245_v41 = vrot.slane %v2315_v57, %v12388_v62  ;;  %v4249_v51 = vrot.slane %v2315_v57, %v12389_v32 }
 0x433   : > { %v4253_v24 = vrot.slane %v2315_v57, %v9942_v12  ;;  %v4257_v55 = vrot.slane %v2315_v57, %v9945_v5  ;;  %v4261_v47 = vrot.slane %v2315_v57, %v9951_v34  ;;  %v4265_v30 = vrot.slane %v2315_v57, %v9955_v38 }
 0x434   : > { %v7251_v58 = vcombine.low %v4237_v53, %v4241_v52  ;;  %v7252_v49 = vcombine.low %v4245_v41, %v4249_v51  ;;  %v7914_v57 = vrot.slane %v11519_v8, %v12502_v18  ;;  %v12503_v53 = vld [vmem:[#allocation34_spill] sm:$0xff]  ;;  %v6134_v8 = vrot.slane %v6124_v37, %v9991_v22 }
 0x435   : > { %v7650_v21 = vpop.permute.xlu1 %7649  ;;  %v7253_v40 = vcombine.low %v4253_v24, %v4257_v55  ;;  %v7254_v29 = vcombine.low %v4261_v47, %v4265_v30  ;;  %v7332_v24 = vcombine.low %v7310_v2, %v7317_v1  ;;  %v7333_v47 = vcombine.low %v7324_v20, %v7331_v54 }
 0x436   : > { %v7909_v52 = vrot.slane %v7650_v21, %v12503_v53  ;;  %v7261_v41 = vrot.slane %v7251_v58, %v9991_v22  ;;  %v7268_v51 = vrot.slane %v7252_v49, %v9991_v22  ;;  %v6141_v21 = vrot.slane %v6125_v16, %v9991_v22  ;;  %v11802_v53 = vpop.permute.xlu0 %7658 }
 0x437   : > { %v7275_v31 = vrot.slane %v7253_v40, %v9991_v22  ;;  %v7282_v55 = vrot.slane %v7254_v29, %v9991_v22  ;;  %v6222_v49 = vcombine.low %v3565_v35, %v3569_v43  ;;  %v6223_v29 = vcombine.low %v3573_v61, %v3577_v26 }
 0x438   : > { %v7910_v30 = vsel %vm7804_vm2, %v7909_v52, %v11406_v11  ;;  %v7283_v59 = vcombine.low %v7261_v41, %v7268_v51  ;;  %v6224_v2 = vcombine.low %v3581_v46, %v3585_v44  ;;  %v7340_v11 = vrot.slane %v7332_v24, %v9991_v22  ;;  %v12505_v41 = vld [vmem:[#allocation4_spill] sm:$0xff] }
 0x439   : > { %v7284_v28 = vcombine.low %v7275_v31, %v7282_v55  ;;  %v11623_v58 = vsel %vm7811_vm3, %v7914_v57, %v7910_v30  ;;  %v7347_v39 = vrot.slane %v7333_v47, %v9991_v22  ;;  %v12504_v31 = vld [vmem:[#allocation29_spill] sm:$0xff]  ;;  %v6148_v16 = vrot.slane %v6126_v6, %v9991_v22 }
 0x43a   : > { %v7291_v40 = vrot.slane %v7283_v59, %v9991_v22  ;;  %v3629_v4 = vrot.slane %v12504_v31, %v12385_v23  ;;  %v3633_v13 = vrot.slane %v12504_v31, %v12386_v0  ;;  %v3637_v37 = vrot.slane %v12504_v31, %v12388_v62 }
 0x43b   : > { %v7298_v1 = vrot.slane %v7284_v28, %v9991_v22  ;;  %v3641_v59 = vrot.slane %v12504_v31, %v12389_v32  ;;  %v6073_v28 = vrot.slane %v11571_v36, %v9991_v22  ;;  %v11641_v17 = vcombine.low %v6134_v8, %v6141_v21 }
 0x43c   : > { %v6232_v35 = vrot.slane %v6222_v49, %v9991_v22  ;;  %v6239_v43 = vrot.slane %v6223_v29, %v9991_v22  ;;  %v6246_v61 = vrot.slane %v6224_v2, %v9991_v22  ;;  %v7348_v26 = vcombine.low %v7340_v11, %v7347_v39 }
 0x43d   : > { %v7299_v44 = vcombine.low %v7291_v40, %v7298_v1  ;;  %v6253_v20 = vrot.slane %v6225_v33, %v9991_v22  ;;  %v3645_v54 = vrot.slane %v12504_v31, %v9942_v12  ;;  %v3649_v36 = vrot.slane %v12504_v31, %v9945_v5 }
 0x43e   : > { %v3653_v14 = vrot.slane %v12504_v31, %v9951_v34  ;;  %v3657_v46 = vrot.slane %v12504_v31, %v9955_v38  ;;  %v6320_v57 = vcombine.low %v3629_v4, %v3633_v13  ;;  %v6321_v52 = vcombine.low %v3637_v37, %v3641_v59 }
 0x43f   : > { %7766 = vperm.xlu0 %8317, %v7299_v44   ;;  %v3693_v51 = vrot.slane %v12505_v41, %v12385_v23  ;;  %v3697_v55 = vrot.slane %v12505_v41, %v12386_v0  ;;  %v3701_v24 = vrot.slane %v12505_v41, %v12388_v62  ;;  %v3705_v47 = vrot.slane %v12505_v41, %v12389_v32 }
 0x440   : > { %v3709_v30 = vrot.slane %v12505_v41, %v9942_v12  ;;  %v3713_v6 = vrot.slane %v12505_v41, %v9945_v5  ;;  %v3717_v8 = vrot.slane %v12505_v41, %v9951_v34  ;;  %v3721_v21 = vrot.slane %v12505_v41, %v9955_v38 }
 0x441   : > { %v6157_v40 = vcombine.low %v6148_v16, %v6155_v45  ;;  %v6254_v49 = vcombine.low %v6232_v35, %v6239_v43  ;;  %v6255_v29 = vcombine.low %v6246_v61, %v6253_v20  ;;  %v6322_v2 = vcombine.low %v3645_v54, %v3649_v36 }
 0x442   : > { %v6323_v1 = vcombine.low %v3653_v14, %v3657_v46  ;;  %v6330_v11 = vrot.slane %v6320_v57, %v9991_v22  ;;  %v6337_v39 = vrot.slane %v6321_v52, %v9991_v22  ;;  %v12506_v33 = vrot.slane %v11491_v56, %v9991_v22 }
 0x443   : > { %7769 = vperm.xlu0 %8317, %v7348_v26   ;;  %2344 = vadd.xlane.f32.xlu1 %v11328_v60  ;;  %v12507_v31 = vrot.slane %v11481_v48, %v9991_v22  ;;  %v12508_v13 = vrot.slane %v11527_v50, %v9991_v22  ;;  %v12509_v60 = vrot.slane %v11503_v9, %v9991_v22 }
 0x444   : > { %v6418_v59 = vcombine.low %v3693_v51, %v3697_v55  ;;  %v6419_v44 = vcombine.low %v3701_v24, %v3705_v47  ;;  %v12510_v16 = vrot.slane %v11533_v63, %v9991_v22  ;;  %v12511_v56 = vrot.slane %v11531_v3, %v9991_v22 }
 0x445   : > { %v5682_v4 = vcombine.low %v12507_v31, %v12506_v33  ;;  %v11686_v37 = vcombine.low %v12509_v60, %v12508_v13  ;;  %v12512_v48 = vrot.slane %v11537_v10, %v9991_v22  ;;  %v12513_v50 = vrot.slane %v11535_v27, %v9991_v22 }
 0x446   : > { %v11694_v45 = vcombine.low %v12511_v56, %v12510_v16  ;;  %v6420_v9 = vcombine.low %v3709_v30, %v3713_v6  ;;  %v6421_v43 = vcombine.low %v3717_v8, %v3721_v21  ;;  %v12514_v61 = vrot.slane %v11555_v7, %v9991_v22  ;;  %v12516_v6 = vld [vmem:[#allocation36_spill] sm:$0xff] }
 0x447   : > { %v11702_v35 = vcombine.low %v12513_v50, %v12512_v48  ;;  %v6164_v3 = vrot.slane %v11641_v17, %v9991_v22  ;;  %v6171_v63 = vrot.slane %v6157_v40, %v9991_v22  ;;  %v6262_v20 = vrot.slane %v6254_v49, %v9991_v22 }
 0x448   : > { %v11707_v26 = vcombine.low %v12514_v61, %v6073_v28  ;;  %v6269_v10 = vrot.slane %v6255_v29, %v9991_v22  ;;  %v6344_v27 = vrot.slane %v6322_v2, %v9991_v22  ;;  %v6351_v54 = vrot.slane %v6323_v1, %v9991_v22  ;;  %v12515_v28 = vld [vmem:[#allocation12_spill] sm:$0xff] }
 0x449   : > { %v11716_v36 = vcombine.low %v6330_v11, %v6337_v39  ;;  %v6428_v14 = vrot.slane %v6418_v59, %v9991_v22  ;;  %v6435_v7 = vrot.slane %v6419_v44, %v9991_v22  ;;  %v3757_v46 = vrot.slane %v12515_v28, %v12385_v23 }
 0x44a   : > { %v3761_v17 = vrot.slane %v12515_v28, %v12386_v0  ;;  %v6442_v57 = vrot.slane %v6420_v9, %v9991_v22  ;;  %v6449_v52 = vrot.slane %v6421_v43, %v9991_v22  ;;  %v3765_v41 = vrot.slane %v12515_v28, %v12388_v62  ;;  %v12517_v43 = vld [vmem:[#allocation42_spill] sm:$0xff] }
 0x44b   : > { %v3769_v51 = vrot.slane %v12515_v28, %v12389_v32  ;;  %v3773_v55 = vrot.slane %v12515_v28, %v9942_v12  ;;  %v3777_v24 = vrot.slane %v12515_v28, %v9945_v5  ;;  %v3781_v47 = vrot.slane %v12515_v28, %v9951_v34 }
 0x44c   : > { %v3785_v30 = vrot.slane %v12515_v28, %v9955_v38  ;;  %v3789_v8 = vrot.slane %v12516_v6, %v12385_v23  ;;  %v3793_v21 = vrot.slane %v12516_v6, %v12386_v0  ;;  %v3797_v40 = vrot.slane %v12516_v6, %v12388_v62 }
 0x44d   : > { %v3801_v49 = vrot.slane %v12516_v6, %v12389_v32  ;;  %v11746_v29 = vcombine.low %v6164_v3, %v6171_v63  ;;  %v11748_v2 = vcombine.low %v6262_v20, %v6269_v10  ;;  %v11750_v1 = vcombine.low %v6344_v27, %v6351_v54 }
 0x44e   : > { %v11754_v39 = vcombine.low %v6428_v14, %v6435_v7  ;;  %v11756_v33 = vcombine.low %v6442_v57, %v6449_v52  ;;  %v6516_v31 = vcombine.low %v3757_v46, %v3761_v17  ;;  %v6517_v13 = vcombine.low %v3765_v41, %v3769_v51  ;;  %v12518_v7 = vld [vmem:[#allocation32_spill] sm:$0xff] }
 0x44f   : > { %v6518_v60 = vcombine.low %v3773_v55, %v3777_v24  ;;  %v6519_v59 = vcombine.low %v3781_v47, %v3785_v30  ;;  %v3805_v44 = vrot.slane %v12516_v6, %v9942_v12  ;;  %v3809_v16 = vrot.slane %v12516_v6, %v9945_v5 }
 0x450   : > { %v3813_v56 = vrot.slane %v12516_v6, %v9951_v34  ;;  %v3817_v48 = vrot.slane %v12516_v6, %v9955_v38  ;;  %v6565_v50 = vcombine.low %v3789_v8, %v3793_v21  ;;  %v6566_v9 = vcombine.low %v3797_v40, %v3801_v49 }
 0x451   : > { %v3821_v61 = vrot.slane %v12517_v43, %v12385_v23  ;;  %v3825_v3 = vrot.slane %v12517_v43, %v12386_v0  ;;  %v3829_v63 = vrot.slane %v12517_v43, %v12388_v62  ;;  %v3833_v20 = vrot.slane %v12517_v43, %v12389_v32 }
 0x452   : > { %v3837_v10 = vrot.slane %v12517_v43, %v9942_v12  ;;  %v3841_v27 = vrot.slane %v12517_v43, %v9945_v5  ;;  %v3845_v54 = vrot.slane %v12517_v43, %v9951_v34  ;;  %v3849_v14 = vrot.slane %v12517_v43, %v9955_v38 }
 0x453   : > { %v3853_v28 = vrot.slane %v12518_v7, %v12385_v23  ;;  %v3857_v46 = vrot.slane %v12518_v7, %v12386_v0  ;;  %v3861_v17 = vrot.slane %v12518_v7, %v12388_v62  ;;  %v3865_v57 = vrot.slane %v12518_v7, %v12389_v32 }
 0x454   : > { %7667 = vperm.xlu1 %8318, %v5682_v4   ;;  %v3869_v52 = vrot.slane %v12518_v7, %v9942_v12  ;;  %v3873_v41 = vrot.slane %v12518_v7, %v9945_v5  ;;  %v3877_v51 = vrot.slane %v12518_v7, %v9951_v34  ;;  %v3881_v55 = vrot.slane %v12518_v7, %v9955_v38 }
 0x455   : > { %v6526_v24 = vrot.slane %v6516_v31, %v9991_v22  ;;  %v6533_v47 = vrot.slane %v6517_v13, %v9991_v22  ;;  %v6540_v30 = vrot.slane %v6518_v60, %v9991_v22  ;;  %v6547_v4 = vrot.slane %v6519_v59, %v9991_v22 }
 0x456   : > { %v6567_v6 = vcombine.low %v3805_v44, %v3809_v16  ;;  %v6568_v8 = vcombine.low %v3813_v56, %v3817_v48  ;;  %v6614_v21 = vcombine.low %v3821_v61, %v3825_v3  ;;  %v6615_v40 = vcombine.low %v3829_v63, %v3833_v20  ;;  %v2330_v63 = vpop.xlane.xlu0 %2329 }
 0x457   : > { %v6616_v49 = vcombine.low %v3837_v10, %v3841_v27  ;;  %v6617_v43 = vcombine.low %v3845_v54, %v3849_v14  ;;  %v6663_v11 = vcombine.low %v3853_v28, %v3857_v46  ;;  %v6664_v18 = vcombine.low %v3861_v17, %v3865_v57 }
 0x458   : > { %7673 = vperm.xlu1 %8318, %v11686_v37   ;;  %v6575_v31 = vrot.slane %v6565_v50, %v9991_v22  ;;  %v6582_v13 = vrot.slane %v6566_v9, %v9991_v22  ;;  %v6665_v7 = vcombine.low %v3869_v52, %v3873_v41  ;;  %v6666_v60 = vcombine.low %v3877_v51, %v3881_v55 }
 0x459   : > { %v6367_v59 = vrot.slane %v11750_v1, %v9991_v22  ;;  %v6458_v44 = vrot.slane %v11754_v39, %v9991_v22  ;;  %v6465_v16 = vrot.slane %v11756_v33, %v9991_v22  ;;  %v11813_v56 = vcombine.low %v6526_v24, %v6533_v47 }
 0x45a   : > { %v6589_v48 = vrot.slane %v6567_v6, %v9991_v22  ;;  %v6596_v37 = vrot.slane %v6568_v8, %v9991_v22  ;;  %v6624_v50 = vrot.slane %v6614_v21, %v9991_v22  ;;  %v6631_v9 = vrot.slane %v6615_v40, %v9991_v22 }
 0x45b   : > { %v6638_v61 = vrot.slane %v6616_v49, %v9991_v22  ;;  %v6645_v1 = vrot.slane %v6617_v43, %v9991_v22  ;;  %v6673_v3 = vrot.slane %v6663_v11, %v9991_v22  ;;  %v6680_v39 = vrot.slane %v6664_v18, %v9991_v22 }
 0x45c   : > { %7679 = vperm.xlu1 %8318, %v11694_v45   ;;  %v11824_v33 = vcombine.low %v6540_v30, %v6547_v4  ;;  %v11826_v20 = vcombine.low %v6575_v31, %v6582_v13  ;;  %v6687_v10 = vrot.slane %v6665_v7, %v9991_v22  ;;  %v6694_v27 = vrot.slane %v6666_v60, %v9991_v22 }
 0x45d   : > { %v4333_v54 = vrot.slane %v2330_v63, %v12385_v23  ;;  %v4337_v14 = vrot.slane %v2330_v63, %v12386_v0  ;;  %v4341_v28 = vrot.slane %v2330_v63, %v12388_v62  ;;  %v4345_v11 = vrot.slane %v2330_v63, %v12389_v32 }
 0x45e   : > { %v4349_v18 = vrot.slane %v2330_v63, %v9942_v12  ;;  %v4353_v45 = vrot.slane %v2330_v63, %v9945_v5  ;;  %v4357_v46 = vrot.slane %v2330_v63, %v9951_v34  ;;  %v4361_v17 = vrot.slane %v2330_v63, %v9955_v38 }
 0x45f   : > { %v11838_v57 = vcombine.low %v6589_v48, %v6596_v37  ;;  %v11840_v52 = vcombine.low %v6624_v50, %v6631_v9  ;;  %v11842_v41 = vcombine.low %v6638_v61, %v6645_v1  ;;  %v11844_v51 = vcombine.low %v6673_v3, %v6680_v39 }
 0x460   : > { %7685 = vperm.xlu1 %8318, %v11702_v35   ;;  %v12519_v55 = vrot.slane %v11716_v36, %v9991_v22  ;;  %v11852_v47 = vcombine.low %v6458_v44, %v6465_v16  ;;  %v6556_v30 = vrot.slane %v11813_v56, %v9991_v22  ;;  %v11856_v4 = vcombine.low %v6687_v10, %v6694_v27  ;;  %v12520_v35 = vld [vmem:[#allocation6_spill] sm:$0xff] }
 0x461   : > { %v6563_v6 = vrot.slane %v11824_v33, %v9991_v22  ;;  %v6605_v8 = vrot.slane %v11826_v20, %v9991_v22  ;;  %v3949_v21 = vrot.slane %v12520_v35, %v12385_v23  ;;  %v3953_v36 = vrot.slane %v12520_v35, %v12386_v0 }
 0x462   : > { %v11850_v24 = vcombine.low %v12519_v55, %v6367_v59  ;;  %v7398_v40 = vcombine.low %v4333_v54, %v4337_v14  ;;  %v7399_v49 = vcombine.low %v4341_v28, %v4345_v11  ;;  %v7400_v43 = vcombine.low %v4349_v18, %v4353_v45 }
 0x463   : > { %v7401_v31 = vcombine.low %v4357_v46, %v4361_v17  ;;  %v6612_v13 = vrot.slane %v11838_v57, %v9991_v22  ;;  %v6654_v7 = vrot.slane %v11840_v52, %v9991_v22  ;;  %v6661_v60 = vrot.slane %v11842_v41, %v9991_v22 }
 0x464   : > { %7691 = vperm.xlu1 %8318, %v11707_v26   ;;  %v3957_v16 = vrot.slane %v12520_v35, %v12388_v62  ;;  %v3961_v48 = vrot.slane %v12520_v35, %v12389_v32  ;;  %v3965_v37 = vrot.slane %v12520_v35, %v9942_v12  ;;  %v3969_v50 = vrot.slane %v12520_v35, %v9945_v5 }
 0x465   : > { %v3973_v9 = vrot.slane %v12520_v35, %v9951_v34  ;;  %v3977_v26 = vrot.slane %v12520_v35, %v9955_v38  ;;  %v11889_v61 = vcombine.low %v3949_v21, %v3953_v36  ;;  %v7408_v3 = vrot.slane %v7398_v40, %v9991_v22  ;;  %v12521_v40 = vld [vmem:[#allocation3_spill] sm:$0xff] }
 0x466   : > { %v2325_v1 = vpop.xlane.xlu1 %2324  ;;  %v7415_v39 = vrot.slane %v7399_v49, %v9991_v22  ;;  %v7422_v63 = vrot.slane %v7400_v43, %v9991_v22  ;;  %v7429_v10 = vrot.slane %v7401_v31, %v9991_v22  ;;  %v6811_v52 = vcombine.low %v3957_v16, %v3961_v48  ;;  %v12523_v31 = vld [vmem:[#allocation37_spill] sm:$0xff] }
 0x467   : > { %v4301_v27 = vrot.slane %v2325_v1, %v12385_v23  ;;  %v4305_v54 = vrot.slane %v2325_v1, %v12386_v0  ;;  %v4309_v14 = vrot.slane %v2325_v1, %v12388_v62  ;;  %v4313_v28 = vrot.slane %v2325_v1, %v12389_v32 }
 0x468   : > { %7697 = vperm.xlu1 %8318, %v11746_v29   ;;  %v4317_v11 = vrot.slane %v2325_v1, %v9942_v12  ;;  %v4321_v18 = vrot.slane %v2325_v1, %v9945_v5  ;;  %v4325_v45 = vrot.slane %v2325_v1, %v9951_v34  ;;  %v4329_v46 = vrot.slane %v2325_v1, %v9955_v38  ;;  %v12522_v29 = vld [vmem:[#allocation38_spill] sm:$0xff] }
 0x469   : > { %v7349_v17 = vcombine.low %v4301_v27, %v4305_v54  ;;  %v7350_v57 = vcombine.low %v4309_v14, %v4313_v28  ;;  %v6812_v41 = vcombine.low %v3965_v37, %v3969_v50  ;;  %v6813_v36 = vcombine.low %v3973_v9, %v3977_v26 }
 0x46a   : > { %v7656_v55 = vpop.permute.xlu1 %7655  ;;  %v7351_v35 = vcombine.low %v4317_v11, %v4321_v18  ;;  %v7352_v21 = vcombine.low %v4325_v45, %v4329_v46  ;;  %v4013_v49 = vrot.slane %v12521_v40, %v12385_v23  ;;  %v7924_v43 = vrot.slane %v11802_v53, %v12522_v29 }
 0x46b   : > { %v7919_v59 = vrot.slane %v7656_v55, %v12523_v31  ;;  %v7359_v44 = vrot.slane %v7349_v17, %v9991_v22  ;;  %v7366_v1 = vrot.slane %v7350_v57, %v9991_v22  ;;  %v7430_v37 = vcombine.low %v7408_v3, %v7415_v39 }
 0x46c   : > { %7703 = vperm.xlu1 %8318, %v11748_v2   ;;  %v7373_v16 = vrot.slane %v7351_v35, %v9991_v22  ;;  %v7380_v48 = vrot.slane %v7352_v21, %v9991_v22  ;;  %v7431_v50 = vcombine.low %v7422_v63, %v7429_v10  ;;  %v4017_v53 = vrot.slane %v12521_v40, %v12386_v0 }
 0x46d   : > { %v7920_v9 = vsel %vm7818_vm4, %v7919_v59, %v11623_v58  ;;  %v7381_v26 = vcombine.low %v7359_v44, %v7366_v1  ;;  %v4021_v27 = vrot.slane %v12521_v40, %v12388_v62  ;;  %v4025_v2 = vrot.slane %v12521_v40, %v12389_v32 }
 0x46e   : > { %v7382_v54 = vcombine.low %v7373_v16, %v7380_v48  ;;  %v4029_v14 = vrot.slane %v12521_v40, %v9942_v12  ;;  %v11925_v3 = vsel %vm7825_vm5, %v7924_v43, %v7920_v9  ;;  %v4033_v58 = vrot.slane %v12521_v40, %v9945_v5 }
 0x46f   : > { %v7389_v39 = vrot.slane %v7381_v26, %v9991_v22  ;;  %v4037_v59 = vrot.slane %v12521_v40, %v9951_v34  ;;  %v4041_v44 = vrot.slane %v12521_v40, %v9955_v38  ;;  %v7438_v10 = vrot.slane %v7430_v37, %v9991_v22 }
 0x470   : > { %7709 = vperm.xlu1 %8318, %v11850_v24   ;;  %v7396_v63 = vrot.slane %v7382_v54, %v9991_v22  ;;  %v7445_v28 = vrot.slane %v7431_v50, %v9991_v22  ;;  %v6564_v11 = vcombine.low %v6556_v30, %v6563_v6  ;;  %v6613_v18 = vcombine.low %v6605_v8, %v6612_v13 }
 0x471   : > { %v6662_v45 = vcombine.low %v6654_v7, %v6661_v60  ;;  %v6820_v24 = vrot.slane %v11889_v61, %v9991_v22  ;;  %v6827_v46 = vrot.slane %v6811_v52, %v9991_v22  ;;  %v6834_v57 = vrot.slane %v6812_v41, %v9991_v22  ;;  %v12526_v60 = vld [vmem:[#allocation43_spill] sm:$0xff] }
 0x472   : > { %v7397_v17 = vcombine.low %v7389_v39, %v7396_v63  ;;  %v6841_v55 = vrot.slane %v6813_v36, %v9991_v22  ;;  %v6908_v33 = vcombine.low %v4013_v49, %v4017_v53  ;;  %v12524_v56 = vrot.slane %v11856_v4, %v9991_v22 }
 0x473   : > { %v12525_v30 = vrot.slane %v11844_v51, %v9991_v22  ;;  %v6909_v6 = vcombine.low %v4021_v27, %v4025_v2  ;;  %v6910_v8 = vcombine.low %v4029_v14, %v4033_v58  ;;  %v6911_v13 = vcombine.low %v4037_v59, %v4041_v44 }
 0x474   : > { %7772 = vperm.xlu0 %8317, %v7397_v17   ;;  %7715 = vperm.xlu1 %8318, %v11852_v47   ;;  %v7446_v7 = vcombine.low %v7438_v10, %v7445_v28  ;;  %v3885_v61 = vrot.slane %v12526_v60, %v12385_v23  ;;  %v3889_v52 = vrot.slane %v12526_v60, %v12386_v0 }
 0x475   : > { %v11958_v20 = vcombine.low %v12525_v30, %v12524_v56  ;;  %v3893_v4 = vrot.slane %v12526_v60, %v12388_v62  ;;  %v3897_v51 = vrot.slane %v12526_v60, %v12389_v32  ;;  %v3901_v41 = vrot.slane %v12526_v60, %v9942_v12 }
 0x476   : > { %v3905_v35 = vrot.slane %v12526_v60, %v9945_v5  ;;  %v6842_v47 = vcombine.low %v6820_v24, %v6827_v46  ;;  %v6843_v21 = vcombine.low %v6834_v57, %v6841_v55  ;;  %v6918_v36 = vrot.slane %v6908_v33, %v9991_v22 }
 0x477   : > { %v3909_v40 = vrot.slane %v12526_v60, %v9951_v34  ;;  %v6925_v49 = vrot.slane %v6909_v6, %v9991_v22  ;;  %v6932_v43 = vrot.slane %v6910_v8, %v9991_v22  ;;  %v6939_v1 = vrot.slane %v6911_v13, %v9991_v22 }
 0x478   : > { %v4077_v16 = vrot.slane %v11255_v19, %v12385_v23  ;;  %7775 = vperm.xlu0 %8317, %v7446_v7   ;;  %7721 = vperm.xlu1 %8318, %v6564_v11   ;;  %v4081_v48 = vrot.slane %v11255_v19, %v12386_v0  ;;  %v4085_v37 = vrot.slane %v11255_v19, %v12388_v62 }
 0x479   : > { %v4089_v50 = vrot.slane %v11255_v19, %v12389_v32  ;;  %v4093_v9 = vrot.slane %v11255_v19, %v9942_v12  ;;  %v4097_v26 = vrot.slane %v11255_v19, %v9945_v5  ;;  %v4101_v53 = vrot.slane %v11255_v19, %v9951_v34 }
 0x47a   : > { %v4105_v27 = vrot.slane %v11255_v19, %v9955_v38  ;;  %v4141_v54 = vrot.slane %v11373_v25, %v12385_v23  ;;  %v4145_v2 = vrot.slane %v11373_v25, %v12386_v0  ;;  %v4149_v14 = vrot.slane %v11373_v25, %v12388_v62 }
 0x47b   : > { %v4153_v39 = vrot.slane %v11373_v25, %v12389_v32  ;;  %v4157_v58 = vrot.slane %v11373_v25, %v9942_v12  ;;  %v4161_v59 = vrot.slane %v11373_v25, %v9945_v5  ;;  %v4165_v19 = vrot.slane %v11373_v25, %v9951_v34 }
 0x47c   : > { %v4169_v44 = vrot.slane %v11373_v25, %v9955_v38  ;;  %7724 = vperm.xlu1 %8318, %v6613_v18   ;;  %v3913_v63 = vrot.slane %v12526_v60, %v9955_v38  ;;  %v12013_v10 = vcombine.low %v3885_v61, %v3889_v52  ;;  %v12015_v28 = vcombine.low %v3893_v4, %v3897_v51 }
 0x47d   : > { %v12017_v11 = vcombine.low %v3901_v41, %v3905_v35  ;;  %v6850_v24 = vrot.slane %v6842_v47, %v9991_v22  ;;  %v6857_v46 = vrot.slane %v6843_v21, %v9991_v22  ;;  %v6940_v17 = vcombine.low %v6918_v36, %v6925_v49 }
 0x47e   : > { %v6941_v57 = vcombine.low %v6932_v43, %v6939_v1  ;;  %v7006_v55 = vcombine.low %v4077_v16, %v4081_v48  ;;  %v7007_v33 = vcombine.low %v4085_v37, %v4089_v50  ;;  %v7008_v56 = vcombine.low %v4093_v9, %v4097_v26  ;;  %v12527_v43 = vld [vmem:[#allocation44_spill] sm:$0xff] }
 0x47f   : > { %v7009_v25 = vcombine.low %v4101_v53, %v4105_v27  ;;  %v7104_v18 = vcombine.low %v4141_v54, %v4145_v2  ;;  %v7105_v30 = vcombine.low %v4149_v14, %v4153_v39  ;;  %v7106_v6 = vcombine.low %v4157_v58, %v4161_v59 }
 0x480   : > { %v7107_v8 = vcombine.low %v4165_v19, %v4169_v44  ;;  %7727 = vperm.xlu1 %8318, %v6662_v45   ;;  %v4205_v13 = vrot.slane %v11489_v42, %v12385_v23  ;;  %v4209_v7 = vrot.slane %v11489_v42, %v12386_v0  ;;  %v4213_v60 = vrot.slane %v11489_v42, %v12388_v62 }
 0x481   : > { %v4217_v61 = vrot.slane %v11489_v42, %v12389_v32  ;;  %v4221_v52 = vrot.slane %v11489_v42, %v9942_v12  ;;  %v4225_v4 = vrot.slane %v11489_v42, %v9945_v5  ;;  %v4229_v45 = vrot.slane %v11489_v42, %v9951_v34 }
 0x482   : > { %v4233_v51 = vrot.slane %v11489_v42, %v9955_v38  ;;  %v7016_v41 = vrot.slane %v7006_v55, %v9991_v22  ;;  %v7023_v35 = vrot.slane %v7007_v33, %v9991_v22  ;;  %v7030_v47 = vrot.slane %v7008_v56, %v9991_v22 }
 0x483   : > { %v7037_v21 = vrot.slane %v7009_v25, %v9991_v22  ;;  %v6858_v36 = vcombine.low %v6850_v24, %v6857_v46  ;;  %v6715_v49 = vcombine.low %v3909_v40, %v3913_v63  ;;  %v3917_v1 = vrot.slane %v12527_v43, %v12385_v23 }
 0x484   : > { %v3921_v16 = vrot.slane %v12527_v43, %v12386_v0  ;;  %7730 = vperm.xlu1 %8318, %v11958_v20   ;;  %v7114_v42 = vrot.slane %v7104_v18, %v9991_v22  ;;  %v7121_v48 = vrot.slane %v7105_v30, %v9991_v22  ;;  %v7128_v37 = vrot.slane %v7106_v6, %v9991_v22 }
 0x485   : > { %v7135_v50 = vrot.slane %v7107_v8, %v9991_v22  ;;  %v7202_v9 = vcombine.low %v4205_v13, %v4209_v7  ;;  %v7203_v26 = vcombine.low %v4213_v60, %v4217_v61  ;;  %v7204_v53 = vcombine.low %v4221_v52, %v4225_v4  ;;  %v12077_v52 = vpop.permute.xlu0 %7664 }
 0x486   : > { %v7205_v40 = vcombine.low %v4229_v45, %v4233_v51  ;;  %v6948_v27 = vrot.slane %v6940_v17, %v9991_v22  ;;  %v6955_v54 = vrot.slane %v6941_v57, %v9991_v22  ;;  %v7038_v2 = vcombine.low %v7016_v41, %v7023_v35 }
 0x487   : > { %v7039_v14 = vcombine.low %v7030_v47, %v7037_v21  ;;  %v3925_v20 = vrot.slane %v12527_v43, %v12388_v62  ;;  %v3929_v39 = vrot.slane %v12527_v43, %v12389_v32  ;;  %v3933_v58 = vrot.slane %v12527_v43, %v9942_v12 }
 0x488   : > { %v3937_v59 = vrot.slane %v12527_v43, %v9945_v5  ;;  %7739 = vperm.xlu1 %8318, %v6858_v36   ;;  %v7136_v19 = vcombine.low %v7114_v42, %v7121_v48  ;;  %v7137_v44 = vcombine.low %v7128_v37, %v7135_v50  ;;  %v3941_v63 = vrot.slane %v12527_v43, %v9951_v34 }
 0x489   : > { %v3945_v24 = vrot.slane %v12527_v43, %v9955_v38  ;;  %v7212_v46 = vrot.slane %v7202_v9, %v9991_v22  ;;  %v7219_v17 = vrot.slane %v7203_v26, %v9991_v22  ;;  %v7226_v57 = vrot.slane %v7204_v53, %v9991_v22  ;;  %v2340_v36 = vpop.xlane.xlu0 %2339 }
 0x48a   : > { %v7233_v55 = vrot.slane %v7205_v40, %v9991_v22  ;;  %v6956_v33 = vcombine.low %v6948_v27, %v6955_v54  ;;  %v7046_v56 = vrot.slane %v7038_v2, %v9991_v22  ;;  %v7053_v25 = vrot.slane %v7039_v14, %v9991_v22 }
 0x48b   : > { %v6722_v18 = vrot.slane %v12013_v10, %v9991_v22  ;;  %v6729_v30 = vrot.slane %v12015_v28, %v9991_v22  ;;  %v6736_v6 = vrot.slane %v12017_v11, %v9991_v22  ;;  %v6743_v8 = vrot.slane %v6715_v49, %v9991_v22 }
 0x48c   : > { %7745 = vperm.xlu1 %8318, %v6956_v33   ;;  %v6761_v13 = vcombine.low %v3917_v1, %v3921_v16  ;;  %v6762_v7 = vcombine.low %v3925_v20, %v3929_v39  ;;  %v6763_v60 = vcombine.low %v3933_v58, %v3937_v59  ;;  %v6764_v61 = vcombine.low %v3941_v63, %v3945_v24 }
 0x48d   : > { %v7144_v4 = vrot.slane %v7136_v19, %v9991_v22  ;;  %v7151_v45 = vrot.slane %v7137_v44, %v9991_v22  ;;  %v7234_v10 = vcombine.low %v7212_v46, %v7219_v17  ;;  %v7235_v51 = vcombine.low %v7226_v57, %v7233_v55 }
 0x48e   : > { %v7054_v41 = vcombine.low %v7046_v56, %v7053_v25  ;;  %v6744_v28 = vcombine.low %v6722_v18, %v6729_v30  ;;  %v6745_v35 = vcombine.low %v6736_v6, %v6743_v8  ;;  %v6771_v11 = vrot.slane %v6761_v13, %v9991_v22 }
 0x48f   : > { %v6778_v47 = vrot.slane %v6762_v7, %v9991_v22  ;;  %v6785_v21 = vrot.slane %v6763_v60, %v9991_v22  ;;  %v7152_v49 = vcombine.low %v7144_v4, %v7151_v45  ;;  %v7242_v43 = vrot.slane %v7234_v10, %v9991_v22 }
 0x490   : > { %7751 = vperm.xlu1 %8318, %v7054_v41   ;;  %v7249_v1 = vrot.slane %v7235_v51, %v9991_v22  ;;  %v6792_v16 = vrot.slane %v6764_v61, %v9991_v22  ;;  %v4397_v42 = vrot.slane %v2340_v36, %v12385_v23  ;;  %v4401_v48 = vrot.slane %v2340_v36, %v12386_v0  ;;  %v12528_v41 = vld [vmem:[#allocation41_spill] sm:$0xff] }
 0x491   : > { %v4405_v37 = vrot.slane %v2340_v36, %v12388_v62  ;;  %v4409_v50 = vrot.slane %v2340_v36, %v12389_v32  ;;  %v4413_v9 = vrot.slane %v2340_v36, %v9942_v12  ;;  %v4417_v26 = vrot.slane %v2340_v36, %v9945_v5 }
 0x492   : > { %v4421_v53 = vrot.slane %v2340_v36, %v9951_v34  ;;  %v4425_v40 = vrot.slane %v2340_v36, %v9955_v38  ;;  %v6752_v27 = vrot.slane %v6744_v28, %v9991_v22  ;;  %v7250_v54 = vcombine.low %v7242_v43, %v7249_v1 }
 0x493   : > { %v6759_v2 = vrot.slane %v6745_v35, %v9991_v22  ;;  %v6793_v14 = vcombine.low %v6771_v11, %v6778_v47  ;;  %v6794_v20 = vcombine.low %v6785_v21, %v6792_v16  ;;  %v7496_v39 = vcombine.low %v4397_v42, %v4401_v48  ;;  %v12529_v35 = vld [vmem:[#allocation40_spill] sm:$0xff] }
 0x494   : > { %7757 = vperm.xlu1 %8318, %v7152_v49   ;;  %v7497_v58 = vcombine.low %v4405_v37, %v4409_v50  ;;  %v7498_v59 = vcombine.low %v4413_v9, %v4417_v26  ;;  %v7499_v19 = vcombine.low %v4421_v53, %v4425_v40  ;;  %v7934_v28 = vrot.slane %v12077_v52, %v12528_v41 }
 0x495   : > { %v6760_v44 = vcombine.low %v6752_v27, %v6759_v2  ;;  %v6801_v63 = vrot.slane %v6793_v14, %v9991_v22  ;;  %v6808_v24 = vrot.slane %v6794_v20, %v9991_v22  ;;  %v7506_v17 = vrot.slane %v7496_v39, %v9991_v22  ;;  %v7671_v27 = vpop.permute.xlu0 %7670 }
 0x496   : > { %v7513_v57 = vrot.slane %v7497_v58, %v9991_v22  ;;  %v7520_v55 = vrot.slane %v7498_v59, %v9991_v22  ;;  %v7527_v33 = vrot.slane %v7499_v19, %v9991_v22 }
 0x497   : > { %v6809_v60 = vcombine.low %v6801_v63, %v6808_v24 }
 0x498   : > { %7763 = vperm.xlu1 %8318, %v7250_v54   ;;  %v7528_v43 = vcombine.low %v7506_v17, %v7513_v57  ;;  %v7529_v1 = vcombine.low %v7520_v55, %v7527_v33  ;;  %v12530_v57 = vld [vmem:[#allocation45_spill] sm:$0xff]  ;;  %v12531_v55 = vld [vmem:[#allocation46_spill] sm:$0xff] }
 0x49a   : > { %v7536_v9 = vrot.slane %v7528_v43, %v9991_v22  ;;  %v7543_v26 = vrot.slane %v7529_v1, %v9991_v22 }
 0x49b   : > { %v2335_v46 = vpop.xlane.xlu1 %2334 }
 0x49c   : > { %7733 = vperm.xlu1 %8318, %v6760_v44   ;;  %v4365_v56 = vrot.slane %v2335_v46, %v12385_v23  ;;  %v4369_v25 = vrot.slane %v2335_v46, %v12386_v0  ;;  %v4373_v18 = vrot.slane %v2335_v46, %v12388_v62  ;;  %v4377_v30 = vrot.slane %v2335_v46, %v12389_v32  ;;  %v7677_v44 = vpop.permute.xlu0 %7676 }
 0x49d   : > { %v4381_v6 = vrot.slane %v2335_v46, %v9942_v12  ;;  %v4385_v8 = vrot.slane %v2335_v46, %v9945_v5  ;;  %v4389_v13 = vrot.slane %v2335_v46, %v9951_v34  ;;  %v4393_v7 = vrot.slane %v2335_v46, %v9955_v38 }
 0x49e   : > { %v7447_v61 = vcombine.low %v4365_v56, %v4369_v25  ;;  %v7448_v4 = vcombine.low %v4373_v18, %v4377_v30  ;;  %v7544_v40 = vcombine.low %v7536_v9, %v7543_v26 }
 0x49f   : > { %v7662_v45 = vpop.permute.xlu1 %7661  ;;  %v7449_v10 = vcombine.low %v4381_v6, %v4385_v8  ;;  %v7450_v51 = vcombine.low %v4389_v13, %v4393_v7  ;;  %v12532_v6 = vld [vmem:[#allocation47_spill] sm:$0xff]  ;;  %v12533_v7 = vld [vmem:[#allocation48_spill] sm:$0xff] }
 0x4a0   : > { %v7929_v11 = vrot.slane %v7662_v45, %v12529_v35  ;;  %7736 = vperm.xlu1 %8318, %v6809_v60   ;;  %v7457_v47 = vrot.slane %v7447_v61, %v9991_v22  ;;  %v7464_v21 = vrot.slane %v7448_v4, %v9991_v22  ;;  %v7683_v30 = vpop.permute.xlu0 %7682  ;;  %v7954_v60 = vrot.slane %v7677_v44, %v12533_v7 }
 0x4a1   : > { %v7471_v36 = vrot.slane %v7449_v10, %v9991_v22  ;;  %v7478_v49 = vrot.slane %v7450_v51, %v9991_v22 }
 0x4a2   : > { %v7930_v16 = vsel %vm7832_vm6, %v7929_v11, %v11925_v3  ;;  %v7479_v42 = vcombine.low %v7457_v47, %v7464_v21  ;;  %v12535_v47 = vld [vmem:[#allocation15_spill] sm:$0xff] }
 0x4a3   : > { %v7480_v48 = vcombine.low %v7471_v36, %v7478_v49  ;;  %v7935_v52 = vsel %vm7839_vm7, %v7934_v28, %v7930_v16  ;;  %v12534_v28 = vld [vmem:[#allocation10_spill] sm:$0xff]  ;;  %v7964_v21 = vrot.slane %v7683_v30, %v12535_v47 }
 0x4a4   : > { %v7487_v37 = vrot.slane %v7479_v42, %v9991_v22  ;;  %v7689_v36 = vpop.permute.xlu0 %7688  ;;  %v12536_v42 = vld [vmem:[#allocation19_spill] sm:$0xff] }
 0x4a5   : > { %v7494_v50 = vrot.slane %v7480_v48, %v9991_v22  ;;  %v7974_v48 = vrot.slane %v7689_v36, %v12536_v42 }
 0x4a7   : > { %v7495_v53 = vcombine.low %v7487_v37, %v7494_v50  ;;  %v12537_v50 = vld [vmem:[#allocation22_spill] sm:$0xff] }
 0x4a9   : > { %7778 = vperm.xlu0 %8317, %v7495_v53  }
 0x4ad   : > { %7781 = vperm.xlu0 %8317, %v7544_v40  }
 0x4d0   : > { %v2345_v54 = vpop.xlane.xlu1 %2344 }
 0x4d1   : > { %v4429_v3 = vrot.slane %v2345_v54, %v12385_v23  ;;  %v4433_v2 = vrot.slane %v2345_v54, %v12386_v0  ;;  %v4437_v14 = vrot.slane %v2345_v54, %v12388_v62  ;;  %v4441_v20 = vrot.slane %v2345_v54, %v12389_v32 }
 0x4d2   : > { %v4445_v39 = vrot.slane %v2345_v54, %v9942_v12  ;;  %v4449_v58 = vrot.slane %v2345_v54, %v9945_v5  ;;  %v4453_v59 = vrot.slane %v2345_v54, %v9951_v34  ;;  %v4457_v19 = vrot.slane %v2345_v54, %v9955_v38 }
 0x4d3   : > { %v7545_v63 = vcombine.low %v4429_v3, %v4433_v2  ;;  %v7546_v24 = vcombine.low %v4437_v14, %v4441_v20  ;;  %v7944_v12 = vrot.slane %v7671_v27, %v12531_v55  ;;  %v7695_v27 = vpop.permute.xlu0 %7694 }
 0x4d4   : > { %v7668_v46 = vpop.permute.xlu1 %7667  ;;  %v7547_v17 = vcombine.low %v4445_v39, %v4449_v58  ;;  %v7548_v23 = vcombine.low %v4453_v59, %v4457_v19 }
 0x4d5   : > { %v7939_v0 = vrot.slane %v7668_v46, %v12530_v57  ;;  %v7555_v62 = vrot.slane %v7545_v63, %v9991_v22  ;;  %v7562_v32 = vrot.slane %v7546_v24, %v9991_v22 }
 0x4d6   : > { %v7569_v5 = vrot.slane %v7547_v17, %v9991_v22  ;;  %v7576_v34 = vrot.slane %v7548_v23, %v9991_v22 }
 0x4d7   : > { %v7940_v38 = vsel %vm7846_vm8, %v7939_v0, %v7935_v52  ;;  %v7577_v33 = vcombine.low %v7555_v62, %v7562_v32  ;;  %v7701_v3 = vpop.permute.xlu0 %7700 }
 0x4d8   : > { %v7674_v56 = vpop.permute.xlu1 %7673  ;;  %v7945_v25 = vsel %vm7853_vm9, %v7944_v12, %v7940_v38  ;;  %v7578_v18 = vcombine.low %v7569_v5, %v7576_v34  ;;  %v12538_v12 = vld [vmem:[#allocation31_spill] sm:$0xff]  ;;  %v12539_v34 = vld [vmem:[#allocation34_spill] sm:$0xff] }
 0x4d9   : > { %v7949_v8 = vrot.slane %v7674_v56, %v12532_v6  ;;  %v7585_v13 = vrot.slane %v7577_v33, %v9991_v22  ;;  %v12540_v33 = vld [vmem:[#allocation30_spill] sm:$0xff] }
 0x4da   : > { %v7592_v61 = vrot.slane %v7578_v18, %v9991_v22 }
 0x4db   : > { %v7950_v4 = vsel %vm7860_vm10, %v7949_v8, %v7945_v25  ;;  %v7707_v14 = vpop.permute.xlu0 %7706 }
 0x4dc   : > { %v7680_v45 = vpop.permute.xlu1 %7679  ;;  %v7955_v10 = vsel %vm7867_vm11, %v7954_v60, %v7950_v4  ;;  %v7593_v51 = vcombine.low %v7585_v13, %v7592_v61  ;;  %v12541_v60 = vld [vmem:[#allocation35_spill] sm:$0xff] }
 0x4dd   : > { %v7959_v11 = vrot.slane %v7680_v45, %v12534_v28 }
 0x4de   : > { %7784 = vperm.xlu0 %8317, %v7593_v51  }
 0x4df   : > { %v7960_v49 = vsel %vm7874_vm12, %v7959_v11, %v7955_v10  ;;  %v7713_v39 = vpop.permute.xlu0 %7712  ;;  %v7983_v10 = vrot.slane %v7695_v27, %v12540_v33 }
 0x4e0   : > { %v7686_v43 = vpop.permute.xlu1 %7685  ;;  %v7965_v1 = vsel %vm7881_vm13, %v7964_v21, %v7960_v49 }
 0x4e1   : > { %v7969_v16 = vrot.slane %v7686_v43, %v11305_v15 }
 0x4e3   : > { %v7970_v52 = vsel %vm7888_vm14, %v7969_v16, %v7965_v1  ;;  %v12163_v59 = vpop.permute.xlu0 %7718 }
 0x4e4   : > { %v12155_v37 = vsel %vm7895_vm15, %v7974_v48, %v7970_v52  ;;  %v7692_v26 = vpop.permute.xlu1 %7691  ;;  %v7993_v52 = vrot.slane %v7701_v3, %v12541_v60 }
 0x4e5   : > { %v8134_v9 = vcombine.low %v12537_v50, %v12155_v37  ;;  %v7979_v4 = vrot.slane %v7692_v26, %v12538_v12 }
 0x4e7   : > { %v7743_v44 = vpop.permute.xlu0 %7742  ;;  %v7984_v43 = vsel %vm7797_vm1, %v7983_v10, %v7979_v4 }
 0x4e8   : > { %v7698_v53 = vpop.permute.xlu1 %7697  ;;  %v8062_v56 = vrot.slane %v7743_v44, %v12540_v33  ;;  %v8013_v33 = vrot.slane %v7713_v39, %v12528_v41 }
 0x4e9   : > { %v7988_v45 = vrot.slane %v7698_v53, %v12539_v34 }
 0x4eb   : > { %v7749_v24 = vpop.permute.xlu0 %7748  ;;  %v7989_v16 = vsel %vm7804_vm2, %v7988_v45, %v7984_v43 }
 0x4ec   : > { %v7704_v40 = vpop.permute.xlu1 %7703  ;;  %v8072_v61 = vrot.slane %v7749_v24, %v12541_v60  ;;  %v7994_v24 = vsel %vm7811_vm3, %v7993_v52, %v7989_v16 }
 0x4ed   : > { %v7998_v48 = vrot.slane %v7704_v40, %v12523_v31 }
 0x4ef   : > { %v7755_v17 = vpop.permute.xlu0 %7754 }
 0x4f0   : > { %v7710_v54 = vpop.permute.xlu1 %7709  ;;  %v8082_v49 = vrot.slane %v7755_v17, %v12522_v29  ;;  %v7999_v17 = vsel %vm7818_vm4, %v7998_v48, %v7994_v24 }
 0x4f3   : > { %v7761_v0 = vpop.permute.xlu0 %7760 }
 0x4f4   : > { %v7716_v2 = vpop.permute.xlu1 %7715  ;;  %v8092_v44 = vrot.slane %v7761_v0, %v12528_v41 }
 0x4f7   : > { %v7767_v62 = vpop.permute.xlu0 %7766 }
 0x4f8   : > { %v12159_v20 = vpop.permute.xlu1 %7721  ;;  %v8102_v3 = vrot.slane %v7767_v62, %v12531_v55 }
 0x4f9   : > { %v8028_v62 = vrot.slane %v12159_v20, %v12532_v6 }
 0x4fb   : > { %v7770_v25 = vpop.permute.xlu0 %7769 }
 0x4fc   : > { %v12161_v58 = vpop.permute.xlu1 %7724 }
 0x4fd   : > { %v8033_v41 = vrot.slane %v12161_v58, %v12533_v7 }
 0x4ff   : > { %v7773_v51 = vpop.permute.xlu0 %7772 }
 0x500   : > { %v12165_v19 = vpop.permute.xlu1 %7727 }
 0x504   : > { %v12167_v63 = vpop.permute.xlu1 %7730 }
 0x508   : > { %v7740_v46 = vpop.permute.xlu1 %7739 }
 0x509   : > { %v8058_v5 = vrot.slane %v7740_v46, %v12538_v12  ;;  %v7776_v46 = vpop.permute.xlu0 %7775 }
 0x50b   : > { %v8063_v18 = vsel %vm7797_vm1, %v8062_v56, %v8058_v5 }
 0x50c   : > { %v7746_v23 = vpop.permute.xlu1 %7745 }
 0x50d   : > { %v8067_v38 = vrot.slane %v7746_v23, %v12539_v34  ;;  %v8008_v23 = vrot.slane %v7710_v54, %v12529_v35  ;;  %v8018_v34 = vrot.slane %v7716_v2, %v12530_v57  ;;  %v8112_v2 = vrot.slane %v7773_v51, %v12533_v7 }
 0x50f   : > { %v8068_v8 = vsel %vm7804_vm2, %v8067_v38, %v8063_v18 }
 0x510   : > { %v7752_v32 = vpop.permute.xlu1 %7751  ;;  %v8073_v11 = vsel %vm7811_vm3, %v8072_v61, %v8068_v8 }
 0x511   : > { %v8077_v13 = vrot.slane %v7752_v32, %v12523_v31  ;;  %v8003_v32 = vrot.slane %v7707_v14, %v12522_v29  ;;  %v8107_v29 = vrot.slane %v7770_v25, %v12532_v6  ;;  %v8038_v25 = vrot.slane %v12165_v19, %v12534_v28 }
 0x512   : > { %v8043_v6 = vrot.slane %v12167_v63, %v12535_v47 }
 0x513   : > { %v8078_v21 = vsel %vm7818_vm4, %v8077_v13, %v8073_v11  ;;  %v8004_v12 = vsel %vm7825_vm5, %v8003_v32, %v7999_v17 }
 0x514   : > { %v7758_v30 = vpop.permute.xlu1 %7757  ;;  %v8083_v26 = vsel %vm7825_vm5, %v8082_v49, %v8078_v21  ;;  %v8009_v0 = vsel %vm7832_vm6, %v8008_v23, %v8004_v12  ;;  %v8142_v21 = vrot.slane %v8134_v9, %v9991_v22 }
 0x515   : > { %v8087_v36 = vrot.slane %v7758_v30, %v12529_v35  ;;  %v8014_v54 = vsel %vm7839_vm7, %v8013_v33, %v8009_v0 }
 0x516   : > { %v8019_v14 = vsel %vm7846_vm8, %v8018_v34, %v8014_v54 }
 0x517   : > { %v8088_v53 = vsel %vm7832_vm6, %v8087_v36, %v8083_v26 }
 0x518   : > { %v7764_v1 = vpop.permute.xlu1 %7763  ;;  %v8093_v31 = vsel %vm7839_vm7, %v8092_v44, %v8088_v53 }
 0x519   : > { %v8097_v27 = vrot.slane %v7764_v1, %v12530_v57  ;;  %v8023_v57 = vrot.slane %v12163_v59, %v12531_v55  ;;  %v8117_v55 = vrot.slane %v7776_v46, %v12534_v28 }
 0x51b   : > { %v8098_v40 = vsel %vm7846_vm8, %v8097_v27, %v8093_v31  ;;  %v8024_v30 = vsel %vm7853_vm9, %v8023_v57, %v8019_v14 }
 0x51c   : > { %v7734_v38 = vpop.permute.xlu1 %7733  ;;  %v8103_v35 = vsel %vm7853_vm9, %v8102_v3, %v8098_v40  ;;  %v8029_v59 = vsel %vm7860_vm10, %v8028_v62, %v8024_v30 }
 0x51d   : > { %v8108_v56 = vsel %vm7860_vm10, %v8107_v29, %v8103_v35  ;;  %v8048_v7 = vrot.slane %v7734_v38, %v11305_v15  ;;  %v8034_v19 = vsel %vm7867_vm11, %v8033_v41, %v8029_v59 }
 0x51e   : > { %v8113_v20 = vsel %vm7867_vm11, %v8112_v2, %v8108_v56  ;;  %v8039_v63 = vsel %vm7874_vm12, %v8038_v25, %v8034_v19 }
 0x51f   : > { %v8118_v60 = vsel %vm7874_vm12, %v8117_v55, %v8113_v20 }
 0x520   : > { %v7737_v18 = vpop.permute.xlu1 %7736 }
 0x521   : > { %v8053_v13 = vrot.slane %v7737_v18, %v12536_v42 }
 0x528   : > { %v7779_v5 = vpop.permute.xlu0 %7778 }
 0x529   : > { %v8122_v8 = vrot.slane %v7779_v5, %v12535_v47  ;;  %v8044_v47 = vsel %vm7881_vm13, %v8043_v6, %v8039_v63 }
 0x52a   : > { %v8049_v45 = vsel %vm7888_vm14, %v8048_v7, %v8044_v47 }
 0x52b   : > { %v8123_v28 = vsel %vm7881_vm13, %v8122_v8, %v8118_v60  ;;  %v8054_v10 = vsel %vm7895_vm15, %v8053_v13, %v8049_v45 }
 0x52c   : > { %v7782_v39 = vpop.permute.xlu0 %7781 }
 0x52d   : > { %v8127_v58 = vrot.slane %v7782_v39, %v11305_v15 }
 0x52f   : > { %v8128_v15 = vsel %vm7888_vm14, %v8127_v58, %v8123_v28 }
 0x55d   : > { %v7785_v61 = vpop.permute.xlu0 %7784 }
 0x55e   : > { %v8132_v4 = vrot.slane %v7785_v61, %v12536_v42  ;;  %v12542_v42 = vlaneseq }
 0x560   : > { %v8133_v51 = vsel %vm7895_vm15, %v8132_v4, %v8128_v15  ;;  %vm8161_vm0 = vcmp.lt.s32.totalorder %v12542_v42, 512 }
 0x561   : > { %v8135_v11 = vcombine.low %v8054_v10, %v8133_v51 }
 0x563   : > { %v8149_v36 = vrot.slane %v8135_v11, %v9991_v22 }
 0x565   : > { %v8150_v49 = vcombine.low %v8142_v21, %v8149_v36 }
 0x567   : > { %v8157_v43 = vrot.slane %v8150_v49, %v9991_v22 }
 0x569   : > { %8163 = vst.msk [vmem:[%s217_s11] sm:$0xf] %vm8161_vm0, %v8157_v43 }
 0x56a PF: > { %s14_s15 = sadd.s32 1, %s8349_s15  }
 0x56b   : > { %p11_p5 = scmp.ge.s32.totalorder %s14_s15, 4  }
 0x56d   :  { %13 = sbr.rel (!%p11_p5) target bundleno = 1 (0x1), region = 66 }

</bundles_post_ra>
